<compile_context>
chip_gen: v5e
topology: v5e:2x2
jax: 0.10.0
libtpu: 0.0.40
codegen_flags: <defaults>
</compile_context>

<pallas_src>
import functools

import jax
import jax.numpy as jnp
import numpy as np
from jax.experimental import pallas as pl
from jax.experimental.pallas import tpu as pltpu


def _round_up(x, m):
    return (x + m - 1) // m * m


def _pad_gates_cols(w, H, Hp):
    """Pad the last (3H) gate axis [r|z|n] to 3Hp, zero-padding each gate block."""
    if Hp == H:
        return w
    r, z, n = w[..., :H], w[..., H:2 * H], w[..., 2 * H:]
    widths = [(0, 0)] * (w.ndim - 1) + [(0, Hp - H)]
    pad = lambda a: jnp.pad(a, widths)
    return jnp.concatenate([pad(r), pad(z), pad(n)], axis=-1)


# ----------------------------------------------------------------------------
# Kernel: grid = (batch_tiles, time_blocks).  One grid step advances BOTH
# directions by TBLK timesteps for one batch tile.  Forward consumes the x
# time-block `t`, backward consumes the mirrored block (nT-1-t) and walks it in
# reverse.  Hidden states live in VMEM scratch and are carried across the
# sequential ("arbitrary") time axis; they are reset at t == 0 (i.e. once per
# batch tile, since time is the innermost grid axis).
# ----------------------------------------------------------------------------
def _birnn_gru_kernel(len_ref, xf_ref, xb_ref, wih_ref, whh_ref, bih_ref,
                      bhh_ref, out_f_ref, out_b_ref, h_ref):
    f32, bf16 = jnp.float32, jnp.bfloat16
    tblk = xf_ref.shape[0]          # timesteps per grid step (static)
    Hp = h_ref.shape[-1]            # lane-aligned hidden width (static)
    tb = pl.program_id(1)
    Tp = pl.num_programs(1) * tblk  # padded sequence length

    @pl.when(tb == 0)
    def _():
        h_ref[...] = jnp.zeros_like(h_ref)

    lens = len_ref[...]             # (TB, 1) int32 valid lengths (resident)

    # Resident weights (bf16 MXU operands) / biases (f32).
    wih_f, wih_b = wih_ref[0], wih_ref[1]   # (I, 3Hp)
    whh_f, whh_b = whh_ref[0], whh_ref[1]   # (Hp, 3Hp)
    bih_f, bih_b = bih_ref[0], bih_ref[1]   # (1, 3Hp)
    bhh_f, bhh_b = bhh_ref[0], bhh_ref[1]   # (1, 3Hp)

    h_f = h_ref[0]                  # (TB, Hp) f32 carries
    h_b = h_ref[1]

    def gru_step(gi, gh, h, valid):
        # gi = W_ih x + b_ih ; gh = W_hh h + b_hh  (both f32, gate order r|z|n)
        r = jax.nn.sigmoid(gi[:, :Hp] + gh[:, :Hp])
        z = jax.nn.sigmoid(gi[:, Hp:2 * Hp] + gh[:, Hp:2 * Hp])
        n = jnp.tanh(gi[:, 2 * Hp:] + r * gh[:, 2 * Hp:])
        h_new = (1.0 - z) * n + z * h
        h_upd = jnp.where(valid, h_new, h)            # freeze beyond valid length
        return h_upd, jnp.where(valid, h_upd, 0.0)    # padding positions emit 0

    # Statically unrolled inner time loop (short, fixed trip count).
    for s in range(tblk):
        t_f = tb * tblk + s                 # forward global time
        t_b = Tp - 1 - t_f                  # backward global time
        # Input-to-hidden (K = I, tiny) and recurrent (K = Hp) matmuls, both
        # on-chip: bf16 operands, f32 accumulate.
        gi_f = jnp.dot(xf_ref[s], wih_f, preferred_element_type=f32) + bih_f
        gi_b = jnp.dot(xb_ref[tblk - 1 - s], wih_b,
                       preferred_element_type=f32) + bih_b
        gh_f = jnp.dot(h_f.astype(bf16), whh_f, preferred_element_type=f32) + bhh_f
        gh_b = jnp.dot(h_b.astype(bf16), whh_b, preferred_element_type=f32) + bhh_b

        h_f, o_f = gru_step(gi_f, gh_f, h_f, t_f < lens)
        h_b, o_b = gru_step(gi_b, gh_b, h_b, t_b < lens)

        out_f_ref[s] = o_f
        out_b_ref[tblk - 1 - s] = o_b       # backward output lands at its own t

    h_ref[0] = h_f
    h_ref[1] = h_b


# ----------------------------------------------------------------------------
# Wrapper: padding/layout prep + pallas_call.
# ----------------------------------------------------------------------------
@functools.partial(jax.jit, static_argnames=("batch_block", "time_block"))
def birnn_forward(x_btI, len_s, params, batch_block=None, time_block=8):
    """x_btI: (B, T, I) float32 padded batch-first input (un-packed equivalent
    of the packed batch); len_s: (B,) int32 valid lengths.
    Returns (enc_sents, len_s) with enc_sents of shape (T, B, 2*H) — seq-major
    like torch.nn.utils.rnn.pad_packed_sequence, zeros beyond each length."""
    B, T, I = x_btI.shape
    H = params["whh_f"].shape[0]

    Hp = _round_up(H, 128)                      # lane-aligned hidden width
    Bp = _round_up(B, 16)                       # sublane-aligned (bf16-friendly) batch
    TB = Bp if batch_block is None else int(batch_block)
    if Bp % TB != 0 or TB % 8 != 0:
        raise ValueError("batch_block must be a multiple of 8 dividing the padded batch")
    nb = Bp // TB
    TBLK = min(int(time_block), T)              # timesteps per grid step
    Tp = _round_up(T, TBLK)
    nT = Tp // TBLK

    f32, bf16 = jnp.float32, jnp.bfloat16

    # Gate-aligned, zero-padded parameters.  Padded gate columns / padded W_hh
    # rows are zero, so with h0 = 0 the padded hidden lanes [H:Hp] stay exactly
    # zero for the whole sequence.
    wih = jnp.stack([_pad_gates_cols(params["wih_f"].astype(f32), H, Hp),
                     _pad_gates_cols(params["wih_b"].astype(f32), H, Hp)]
                    ).astype(bf16)                                           # (2, I, 3Hp)

    def pad_whh(w):
        w = jnp.pad(w.astype(f32), ((0, Hp - H), (0, 0)))
        return _pad_gates_cols(w, H, Hp)

    whh = jnp.stack([pad_whh(params["whh_f"]),
                     pad_whh(params["whh_b"])]).astype(bf16)                 # (2, Hp, 3Hp)
    bih = jnp.stack([_pad_gates_cols(params["bih_f"].astype(f32), H, Hp),
                     _pad_gates_cols(params["bih_b"].astype(f32), H, Hp)])[:, None, :]  # (2,1,3Hp)
    bhh = jnp.stack([_pad_gates_cols(params["bhh_f"].astype(f32), H, Hp),
                     _pad_gates_cols(params["bhh_b"].astype(f32), H, Hp)])[:, None, :]  # (2,1,3Hp)

    # Time-major bf16 input stream (cast BEFORE the transpose: half the bytes
    # moved).  No precomputed GI array — the kernel does x@W_ih on-chip.
    x_tbi = jnp.transpose(x_btI.astype(bf16), (1, 0, 2))                     # (T, B, I)
    x_tbi = jnp.pad(x_tbi, ((0, Tp - T), (0, Bp - B), (0, 0)))               # (Tp, Bp, I)

    lens = jnp.pad(len_s.astype(jnp.int32), (0, Bp - B))[:, None]            # (Bp, 1); pad rows -> len 0

    grid_spec = pltpu.PrefetchScalarGridSpec(
        num_scalar_prefetch=0,
        grid=(nb, nT),
        in_specs=[
            pl.BlockSpec((TB, 1), lambda b, t: (b, 0)),                       # lengths (resident)
            pl.BlockSpec((TBLK, TB, I), lambda b, t: (t, b, 0)),              # x, forward blocks
            pl.BlockSpec((TBLK, TB, I), lambda b, t: (nT - 1 - t, b, 0)),     # x, mirrored blocks
            pl.BlockSpec((2, I, 3 * Hp), lambda b, t: (0, 0, 0)),             # W_ih (fwd,bwd) bf16
            pl.BlockSpec((2, Hp, 3 * Hp), lambda b, t: (0, 0, 0)),            # W_hh (fwd,bwd) bf16
            pl.BlockSpec((2, 1, 3 * Hp), lambda b, t: (0, 0, 0)),             # b_ih f32
            pl.BlockSpec((2, 1, 3 * Hp), lambda b, t: (0, 0, 0)),             # b_hh f32
        ],
        out_specs=[
            pl.BlockSpec((TBLK, TB, Hp), lambda b, t: (t, b, 0)),             # forward outputs
            pl.BlockSpec((TBLK, TB, Hp), lambda b, t: (nT - 1 - t, b, 0)),    # backward outputs
        ],
        scratch_shapes=[pltpu.VMEM((2, TB, Hp), f32)],                        # fwd/bwd hidden carry
    )

    out_f, out_b = pl.pallas_call(
        _birnn_gru_kernel,
        out_shape=[jax.ShapeDtypeStruct((Tp, Bp, Hp), f32),
                   jax.ShapeDtypeStruct((Tp, Bp, Hp), f32)],
        grid_spec=grid_spec,
        compiler_params=pltpu.CompilerParams(
            # batch tiles are independent (v7x: sharded across the 2 TCs);
            # the time axis is the sequential recurrence and MUST stay innermost.
            dimension_semantics=("parallel", "arbitrary"),
        ),
    )(lens, x_tbi, x_tbi, wih, whh, bih, bhh)

    enc_sents = jnp.concatenate([out_f[:T, :B, :H], out_b[:T, :B, :H]], axis=-1)  # (T, B, 2H)
    return enc_sents, len_s


# ----------------------------------------------------------------------------
# Pure-JAX reference mirroring the same dtype policy (bf16 MXU operands,
# f32 accumulate/gate math) and packed-sequence masking semantics.
# ----------------------------------------------------------------------------
def birnn_reference(x_btI, len_s, params):
    B, T, I = x_btI.shape
    H = params["whh_f"].shape[0]
    x_bf = x_btI.astype(jnp.bfloat16)

    def run(wih, whh, bih, bhh, reverse):
        gi_all = jnp.einsum("bti,ig->btg", x_bf, wih.astype(jnp.bfloat16),
                            preferred_element_type=jnp.float32) + bih          # (B, T, 3H)
        whh_bf = whh.astype(jnp.bfloat16)
        h = jnp.zeros((B, H), jnp.float32)
        outs = [None] * T
        order = range(T - 1, -1, -1) if reverse else range(T)
        for t in order:
            gi = gi_all[:, t]
            gh = jnp.dot(h.astype(jnp.bfloat16), whh_bf,
                         preferred_element_type=jnp.float32) + bhh
            r = jax.nn.sigmoid(gi[:, :H] + gh[:, :H])
            z = jax.nn.sigmoid(gi[:, H:2 * H] + gh[:, H:2 * H])
            n = jnp.tanh(gi[:, 2 * H:] + r * gh[:, 2 * H:])
            h_new = (1.0 - z) * n + z * h
            valid = (t < len_s)[:, None]
            h = jnp.where(valid, h_new, h)
            outs[t] = jnp.where(valid, h, 0.0)
        return jnp.stack(outs)                                                  # (T, B, H)

    out_f = run(params["wih_f"], params["whh_f"], params["bih_f"], params["bhh_f"], False)
    out_b = run(params["wih_b"], params["whh_b"], params["bih_b"], params["bhh_b"], True)
    return jnp.concatenate([out_f, out_b], axis=-1)


def init_params(key, inp_size, hid_size):
    """PyTorch-style uniform(-1/sqrt(H), 1/sqrt(H)) GRU weights, stored
    pre-transposed for right-multiplication: W_ih -> (I, 3H), W_hh -> (H, 3H),
    gate order [r | z | n]."""
    k = 1.0 / np.sqrt(hid_size)
    keys = jax.random.split(key, 8)
    u = lambda kk, shape: jax.random.uniform(kk, shape, jnp.float32, -k, k)
    return {
        "wih_f": u(keys[0], (inp_size, 3 * hid_size)),
        "whh_f": u(keys[1], (hid_size, 3 * hid_size)),
        "bih_f": u(keys[2], (3 * hid_size,)),
        "bhh_f": u(keys[3], (3 * hid_size,)),
        "wih_b": u(keys[4], (inp_size, 3 * hid_size)),
        "whh_b": u(keys[5], (hid_size, 3 * hid_size)),
        "bih_b": u(keys[6], (3 * hid_size,)),
        "bhh_b": u(keys[7], (3 * hid_size,)),
    }


if __name__ == "__main__":
    B, T, I, H = 16, 8, 16, 32

    key = jax.random.PRNGKey(0)
    kx, kp = jax.random.split(key)
    x = jax.random.normal(kx, (B, T, I), jnp.float32)                 # padded batch-first input
    len_s = jnp.array([8, 5, 8, 3, 7, 6, 8, 2, 4, 8, 1, 6, 7, 3, 5, 8],
                      jnp.int32)                                      # per-sequence lengths (max == T)
    params = init_params(kp, I, H)

    ref = birnn_reference(x, len_s, params)

    # Config 1 (default): whole padded batch as one tile, time blocked by 4
    # (2 time blocks -> exercises the cross-block hidden-state carry).
    enc_sents, lens_out = birnn_forward(x, len_s, params, time_block=4)
    enc_sents = jax.block_until_ready(enc_sents)
    np.testing.assert_allclose(np.asarray(enc_sents), np.asarray(ref),
                               rtol=2e-3, atol=2e-3)

    # Config 2: two batch tiles ("parallel" axis) with the whole sequence in
    # one time block (exercises the per-tile hidden-state reset).
    enc2, _ = birnn_forward(x, len_s, params, batch_block=8, time_block=8)
    enc2 = jax.block_until_ready(enc2)
    np.testing.assert_allclose(np.asarray(enc2), np.asarray(ref),
                               rtol=2e-3, atol=2e-3)

    assert enc_sents.shape == (T, B, 2 * H)
    assert np.array_equal(np.asarray(lens_out), np.asarray(len_s))

    print("KERNEL_OK")
</pallas_src>

<mosaic_0001>
module attributes {stable_mosaic.version = 11 : i64} {
  func.func @_birnn_gru_kernel(%arg0: i32, %arg1: i32, %arg2: memref<16x1xi32, #tpu.memory_space<vmem>>, %arg3: memref<4x16x16xbf16, #tpu.memory_space<vmem>>, %arg4: memref<4x16x16xbf16, #tpu.memory_space<vmem>>, %arg5: memref<2x16x384xbf16, #tpu.memory_space<vmem>>, %arg6: memref<2x128x384xbf16, #tpu.memory_space<vmem>>, %arg7: memref<2x1x384xf32, #tpu.memory_space<vmem>>, %arg8: memref<2x1x384xf32, #tpu.memory_space<vmem>>, %arg9: memref<4x16x128xf32, #tpu.memory_space<vmem>>, %arg10: memref<4x16x128xf32, #tpu.memory_space<vmem>>, %arg11: memref<2x16x128xf32, #tpu.memory_space<vmem>>) attributes {dimension_semantics = [#tpu.dimension_semantics<parallel>, #tpu.dimension_semantics<arbitrary>], iteration_bounds = array<i64: 1, 2>, scalar_prefetch = 0 : i64, scratch_operands = 1 : i64, tpu.core_type = #tpu.core_type<tc>, window_params = [{transform_indices = @transform_0, window_bounds = array<i64: 16, 1>}, {transform_indices = @transform_1, window_bounds = array<i64: 4, 16, 16>}, {transform_indices = @transform_2, window_bounds = array<i64: 4, 16, 16>}, {pipeline_mode = #tpu.pipeline_mode<synchronous>, transform_indices = @transform_3, window_bounds = array<i64: 2, 16, 384>}, {pipeline_mode = #tpu.pipeline_mode<synchronous>, transform_indices = @transform_4, window_bounds = array<i64: 2, 128, 384>}, {pipeline_mode = #tpu.pipeline_mode<synchronous>, transform_indices = @transform_5, window_bounds = array<i64: 2, 1, 384>}, {pipeline_mode = #tpu.pipeline_mode<synchronous>, transform_indices = @transform_6, window_bounds = array<i64: 2, 1, 384>}, {transform_indices = @transform_7, window_bounds = array<i64: 4, 16, 128>}, {transform_indices = @transform_8, window_bounds = array<i64: 4, 16, 128>}]} {
    %c0_i32 = arith.constant 0 : i32
    %0 = arith.cmpi eq, %arg1, %c0_i32 : i32
    %1 = arith.extui %0 : i1 to i32
    %c0_i32_0 = arith.constant 0 : i32
    %2 = arith.cmpi ne, %1, %c0_i32_0 : i32
    scf.if %2 {
      %cst_137 = arith.constant 0.000000e+00 : f32
      %418 = vector.broadcast %cst_137 : f32 to vector<2x16x128xf32>
      %c0_138 = arith.constant 0 : index
      %c0_139 = arith.constant 0 : index
      %c0_140 = arith.constant 0 : index
      %419 = vector.load %arg11[%c0_138, %c0_139, %c0_140] : memref<2x16x128xf32, #tpu.memory_space<vmem>>, vector<2x16x128xf32>
      tpu.vector_store %arg11[%c0_138, %c0_139, %c0_140], %418 {strides = array<i32>} : memref<2x16x128xf32, #tpu.memory_space<vmem>>, vector<2x16x128xf32>,
    } else {
    }
    %c0 = arith.constant 0 : index
    %c0_1 = arith.constant 0 : index
    %3 = vector.load %arg2[%c0, %c0_1] : memref<16x1xi32, #tpu.memory_space<vmem>>, vector<16x1xi32>
    %c0_2 = arith.constant 0 : index
    %c0_3 = arith.constant 0 : index
    %c0_4 = arith.constant 0 : index
    %4 = vector.load %arg5[%c0_2, %c0_3, %c0_4] : memref<2x16x384xbf16, #tpu.memory_space<vmem>>, vector<1x16x384xbf16>
    %5 = vector.shape_cast %4 : vector<1x16x384xbf16> to vector<16x384xbf16>
    %c1 = arith.constant 1 : index
    %c0_5 = arith.constant 0 : index
    %c0_6 = arith.constant 0 : index
    %6 = vector.load %arg5[%c1, %c0_5, %c0_6] : memref<2x16x384xbf16, #tpu.memory_space<vmem>>, vector<1x16x384xbf16>
    %7 = vector.shape_cast %6 : vector<1x16x384xbf16> to vector<16x384xbf16>
    %c0_7 = arith.constant 0 : index
    %c0_8 = arith.constant 0 : index
    %c0_9 = arith.constant 0 : index
    %8 = vector.load %arg6[%c0_7, %c0_8, %c0_9] : memref<2x128x384xbf16, #tpu.memory_space<vmem>>, vector<1x128x384xbf16>
    %9 = vector.shape_cast %8 : vector<1x128x384xbf16> to vector<128x384xbf16>
    %c1_10 = arith.constant 1 : index
    %c0_11 = arith.constant 0 : index
    %c0_12 = arith.constant 0 : index
    %10 = vector.load %arg6[%c1_10, %c0_11, %c0_12] : memref<2x128x384xbf16, #tpu.memory_space<vmem>>, vector<1x128x384xbf16>
    %11 = vector.shape_cast %10 : vector<1x128x384xbf16> to vector<128x384xbf16>
    %c0_13 = arith.constant 0 : index
    %c0_14 = arith.constant 0 : index
    %c0_15 = arith.constant 0 : index
    %12 = vector.load %arg7[%c0_13, %c0_14, %c0_15] : memref<2x1x384xf32, #tpu.memory_space<vmem>>, vector<1x1x384xf32>
    %13 = vector.shape_cast %12 : vector<1x1x384xf32> to vector<1x384xf32>
    %c1_16 = arith.constant 1 : index
    %c0_17 = arith.constant 0 : index
    %c0_18 = arith.constant 0 : index
    %14 = vector.load %arg7[%c1_16, %c0_17, %c0_18] : memref<2x1x384xf32, #tpu.memory_space<vmem>>, vector<1x1x384xf32>
    %15 = vector.shape_cast %14 : vector<1x1x384xf32> to vector<1x384xf32>
    %c0_19 = arith.constant 0 : index
    %c0_20 = arith.constant 0 : index
    %c0_21 = arith.constant 0 : index
    %16 = vector.load %arg8[%c0_19, %c0_20, %c0_21] : memref<2x1x384xf32, #tpu.memory_space<vmem>>, vector<1x1x384xf32>
    %17 = vector.shape_cast %16 : vector<1x1x384xf32> to vector<1x384xf32>
    %c1_22 = arith.constant 1 : index
    %c0_23 = arith.constant 0 : index
    %c0_24 = arith.constant 0 : index
    %18 = vector.load %arg8[%c1_22, %c0_23, %c0_24] : memref<2x1x384xf32, #tpu.memory_space<vmem>>, vector<1x1x384xf32>
    %19 = vector.shape_cast %18 : vector<1x1x384xf32> to vector<1x384xf32>
    %c0_25 = arith.constant 0 : index
    %c0_26 = arith.constant 0 : index
    %c0_27 = arith.constant 0 : index
    %20 = vector.load %arg11[%c0_25, %c0_26, %c0_27] : memref<2x16x128xf32, #tpu.memory_space<vmem>>, vector<1x16x128xf32>
    %21 = vector.shape_cast %20 : vector<1x16x128xf32> to vector<16x128xf32>
    %c1_28 = arith.constant 1 : index
    %c0_29 = arith.constant 0 : index
    %c0_30 = arith.constant 0 : index
    %22 = vector.load %arg11[%c1_28, %c0_29, %c0_30] : memref<2x16x128xf32, #tpu.memory_space<vmem>>, vector<1x16x128xf32>
    %23 = vector.shape_cast %22 : vector<1x16x128xf32> to vector<16x128xf32>
    %c4_i32 = arith.constant 4 : i32
    %24 = arith.muli %arg1, %c4_i32 : i32
    %c0_i32_31 = arith.constant 0 : i32
    %25 = arith.addi %24, %c0_i32_31 : i32
    %c7_i32 = arith.constant 7 : i32
    %26 = arith.subi %c7_i32, %25 : i32
    %c0_32 = arith.constant 0 : index
    %c0_33 = arith.constant 0 : index
    %c0_34 = arith.constant 0 : index
    %27 = vector.load %arg3[%c0_32, %c0_33, %c0_34] : memref<4x16x16xbf16, #tpu.memory_space<vmem>>, vector<1x16x16xbf16>
    %28 = vector.shape_cast %27 : vector<1x16x16xbf16> to vector<16x16xbf16>
    %cst = arith.constant dense<0.000000e+00> : vector<16x384xf32>
    %29 = tpu.matmul %28, %5, %cst {dimension_numbers = #tpu.dot_dimension_numbers<[1], [0], [0], [1], [0, 0, 1, 1], [], []>} : vector<16x16xbf16>, vector<16x384xbf16>, vector<16x384xf32> -> vector<16x384xf32>
    %30 = vector.broadcast %13 : vector<1x384xf32> to vector<16x384xf32>
    %31 = arith.addf %29, %30 : vector<16x384xf32>
    %c3 = arith.constant 3 : index
    %c0_35 = arith.constant 0 : index
    %c0_36 = arith.constant 0 : index
    %32 = vector.load %arg4[%c3, %c0_35, %c0_36] : memref<4x16x16xbf16, #tpu.memory_space<vmem>>, vector<1x16x16xbf16>
    %33 = vector.shape_cast %32 : vector<1x16x16xbf16> to vector<16x16xbf16>
    %cst_37 = arith.constant dense<0.000000e+00> : vector<16x384xf32>
    %34 = tpu.matmul %33, %7, %cst_37 {dimension_numbers = #tpu.dot_dimension_numbers<[1], [0], [0], [1], [0, 0, 1, 1], [], []>} : vector<16x16xbf16>, vector<16x384xbf16>, vector<16x384xf32> -> vector<16x384xf32>
    %35 = vector.broadcast %15 : vector<1x384xf32> to vector<16x384xf32>
    %36 = arith.addf %34, %35 : vector<16x384xf32>
    %37 = arith.truncf %21 : vector<16x128xf32> to vector<16x128xbf16>
    %cst_38 = arith.constant dense<0.000000e+00> : vector<16x384xf32>
    %38 = tpu.matmul %37, %9, %cst_38 {dimension_numbers = #tpu.dot_dimension_numbers<[1], [0], [0], [1], [0, 0, 1, 1], [], []>} : vector<16x128xbf16>, vector<128x384xbf16>, vector<16x384xf32> -> vector<16x384xf32>
    %39 = vector.broadcast %17 : vector<1x384xf32> to vector<16x384xf32>
    %40 = arith.addf %38, %39 : vector<16x384xf32>
    %41 = arith.truncf %23 : vector<16x128xf32> to vector<16x128xbf16>
    %cst_39 = arith.constant dense<0.000000e+00> : vector<16x384xf32>
    %42 = tpu.matmul %41, %11, %cst_39 {dimension_numbers = #tpu.dot_dimension_numbers<[1], [0], [0], [1], [0, 0, 1, 1], [], []>} : vector<16x128xbf16>, vector<128x384xbf16>, vector<16x384xf32> -> vector<16x384xf32>
    %43 = vector.broadcast %19 : vector<1x384xf32> to vector<16x384xf32>
    %44 = arith.addf %42, %43 : vector<16x384xf32>
    %45 = vector.broadcast %25 : i32 to vector<16x1xi32>
    %46 = arith.cmpi slt, %45, %3 : vector<16x1xi32>
    %47 = vector.extract_strided_slice %31 {offsets = [0, 0], sizes = [16, 128], strides = [1, 1]} : vector<16x384xf32> to vector<16x128xf32>
    %48 = vector.extract_strided_slice %40 {offsets = [0, 0], sizes = [16, 128], strides = [1, 1]} : vector<16x384xf32> to vector<16x128xf32>
    %49 = arith.addf %47, %48 : vector<16x128xf32>
    %50 = arith.negf %49 : vector<16x128xf32>
    %51 = math.exp %50 : vector<16x128xf32>
    %cst_40 = arith.constant 1.000000e+00 : f32
    %52 = vector.broadcast %cst_40 : f32 to vector<16x128xf32>
    %53 = arith.addf %52, %51 : vector<16x128xf32>
    %54 = arith.divf %52, %53 : vector<16x128xf32>
    %55 = vector.extract_strided_slice %31 {offsets = [0, 128], sizes = [16, 128], strides = [1, 1]} : vector<16x384xf32> to vector<16x128xf32>
    %56 = vector.extract_strided_slice %40 {offsets = [0, 128], sizes = [16, 128], strides = [1, 1]} : vector<16x384xf32> to vector<16x128xf32>
    %57 = arith.addf %55, %56 : vector<16x128xf32>
    %58 = arith.negf %57 : vector<16x128xf32>
    %59 = math.exp %58 : vector<16x128xf32>
    %cst_41 = arith.constant 1.000000e+00 : f32
    %60 = vector.broadcast %cst_41 : f32 to vector<16x128xf32>
    %61 = arith.addf %60, %59 : vector<16x128xf32>
    %62 = arith.divf %60, %61 : vector<16x128xf32>
    %63 = vector.extract_strided_slice %31 {offsets = [0, 256], sizes = [16, 128], strides = [1, 1]} : vector<16x384xf32> to vector<16x128xf32>
    %64 = vector.extract_strided_slice %40 {offsets = [0, 256], sizes = [16, 128], strides = [1, 1]} : vector<16x384xf32> to vector<16x128xf32>
    %65 = arith.mulf %54, %64 : vector<16x128xf32>
    %66 = arith.addf %63, %65 : vector<16x128xf32>
    %67 = math.tanh %66 : vector<16x128xf32>
    %cst_42 = arith.constant 1.000000e+00 : f32
    %68 = vector.broadcast %cst_42 : f32 to vector<16x128xf32>
    %69 = arith.subf %68, %62 : vector<16x128xf32>
    %70 = arith.mulf %69, %67 : vector<16x128xf32>
    %71 = arith.mulf %62, %21 : vector<16x128xf32>
    %72 = arith.addf %70, %71 : vector<16x128xf32>
    %73 = vector.shape_cast %46 : vector<16x1xi1> to vector<16x1xi1>
    %74 = vector.broadcast %73 : vector<16x1xi1> to vector<16x128xi1>
    %75 = arith.select %74, %72, %21 : vector<16x128xi1>, vector<16x128xf32>
    %cst_43 = arith.constant 0.000000e+00 : f32
    %76 = vector.shape_cast %46 : vector<16x1xi1> to vector<16x1xi1>
    %77 = vector.broadcast %76 : vector<16x1xi1> to vector<16x128xi1>
    %78 = vector.broadcast %cst_43 : f32 to vector<16x128xf32>
    %79 = arith.select %77, %75, %78 : vector<16x128xi1>, vector<16x128xf32>
    %80 = vector.broadcast %26 : i32 to vector<16x1xi32>
    %81 = arith.cmpi slt, %80, %3 : vector<16x1xi32>
    %82 = vector.extract_strided_slice %36 {offsets = [0, 0], sizes = [16, 128], strides = [1, 1]} : vector<16x384xf32> to vector<16x128xf32>
    %83 = vector.extract_strided_slice %44 {offsets = [0, 0], sizes = [16, 128], strides = [1, 1]} : vector<16x384xf32> to vector<16x128xf32>
    %84 = arith.addf %82, %83 : vector<16x128xf32>
    %85 = arith.negf %84 : vector<16x128xf32>
    %86 = math.exp %85 : vector<16x128xf32>
    %cst_44 = arith.constant 1.000000e+00 : f32
    %87 = vector.broadcast %cst_44 : f32 to vector<16x128xf32>
    %88 = arith.addf %87, %86 : vector<16x128xf32>
    %89 = arith.divf %87, %88 : vector<16x128xf32>
    %90 = vector.extract_strided_slice %36 {offsets = [0, 128], sizes = [16, 128], strides = [1, 1]} : vector<16x384xf32> to vector<16x128xf32>
    %91 = vector.extract_strided_slice %44 {offsets = [0, 128], sizes = [16, 128], strides = [1, 1]} : vector<16x384xf32> to vector<16x128xf32>
    %92 = arith.addf %90, %91 : vector<16x128xf32>
    %93 = arith.negf %92 : vector<16x128xf32>
    %94 = math.exp %93 : vector<16x128xf32>
    %cst_45 = arith.constant 1.000000e+00 : f32
    %95 = vector.broadcast %cst_45 : f32 to vector<16x128xf32>
    %96 = arith.addf %95, %94 : vector<16x128xf32>
    %97 = arith.divf %95, %96 : vector<16x128xf32>
    %98 = vector.extract_strided_slice %36 {offsets = [0, 256], sizes = [16, 128], strides = [1, 1]} : vector<16x384xf32> to vector<16x128xf32>
    %99 = vector.extract_strided_slice %44 {offsets = [0, 256], sizes = [16, 128], strides = [1, 1]} : vector<16x384xf32> to vector<16x128xf32>
    %100 = arith.mulf %89, %99 : vector<16x128xf32>
    %101 = arith.addf %98, %100 : vector<16x128xf32>
    %102 = math.tanh %101 : vector<16x128xf32>
    %cst_46 = arith.constant 1.000000e+00 : f32
    %103 = vector.broadcast %cst_46 : f32 to vector<16x128xf32>
    %104 = arith.subf %103, %97 : vector<16x128xf32>
    %105 = arith.mulf %104, %102 : vector<16x128xf32>
    %106 = arith.mulf %97, %23 : vector<16x128xf32>
    %107 = arith.addf %105, %106 : vector<16x128xf32>
    %108 = vector.shape_cast %81 : vector<16x1xi1> to vector<16x1xi1>
    %109 = vector.broadcast %108 : vector<16x1xi1> to vector<16x128xi1>
    %110 = arith.select %109, %107, %23 : vector<16x128xi1>, vector<16x128xf32>
    %cst_47 = arith.constant 0.000000e+00 : f32
    %111 = vector.shape_cast %81 : vector<16x1xi1> to vector<16x1xi1>
    %112 = vector.broadcast %111 : vector<16x1xi1> to vector<16x128xi1>
    %113 = vector.broadcast %cst_47 : f32 to vector<16x128xf32>
    %114 = arith.select %112, %110, %113 : vector<16x128xi1>, vector<16x128xf32>
    %c0_48 = arith.constant 0 : index
    %c0_49 = arith.constant 0 : index
    %c0_50 = arith.constant 0 : index
    %115 = vector.load %arg9[%c0_48, %c0_49, %c0_50] : memref<4x16x128xf32, #tpu.memory_space<vmem>>, vector<1x16x128xf32>
    %116 = vector.shape_cast %115 : vector<1x16x128xf32> to vector<16x128xf32>
    %117 = vector.shape_cast %79 : vector<16x128xf32> to vector<1x16x128xf32>
    tpu.vector_store %arg9[%c0_48, %c0_49, %c0_50], %117 {strides = array<i32>} : memref<4x16x128xf32, #tpu.memory_space<vmem>>, vector<1x16x128xf32>,
    %c3_51 = arith.constant 3 : index
    %c0_52 = arith.constant 0 : index
    %c0_53 = arith.constant 0 : index
    %118 = vector.load %arg10[%c3_51, %c0_52, %c0_53] : memref<4x16x128xf32, #tpu.memory_space<vmem>>, vector<1x16x128xf32>
    %119 = vector.shape_cast %118 : vector<1x16x128xf32> to vector<16x128xf32>
    %120 = vector.shape_cast %114 : vector<16x128xf32> to vector<1x16x128xf32>
    tpu.vector_store %arg10[%c3_51, %c0_52, %c0_53], %120 {strides = array<i32>} : memref<4x16x128xf32, #tpu.memory_space<vmem>>, vector<1x16x128xf32>,
    %c4_i32_54 = arith.constant 4 : i32
    %121 = arith.muli %arg1, %c4_i32_54 : i32
    %c1_i32 = arith.constant 1 : i32
    %122 = arith.addi %121, %c1_i32 : i32
    %c7_i32_55 = arith.constant 7 : i32
    %123 = arith.subi %c7_i32_55, %122 : i32
    %c1_56 = arith.constant 1 : index
    %c0_57 = arith.constant 0 : index
    %c0_58 = arith.constant 0 : index
    %124 = vector.load %arg3[%c1_56, %c0_57, %c0_58] : memref<4x16x16xbf16, #tpu.memory_space<vmem>>, vector<1x16x16xbf16>
    %125 = vector.shape_cast %124 : vector<1x16x16xbf16> to vector<16x16xbf16>
    %cst_59 = arith.constant dense<0.000000e+00> : vector<16x384xf32>
    %126 = tpu.matmul %125, %5, %cst_59 {dimension_numbers = #tpu.dot_dimension_numbers<[1], [0], [0], [1], [0, 0, 1, 1], [], []>} : vector<16x16xbf16>, vector<16x384xbf16>, vector<16x384xf32> -> vector<16x384xf32>
    %127 = vector.broadcast %13 : vector<1x384xf32> to vector<16x384xf32>
    %128 = arith.addf %126, %127 : vector<16x384xf32>
    %c2 = arith.constant 2 : index
    %c0_60 = arith.constant 0 : index
    %c0_61 = arith.constant 0 : index
    %129 = vector.load %arg4[%c2, %c0_60, %c0_61] : memref<4x16x16xbf16, #tpu.memory_space<vmem>>, vector<1x16x16xbf16>
    %130 = vector.shape_cast %129 : vector<1x16x16xbf16> to vector<16x16xbf16>
    %cst_62 = arith.constant dense<0.000000e+00> : vector<16x384xf32>
    %131 = tpu.matmul %130, %7, %cst_62 {dimension_numbers = #tpu.dot_dimension_numbers<[1], [0], [0], [1], [0, 0, 1, 1], [], []>} : vector<16x16xbf16>, vector<16x384xbf16>, vector<16x384xf32> -> vector<16x384xf32>
    %132 = vector.broadcast %15 : vector<1x384xf32> to vector<16x384xf32>
    %133 = arith.addf %131, %132 : vector<16x384xf32>
    %134 = arith.truncf %75 : vector<16x128xf32> to vector<16x128xbf16>
    %cst_63 = arith.constant dense<0.000000e+00> : vector<16x384xf32>
    %135 = tpu.matmul %134, %9, %cst_63 {dimension_numbers = #tpu.dot_dimension_numbers<[1], [0], [0], [1], [0, 0, 1, 1], [], []>} : vector<16x128xbf16>, vector<128x384xbf16>, vector<16x384xf32> -> vector<16x384xf32>
    %136 = vector.broadcast %17 : vector<1x384xf32> to vector<16x384xf32>
    %137 = arith.addf %135, %136 : vector<16x384xf32>
    %138 = arith.truncf %110 : vector<16x128xf32> to vector<16x128xbf16>
    %cst_64 = arith.constant dense<0.000000e+00> : vector<16x384xf32>
    %139 = tpu.matmul %138, %11, %cst_64 {dimension_numbers = #tpu.dot_dimension_numbers<[1], [0], [0], [1], [0, 0, 1, 1], [], []>} : vector<16x128xbf16>, vector<128x384xbf16>, vector<16x384xf32> -> vector<16x384xf32>
    %140 = vector.broadcast %19 : vector<1x384xf32> to vector<16x384xf32>
    %141 = arith.addf %139, %140 : vector<16x384xf32>
    %142 = vector.broadcast %122 : i32 to vector<16x1xi32>
    %143 = arith.cmpi slt, %142, %3 : vector<16x1xi32>
    %144 = vector.extract_strided_slice %128 {offsets = [0, 0], sizes = [16, 128], strides = [1, 1]} : vector<16x384xf32> to vector<16x128xf32>
    %145 = vector.extract_strided_slice %137 {offsets = [0, 0], sizes = [16, 128], strides = [1, 1]} : vector<16x384xf32> to vector<16x128xf32>
    %146 = arith.addf %144, %145 : vector<16x128xf32>
    %147 = arith.negf %146 : vector<16x128xf32>
    %148 = math.exp %147 : vector<16x128xf32>
    %cst_65 = arith.constant 1.000000e+00 : f32
    %149 = vector.broadcast %cst_65 : f32 to vector<16x128xf32>
    %150 = arith.addf %149, %148 : vector<16x128xf32>
    %151 = arith.divf %149, %150 : vector<16x128xf32>
    %152 = vector.extract_strided_slice %128 {offsets = [0, 128], sizes = [16, 128], strides = [1, 1]} : vector<16x384xf32> to vector<16x128xf32>
    %153 = vector.extract_strided_slice %137 {offsets = [0, 128], sizes = [16, 128], strides = [1, 1]} : vector<16x384xf32> to vector<16x128xf32>
    %154 = arith.addf %152, %153 : vector<16x128xf32>
    %155 = arith.negf %154 : vector<16x128xf32>
    %156 = math.exp %155 : vector<16x128xf32>
    %cst_66 = arith.constant 1.000000e+00 : f32
    %157 = vector.broadcast %cst_66 : f32 to vector<16x128xf32>
    %158 = arith.addf %157, %156 : vector<16x128xf32>
    %159 = arith.divf %157, %158 : vector<16x128xf32>
    %160 = vector.extract_strided_slice %128 {offsets = [0, 256], sizes = [16, 128], strides = [1, 1]} : vector<16x384xf32> to vector<16x128xf32>
    %161 = vector.extract_strided_slice %137 {offsets = [0, 256], sizes = [16, 128], strides = [1, 1]} : vector<16x384xf32> to vector<16x128xf32>
    %162 = arith.mulf %151, %161 : vector<16x128xf32>
    %163 = arith.addf %160, %162 : vector<16x128xf32>
    %164 = math.tanh %163 : vector<16x128xf32>
    %cst_67 = arith.constant 1.000000e+00 : f32
    %165 = vector.broadcast %cst_67 : f32 to vector<16x128xf32>
    %166 = arith.subf %165, %159 : vector<16x128xf32>
    %167 = arith.mulf %166, %164 : vector<16x128xf32>
    %168 = arith.mulf %159, %75 : vector<16x128xf32>
    %169 = arith.addf %167, %168 : vector<16x128xf32>
    %170 = vector.shape_cast %143 : vector<16x1xi1> to vector<16x1xi1>
    %171 = vector.broadcast %170 : vector<16x1xi1> to vector<16x128xi1>
    %172 = arith.select %171, %169, %75 : vector<16x128xi1>, vector<16x128xf32>
    %cst_68 = arith.constant 0.000000e+00 : f32
    %173 = vector.shape_cast %143 : vector<16x1xi1> to vector<16x1xi1>
    %174 = vector.broadcast %173 : vector<16x1xi1> to vector<16x128xi1>
    %175 = vector.broadcast %cst_68 : f32 to vector<16x128xf32>
    %176 = arith.select %174, %172, %175 : vector<16x128xi1>, vector<16x128xf32>
    %177 = vector.broadcast %123 : i32 to vector<16x1xi32>
    %178 = arith.cmpi slt, %177, %3 : vector<16x1xi32>
    %179 = vector.extract_strided_slice %133 {offsets = [0, 0], sizes = [16, 128], strides = [1, 1]} : vector<16x384xf32> to vector<16x128xf32>
    %180 = vector.extract_strided_slice %141 {offsets = [0, 0], sizes = [16, 128], strides = [1, 1]} : vector<16x384xf32> to vector<16x128xf32>
    %181 = arith.addf %179, %180 : vector<16x128xf32>
    %182 = arith.negf %181 : vector<16x128xf32>
    %183 = math.exp %182 : vector<16x128xf32>
    %cst_69 = arith.constant 1.000000e+00 : f32
    %184 = vector.broadcast %cst_69 : f32 to vector<16x128xf32>
    %185 = arith.addf %184, %183 : vector<16x128xf32>
    %186 = arith.divf %184, %185 : vector<16x128xf32>
    %187 = vector.extract_strided_slice %133 {offsets = [0, 128], sizes = [16, 128], strides = [1, 1]} : vector<16x384xf32> to vector<16x128xf32>
    %188 = vector.extract_strided_slice %141 {offsets = [0, 128], sizes = [16, 128], strides = [1, 1]} : vector<16x384xf32> to vector<16x128xf32>
    %189 = arith.addf %187, %188 : vector<16x128xf32>
    %190 = arith.negf %189 : vector<16x128xf32>
    %191 = math.exp %190 : vector<16x128xf32>
    %cst_70 = arith.constant 1.000000e+00 : f32
    %192 = vector.broadcast %cst_70 : f32 to vector<16x128xf32>
    %193 = arith.addf %192, %191 : vector<16x128xf32>
    %194 = arith.divf %192, %193 : vector<16x128xf32>
    %195 = vector.extract_strided_slice %133 {offsets = [0, 256], sizes = [16, 128], strides = [1, 1]} : vector<16x384xf32> to vector<16x128xf32>
    %196 = vector.extract_strided_slice %141 {offsets = [0, 256], sizes = [16, 128], strides = [1, 1]} : vector<16x384xf32> to vector<16x128xf32>
    %197 = arith.mulf %186, %196 : vector<16x128xf32>
    %198 = arith.addf %195, %197 : vector<16x128xf32>
    %199 = math.tanh %198 : vector<16x128xf32>
    %cst_71 = arith.constant 1.000000e+00 : f32
    %200 = vector.broadcast %cst_71 : f32 to vector<16x128xf32>
    %201 = arith.subf %200, %194 : vector<16x128xf32>
    %202 = arith.mulf %201, %199 : vector<16x128xf32>
    %203 = arith.mulf %194, %110 : vector<16x128xf32>
    %204 = arith.addf %202, %203 : vector<16x128xf32>
    %205 = vector.shape_cast %178 : vector<16x1xi1> to vector<16x1xi1>
    %206 = vector.broadcast %205 : vector<16x1xi1> to vector<16x128xi1>
    %207 = arith.select %206, %204, %110 : vector<16x128xi1>, vector<16x128xf32>
    %cst_72 = arith.constant 0.000000e+00 : f32
    %208 = vector.shape_cast %178 : vector<16x1xi1> to vector<16x1xi1>
    %209 = vector.broadcast %208 : vector<16x1xi1> to vector<16x128xi1>
    %210 = vector.broadcast %cst_72 : f32 to vector<16x128xf32>
    %211 = arith.select %209, %207, %210 : vector<16x128xi1>, vector<16x128xf32>
    %c1_73 = arith.constant 1 : index
    %c0_74 = arith.constant 0 : index
    %c0_75 = arith.constant 0 : index
    %212 = vector.load %arg9[%c1_73, %c0_74, %c0_75] : memref<4x16x128xf32, #tpu.memory_space<vmem>>, vector<1x16x128xf32>
    %213 = vector.shape_cast %212 : vector<1x16x128xf32> to vector<16x128xf32>
    %214 = vector.shape_cast %176 : vector<16x128xf32> to vector<1x16x128xf32>
    tpu.vector_store %arg9[%c1_73, %c0_74, %c0_75], %214 {strides = array<i32>} : memref<4x16x128xf32, #tpu.memory_space<vmem>>, vector<1x16x128xf32>,
    %c2_76 = arith.constant 2 : index
    %c0_77 = arith.constant 0 : index
    %c0_78 = arith.constant 0 : index
    %215 = vector.load %arg10[%c2_76, %c0_77, %c0_78] : memref<4x16x128xf32, #tpu.memory_space<vmem>>, vector<1x16x128xf32>
    %216 = vector.shape_cast %215 : vector<1x16x128xf32> to vector<16x128xf32>
    %217 = vector.shape_cast %211 : vector<16x128xf32> to vector<1x16x128xf32>
    tpu.vector_store %arg10[%c2_76, %c0_77, %c0_78], %217 {strides = array<i32>} : memref<4x16x128xf32, #tpu.memory_space<vmem>>, vector<1x16x128xf32>,
    %c4_i32_79 = arith.constant 4 : i32
    %218 = arith.muli %arg1, %c4_i32_79 : i32
    %c2_i32 = arith.constant 2 : i32
    %219 = arith.addi %218, %c2_i32 : i32
    %c7_i32_80 = arith.constant 7 : i32
    %220 = arith.subi %c7_i32_80, %219 : i32
    %c2_81 = arith.constant 2 : index
    %c0_82 = arith.constant 0 : index
    %c0_83 = arith.constant 0 : index
    %221 = vector.load %arg3[%c2_81, %c0_82, %c0_83] : memref<4x16x16xbf16, #tpu.memory_space<vmem>>, vector<1x16x16xbf16>
    %222 = vector.shape_cast %221 : vector<1x16x16xbf16> to vector<16x16xbf16>
    %cst_84 = arith.constant dense<0.000000e+00> : vector<16x384xf32>
    %223 = tpu.matmul %222, %5, %cst_84 {dimension_numbers = #tpu.dot_dimension_numbers<[1], [0], [0], [1], [0, 0, 1, 1], [], []>} : vector<16x16xbf16>, vector<16x384xbf16>, vector<16x384xf32> -> vector<16x384xf32>
    %224 = vector.broadcast %13 : vector<1x384xf32> to vector<16x384xf32>
    %225 = arith.addf %223, %224 : vector<16x384xf32>
    %c1_85 = arith.constant 1 : index
    %c0_86 = arith.constant 0 : index
    %c0_87 = arith.constant 0 : index
    %226 = vector.load %arg4[%c1_85, %c0_86, %c0_87] : memref<4x16x16xbf16, #tpu.memory_space<vmem>>, vector<1x16x16xbf16>
    %227 = vector.shape_cast %226 : vector<1x16x16xbf16> to vector<16x16xbf16>
    %cst_88 = arith.constant dense<0.000000e+00> : vector<16x384xf32>
    %228 = tpu.matmul %227, %7, %cst_88 {dimension_numbers = #tpu.dot_dimension_numbers<[1], [0], [0], [1], [0, 0, 1, 1], [], []>} : vector<16x16xbf16>, vector<16x384xbf16>, vector<16x384xf32> -> vector<16x384xf32>
    %229 = vector.broadcast %15 : vector<1x384xf32> to vector<16x384xf32>
    %230 = arith.addf %228, %229 : vector<16x384xf32>
    %231 = arith.truncf %172 : vector<16x128xf32> to vector<16x128xbf16>
    %cst_89 = arith.constant dense<0.000000e+00> : vector<16x384xf32>
    %232 = tpu.matmul %231, %9, %cst_89 {dimension_numbers = #tpu.dot_dimension_numbers<[1], [0], [0], [1], [0, 0, 1, 1], [], []>} : vector<16x128xbf16>, vector<128x384xbf16>, vector<16x384xf32> -> vector<16x384xf32>
    %233 = vector.broadcast %17 : vector<1x384xf32> to vector<16x384xf32>
    %234 = arith.addf %232, %233 : vector<16x384xf32>
    %235 = arith.truncf %207 : vector<16x128xf32> to vector<16x128xbf16>
    %cst_90 = arith.constant dense<0.000000e+00> : vector<16x384xf32>
    %236 = tpu.matmul %235, %11, %cst_90 {dimension_numbers = #tpu.dot_dimension_numbers<[1], [0], [0], [1], [0, 0, 1, 1], [], []>} : vector<16x128xbf16>, vector<128x384xbf16>, vector<16x384xf32> -> vector<16x384xf32>
    %237 = vector.broadcast %19 : vector<1x384xf32> to vector<16x384xf32>
    %238 = arith.addf %236, %237 : vector<16x384xf32>
    %239 = vector.broadcast %219 : i32 to vector<16x1xi32>
    %240 = arith.cmpi slt, %239, %3 : vector<16x1xi32>
    %241 = vector.extract_strided_slice %225 {offsets = [0, 0], sizes = [16, 128], strides = [1, 1]} : vector<16x384xf32> to vector<16x128xf32>
    %242 = vector.extract_strided_slice %234 {offsets = [0, 0], sizes = [16, 128], strides = [1, 1]} : vector<16x384xf32> to vector<16x128xf32>
    %243 = arith.addf %241, %242 : vector<16x128xf32>
    %244 = arith.negf %243 : vector<16x128xf32>
    %245 = math.exp %244 : vector<16x128xf32>
    %cst_91 = arith.constant 1.000000e+00 : f32
    %246 = vector.broadcast %cst_91 : f32 to vector<16x128xf32>
    %247 = arith.addf %246, %245 : vector<16x128xf32>
    %248 = arith.divf %246, %247 : vector<16x128xf32>
    %249 = vector.extract_strided_slice %225 {offsets = [0, 128], sizes = [16, 128], strides = [1, 1]} : vector<16x384xf32> to vector<16x128xf32>
    %250 = vector.extract_strided_slice %234 {offsets = [0, 128], sizes = [16, 128], strides = [1, 1]} : vector<16x384xf32> to vector<16x128xf32>
    %251 = arith.addf %249, %250 : vector<16x128xf32>
    %252 = arith.negf %251 : vector<16x128xf32>
    %253 = math.exp %252 : vector<16x128xf32>
    %cst_92 = arith.constant 1.000000e+00 : f32
    %254 = vector.broadcast %cst_92 : f32 to vector<16x128xf32>
    %255 = arith.addf %254, %253 : vector<16x128xf32>
    %256 = arith.divf %254, %255 : vector<16x128xf32>
    %257 = vector.extract_strided_slice %225 {offsets = [0, 256], sizes = [16, 128], strides = [1, 1]} : vector<16x384xf32> to vector<16x128xf32>
    %258 = vector.extract_strided_slice %234 {offsets = [0, 256], sizes = [16, 128], strides = [1, 1]} : vector<16x384xf32> to vector<16x128xf32>
    %259 = arith.mulf %248, %258 : vector<16x128xf32>
    %260 = arith.addf %257, %259 : vector<16x128xf32>
    %261 = math.tanh %260 : vector<16x128xf32>
    %cst_93 = arith.constant 1.000000e+00 : f32
    %262 = vector.broadcast %cst_93 : f32 to vector<16x128xf32>
    %263 = arith.subf %262, %256 : vector<16x128xf32>
    %264 = arith.mulf %263, %261 : vector<16x128xf32>
    %265 = arith.mulf %256, %172 : vector<16x128xf32>
    %266 = arith.addf %264, %265 : vector<16x128xf32>
    %267 = vector.shape_cast %240 : vector<16x1xi1> to vector<16x1xi1>
    %268 = vector.broadcast %267 : vector<16x1xi1> to vector<16x128xi1>
    %269 = arith.select %268, %266, %172 : vector<16x128xi1>, vector<16x128xf32>
    %cst_94 = arith.constant 0.000000e+00 : f32
    %270 = vector.shape_cast %240 : vector<16x1xi1> to vector<16x1xi1>
    %271 = vector.broadcast %270 : vector<16x1xi1> to vector<16x128xi1>
    %272 = vector.broadcast %cst_94 : f32 to vector<16x128xf32>
    %273 = arith.select %271, %269, %272 : vector<16x128xi1>, vector<16x128xf32>
    %274 = vector.broadcast %220 : i32 to vector<16x1xi32>
    %275 = arith.cmpi slt, %274, %3 : vector<16x1xi32>
    %276 = vector.extract_strided_slice %230 {offsets = [0, 0], sizes = [16, 128], strides = [1, 1]} : vector<16x384xf32> to vector<16x128xf32>
    %277 = vector.extract_strided_slice %238 {offsets = [0, 0], sizes = [16, 128], strides = [1, 1]} : vector<16x384xf32> to vector<16x128xf32>
    %278 = arith.addf %276, %277 : vector<16x128xf32>
    %279 = arith.negf %278 : vector<16x128xf32>
    %280 = math.exp %279 : vector<16x128xf32>
    %cst_95 = arith.constant 1.000000e+00 : f32
    %281 = vector.broadcast %cst_95 : f32 to vector<16x128xf32>
    %282 = arith.addf %281, %280 : vector<16x128xf32>
    %283 = arith.divf %281, %282 : vector<16x128xf32>
    %284 = vector.extract_strided_slice %230 {offsets = [0, 128], sizes = [16, 128], strides = [1, 1]} : vector<16x384xf32> to vector<16x128xf32>
    %285 = vector.extract_strided_slice %238 {offsets = [0, 128], sizes = [16, 128], strides = [1, 1]} : vector<16x384xf32> to vector<16x128xf32>
    %286 = arith.addf %284, %285 : vector<16x128xf32>
    %287 = arith.negf %286 : vector<16x128xf32>
    %288 = math.exp %287 : vector<16x128xf32>
    %cst_96 = arith.constant 1.000000e+00 : f32
    %289 = vector.broadcast %cst_96 : f32 to vector<16x128xf32>
    %290 = arith.addf %289, %288 : vector<16x128xf32>
    %291 = arith.divf %289, %290 : vector<16x128xf32>
    %292 = vector.extract_strided_slice %230 {offsets = [0, 256], sizes = [16, 128], strides = [1, 1]} : vector<16x384xf32> to vector<16x128xf32>
    %293 = vector.extract_strided_slice %238 {offsets = [0, 256], sizes = [16, 128], strides = [1, 1]} : vector<16x384xf32> to vector<16x128xf32>
    %294 = arith.mulf %283, %293 : vector<16x128xf32>
    %295 = arith.addf %292, %294 : vector<16x128xf32>
    %296 = math.tanh %295 : vector<16x128xf32>
    %cst_97 = arith.constant 1.000000e+00 : f32
    %297 = vector.broadcast %cst_97 : f32 to vector<16x128xf32>
    %298 = arith.subf %297, %291 : vector<16x128xf32>
    %299 = arith.mulf %298, %296 : vector<16x128xf32>
    %300 = arith.mulf %291, %207 : vector<16x128xf32>
    %301 = arith.addf %299, %300 : vector<16x128xf32>
    %302 = vector.shape_cast %275 : vector<16x1xi1> to vector<16x1xi1>
    %303 = vector.broadcast %302 : vector<16x1xi1> to vector<16x128xi1>
    %304 = arith.select %303, %301, %207 : vector<16x128xi1>, vector<16x128xf32>
    %cst_98 = arith.constant 0.000000e+00 : f32
    %305 = vector.shape_cast %275 : vector<16x1xi1> to vector<16x1xi1>
    %306 = vector.broadcast %305 : vector<16x1xi1> to vector<16x128xi1>
    %307 = vector.broadcast %cst_98 : f32 to vector<16x128xf32>
    %308 = arith.select %306, %304, %307 : vector<16x128xi1>, vector<16x128xf32>
    %c2_99 = arith.constant 2 : index
    %c0_100 = arith.constant 0 : index
    %c0_101 = arith.constant 0 : index
    %309 = vector.load %arg9[%c2_99, %c0_100, %c0_101] : memref<4x16x128xf32, #tpu.memory_space<vmem>>, vector<1x16x128xf32>
    %310 = vector.shape_cast %309 : vector<1x16x128xf32> to vector<16x128xf32>
    %311 = vector.shape_cast %273 : vector<16x128xf32> to vector<1x16x128xf32>
    tpu.vector_store %arg9[%c2_99, %c0_100, %c0_101], %311 {strides = array<i32>} : memref<4x16x128xf32, #tpu.memory_space<vmem>>, vector<1x16x128xf32>,
    %c1_102 = arith.constant 1 : index
    %c0_103 = arith.constant 0 : index
    %c0_104 = arith.constant 0 : index
    %312 = vector.load %arg10[%c1_102, %c0_103, %c0_104] : memref<4x16x128xf32, #tpu.memory_space<vmem>>, vector<1x16x128xf32>
    %313 = vector.shape_cast %312 : vector<1x16x128xf32> to vector<16x128xf32>
    %314 = vector.shape_cast %308 : vector<16x128xf32> to vector<1x16x128xf32>
    tpu.vector_store %arg10[%c1_102, %c0_103, %c0_104], %314 {strides = array<i32>} : memref<4x16x128xf32, #tpu.memory_space<vmem>>, vector<1x16x128xf32>,
    %c4_i32_105 = arith.constant 4 : i32
    %315 = arith.muli %arg1, %c4_i32_105 : i32
    %c3_i32 = arith.constant 3 : i32
    %316 = arith.addi %315, %c3_i32 : i32
    %c7_i32_106 = arith.constant 7 : i32
    %317 = arith.subi %c7_i32_106, %316 : i32
    %c3_107 = arith.constant 3 : index
    %c0_108 = arith.constant 0 : index
    %c0_109 = arith.constant 0 : index
    %318 = vector.load %arg3[%c3_107, %c0_108, %c0_109] : memref<4x16x16xbf16, #tpu.memory_space<vmem>>, vector<1x16x16xbf16>
    %319 = vector.shape_cast %318 : vector<1x16x16xbf16> to vector<16x16xbf16>
    %cst_110 = arith.constant dense<0.000000e+00> : vector<16x384xf32>
    %320 = tpu.matmul %319, %5, %cst_110 {dimension_numbers = #tpu.dot_dimension_numbers<[1], [0], [0], [1], [0, 0, 1, 1], [], []>} : vector<16x16xbf16>, vector<16x384xbf16>, vector<16x384xf32> -> vector<16x384xf32>
    %321 = vector.broadcast %13 : vector<1x384xf32> to vector<16x384xf32>
    %322 = arith.addf %320, %321 : vector<16x384xf32>
    %c0_111 = arith.constant 0 : index
    %c0_112 = arith.constant 0 : index
    %c0_113 = arith.constant 0 : index
    %323 = vector.load %arg4[%c0_111, %c0_112, %c0_113] : memref<4x16x16xbf16, #tpu.memory_space<vmem>>, vector<1x16x16xbf16>
    %324 = vector.shape_cast %323 : vector<1x16x16xbf16> to vector<16x16xbf16>
    %cst_114 = arith.constant dense<0.000000e+00> : vector<16x384xf32>
    %325 = tpu.matmul %324, %7, %cst_114 {dimension_numbers = #tpu.dot_dimension_numbers<[1], [0], [0], [1], [0, 0, 1, 1], [], []>} : vector<16x16xbf16>, vector<16x384xbf16>, vector<16x384xf32> -> vector<16x384xf32>
    %326 = vector.broadcast %15 : vector<1x384xf32> to vector<16x384xf32>
    %327 = arith.addf %325, %326 : vector<16x384xf32>
    %328 = arith.truncf %269 : vector<16x128xf32> to vector<16x128xbf16>
    %cst_115 = arith.constant dense<0.000000e+00> : vector<16x384xf32>
    %329 = tpu.matmul %328, %9, %cst_115 {dimension_numbers = #tpu.dot_dimension_numbers<[1], [0], [0], [1], [0, 0, 1, 1], [], []>} : vector<16x128xbf16>, vector<128x384xbf16>, vector<16x384xf32> -> vector<16x384xf32>
    %330 = vector.broadcast %17 : vector<1x384xf32> to vector<16x384xf32>
    %331 = arith.addf %329, %330 : vector<16x384xf32>
    %332 = arith.truncf %304 : vector<16x128xf32> to vector<16x128xbf16>
    %cst_116 = arith.constant dense<0.000000e+00> : vector<16x384xf32>
    %333 = tpu.matmul %332, %11, %cst_116 {dimension_numbers = #tpu.dot_dimension_numbers<[1], [0], [0], [1], [0, 0, 1, 1], [], []>} : vector<16x128xbf16>, vector<128x384xbf16>, vector<16x384xf32> -> vector<16x384xf32>
    %334 = vector.broadcast %19 : vector<1x384xf32> to vector<16x384xf32>
    %335 = arith.addf %333, %334 : vector<16x384xf32>
    %336 = vector.broadcast %316 : i32 to vector<16x1xi32>
    %337 = arith.cmpi slt, %336, %3 : vector<16x1xi32>
    %338 = vector.extract_strided_slice %322 {offsets = [0, 0], sizes = [16, 128], strides = [1, 1]} : vector<16x384xf32> to vector<16x128xf32>
    %339 = vector.extract_strided_slice %331 {offsets = [0, 0], sizes = [16, 128], strides = [1, 1]} : vector<16x384xf32> to vector<16x128xf32>
    %340 = arith.addf %338, %339 : vector<16x128xf32>
    %341 = arith.negf %340 : vector<16x128xf32>
    %342 = math.exp %341 : vector<16x128xf32>
    %cst_117 = arith.constant 1.000000e+00 : f32
    %343 = vector.broadcast %cst_117 : f32 to vector<16x128xf32>
    %344 = arith.addf %343, %342 : vector<16x128xf32>
    %345 = arith.divf %343, %344 : vector<16x128xf32>
    %346 = vector.extract_strided_slice %322 {offsets = [0, 128], sizes = [16, 128], strides = [1, 1]} : vector<16x384xf32> to vector<16x128xf32>
    %347 = vector.extract_strided_slice %331 {offsets = [0, 128], sizes = [16, 128], strides = [1, 1]} : vector<16x384xf32> to vector<16x128xf32>
    %348 = arith.addf %346, %347 : vector<16x128xf32>
    %349 = arith.negf %348 : vector<16x128xf32>
    %350 = math.exp %349 : vector<16x128xf32>
    %cst_118 = arith.constant 1.000000e+00 : f32
    %351 = vector.broadcast %cst_118 : f32 to vector<16x128xf32>
    %352 = arith.addf %351, %350 : vector<16x128xf32>
    %353 = arith.divf %351, %352 : vector<16x128xf32>
    %354 = vector.extract_strided_slice %322 {offsets = [0, 256], sizes = [16, 128], strides = [1, 1]} : vector<16x384xf32> to vector<16x128xf32>
    %355 = vector.extract_strided_slice %331 {offsets = [0, 256], sizes = [16, 128], strides = [1, 1]} : vector<16x384xf32> to vector<16x128xf32>
    %356 = arith.mulf %345, %355 : vector<16x128xf32>
    %357 = arith.addf %354, %356 : vector<16x128xf32>
    %358 = math.tanh %357 : vector<16x128xf32>
    %cst_119 = arith.constant 1.000000e+00 : f32
    %359 = vector.broadcast %cst_119 : f32 to vector<16x128xf32>
    %360 = arith.subf %359, %353 : vector<16x128xf32>
    %361 = arith.mulf %360, %358 : vector<16x128xf32>
    %362 = arith.mulf %353, %269 : vector<16x128xf32>
    %363 = arith.addf %361, %362 : vector<16x128xf32>
    %364 = vector.shape_cast %337 : vector<16x1xi1> to vector<16x1xi1>
    %365 = vector.broadcast %364 : vector<16x1xi1> to vector<16x128xi1>
    %366 = arith.select %365, %363, %269 : vector<16x128xi1>, vector<16x128xf32>
    %cst_120 = arith.constant 0.000000e+00 : f32
    %367 = vector.shape_cast %337 : vector<16x1xi1> to vector<16x1xi1>
    %368 = vector.broadcast %367 : vector<16x1xi1> to vector<16x128xi1>
    %369 = vector.broadcast %cst_120 : f32 to vector<16x128xf32>
    %370 = arith.select %368, %366, %369 : vector<16x128xi1>, vector<16x128xf32>
    %371 = vector.broadcast %317 : i32 to vector<16x1xi32>
    %372 = arith.cmpi slt, %371, %3 : vector<16x1xi32>
    %373 = vector.extract_strided_slice %327 {offsets = [0, 0], sizes = [16, 128], strides = [1, 1]} : vector<16x384xf32> to vector<16x128xf32>
    %374 = vector.extract_strided_slice %335 {offsets = [0, 0], sizes = [16, 128], strides = [1, 1]} : vector<16x384xf32> to vector<16x128xf32>
    %375 = arith.addf %373, %374 : vector<16x128xf32>
    %376 = arith.negf %375 : vector<16x128xf32>
    %377 = math.exp %376 : vector<16x128xf32>
    %cst_121 = arith.constant 1.000000e+00 : f32
    %378 = vector.broadcast %cst_121 : f32 to vector<16x128xf32>
    %379 = arith.addf %378, %377 : vector<16x128xf32>
    %380 = arith.divf %378, %379 : vector<16x128xf32>
    %381 = vector.extract_strided_slice %327 {offsets = [0, 128], sizes = [16, 128], strides = [1, 1]} : vector<16x384xf32> to vector<16x128xf32>
    %382 = vector.extract_strided_slice %335 {offsets = [0, 128], sizes = [16, 128], strides = [1, 1]} : vector<16x384xf32> to vector<16x128xf32>
    %383 = arith.addf %381, %382 : vector<16x128xf32>
    %384 = arith.negf %383 : vector<16x128xf32>
    %385 = math.exp %384 : vector<16x128xf32>
    %cst_122 = arith.constant 1.000000e+00 : f32
    %386 = vector.broadcast %cst_122 : f32 to vector<16x128xf32>
    %387 = arith.addf %386, %385 : vector<16x128xf32>
    %388 = arith.divf %386, %387 : vector<16x128xf32>
    %389 = vector.extract_strided_slice %327 {offsets = [0, 256], sizes = [16, 128], strides = [1, 1]} : vector<16x384xf32> to vector<16x128xf32>
    %390 = vector.extract_strided_slice %335 {offsets = [0, 256], sizes = [16, 128], strides = [1, 1]} : vector<16x384xf32> to vector<16x128xf32>
    %391 = arith.mulf %380, %390 : vector<16x128xf32>
    %392 = arith.addf %389, %391 : vector<16x128xf32>
    %393 = math.tanh %392 : vector<16x128xf32>
    %cst_123 = arith.constant 1.000000e+00 : f32
    %394 = vector.broadcast %cst_123 : f32 to vector<16x128xf32>
    %395 = arith.subf %394, %388 : vector<16x128xf32>
    %396 = arith.mulf %395, %393 : vector<16x128xf32>
    %397 = arith.mulf %388, %304 : vector<16x128xf32>
    %398 = arith.addf %396, %397 : vector<16x128xf32>
    %399 = vector.shape_cast %372 : vector<16x1xi1> to vector<16x1xi1>
    %400 = vector.broadcast %399 : vector<16x1xi1> to vector<16x128xi1>
    %401 = arith.select %400, %398, %304 : vector<16x128xi1>, vector<16x128xf32>
    %cst_124 = arith.constant 0.000000e+00 : f32
    %402 = vector.shape_cast %372 : vector<16x1xi1> to vector<16x1xi1>
    %403 = vector.broadcast %402 : vector<16x1xi1> to vector<16x128xi1>
    %404 = vector.broadcast %cst_124 : f32 to vector<16x128xf32>
    %405 = arith.select %403, %401, %404 : vector<16x128xi1>, vector<16x128xf32>
    %c3_125 = arith.constant 3 : index
    %c0_126 = arith.constant 0 : index
    %c0_127 = arith.constant 0 : index
    %406 = vector.load %arg9[%c3_125, %c0_126, %c0_127] : memref<4x16x128xf32, #tpu.memory_space<vmem>>, vector<1x16x128xf32>
    %407 = vector.shape_cast %406 : vector<1x16x128xf32> to vector<16x128xf32>
    %408 = vector.shape_cast %370 : vector<16x128xf32> to vector<1x16x128xf32>
    tpu.vector_store %arg9[%c3_125, %c0_126, %c0_127], %408 {strides = array<i32>} : memref<4x16x128xf32, #tpu.memory_space<vmem>>, vector<1x16x128xf32>,
    %c0_128 = arith.constant 0 : index
    %c0_129 = arith.constant 0 : index
    %c0_130 = arith.constant 0 : index
    %409 = vector.load %arg10[%c0_128, %c0_129, %c0_130] : memref<4x16x128xf32, #tpu.memory_space<vmem>>, vector<1x16x128xf32>
    %410 = vector.shape_cast %409 : vector<1x16x128xf32> to vector<16x128xf32>
    %411 = vector.shape_cast %405 : vector<16x128xf32> to vector<1x16x128xf32>
    tpu.vector_store %arg10[%c0_128, %c0_129, %c0_130], %411 {strides = array<i32>} : memref<4x16x128xf32, #tpu.memory_space<vmem>>, vector<1x16x128xf32>,
    %c0_131 = arith.constant 0 : index
    %c0_132 = arith.constant 0 : index
    %c0_133 = arith.constant 0 : index
    %412 = vector.load %arg11[%c0_131, %c0_132, %c0_133] : memref<2x16x128xf32, #tpu.memory_space<vmem>>, vector<1x16x128xf32>
    %413 = vector.shape_cast %412 : vector<1x16x128xf32> to vector<16x128xf32>
    %414 = vector.shape_cast %366 : vector<16x128xf32> to vector<1x16x128xf32>
    tpu.vector_store %arg11[%c0_131, %c0_132, %c0_133], %414 {strides = array<i32>} : memref<2x16x128xf32, #tpu.memory_space<vmem>>, vector<1x16x128xf32>,
    %c1_134 = arith.constant 1 : index
    %c0_135 = arith.constant 0 : index
    %c0_136 = arith.constant 0 : index
    %415 = vector.load %arg11[%c1_134, %c0_135, %c0_136] : memref<2x16x128xf32, #tpu.memory_space<vmem>>, vector<1x16x128xf32>
    %416 = vector.shape_cast %415 : vector<1x16x128xf32> to vector<16x128xf32>
    %417 = vector.shape_cast %401 : vector<16x128xf32> to vector<1x16x128xf32>
    tpu.vector_store %arg11[%c1_134, %c0_135, %c0_136], %417 {strides = array<i32>} : memref<2x16x128xf32, #tpu.memory_space<vmem>>, vector<1x16x128xf32>,
    return
  }
  func.func @transform_0(%arg0: i32, %arg1: i32) -> (i32, i32) {
    %c0_i32 = arith.constant 0 : i32
    %c0_i32_0 = arith.constant 0 : i32
    return %arg0, %c0_i32 : i32, i32
  }
  func.func @transform_1(%arg0: i32, %arg1: i32) -> (i32, i32, i32) {
    %c0_i32 = arith.constant 0 : i32
    %c0_i32_0 = arith.constant 0 : i32
    return %arg1, %arg0, %c0_i32 : i32, i32, i32
  }
  func.func @transform_2(%arg0: i32, %arg1: i32) -> (i32, i32, i32) {
    %c1_i32 = arith.constant 1 : i32
    %0 = arith.subi %c1_i32, %arg1 : i32
    %c0_i32 = arith.constant 0 : i32
    %c0_i32_0 = arith.constant 0 : i32
    return %0, %arg0, %c0_i32 : i32, i32, i32
  }
  func.func @transform_3(%arg0: i32, %arg1: i32) -> (i32, i32, i32) {
    %c0_i32 = arith.constant 0 : i32
    %c0_i32_0 = arith.constant 0 : i32
    %c0_i32_1 = arith.constant 0 : i32
    %c0_i32_2 = arith.constant 0 : i32
    return %c0_i32, %c0_i32_0, %c0_i32_1 : i32, i32, i32
  }
  func.func @transform_4(%arg0: i32, %arg1: i32) -> (i32, i32, i32) {
    %c0_i32 = arith.constant 0 : i32
    %c0_i32_0 = arith.constant 0 : i32
    %c0_i32_1 = arith.constant 0 : i32
    %c0_i32_2 = arith.constant 0 : i32
    return %c0_i32, %c0_i32_0, %c0_i32_1 : i32, i32, i32
  }
  func.func @transform_5(%arg0: i32, %arg1: i32) -> (i32, i32, i32) {
    %c0_i32 = arith.constant 0 : i32
    %c0_i32_0 = arith.constant 0 : i32
    %c0_i32_1 = arith.constant 0 : i32
    %c0_i32_2 = arith.constant 0 : i32
    return %c0_i32, %c0_i32_0, %c0_i32_1 : i32, i32, i32
  }
  func.func @transform_6(%arg0: i32, %arg1: i32) -> (i32, i32, i32) {
    %c0_i32 = arith.constant 0 : i32
    %c0_i32_0 = arith.constant 0 : i32
    %c0_i32_1 = arith.constant 0 : i32
    %c0_i32_2 = arith.constant 0 : i32
    return %c0_i32, %c0_i32_0, %c0_i32_1 : i32, i32, i32
  }
  func.func @transform_7(%arg0: i32, %arg1: i32) -> (i32, i32, i32) {
    %c0_i32 = arith.constant 0 : i32
    %c0_i32_0 = arith.constant 0 : i32
    return %arg1, %arg0, %c0_i32 : i32, i32, i32
  }
  func.func @transform_8(%arg0: i32, %arg1: i32) -> (i32, i32, i32) {
    %c1_i32 = arith.constant 1 : i32
    %0 = arith.subi %c1_i32, %arg1 : i32
    %c0_i32 = arith.constant 0 : i32
    %c0_i32_0 = arith.constant 0 : i32
    return %0, %arg0, %c0_i32 : i32, i32, i32
  }
}

</mosaic_0001>

<bundles_post_ra>
// kernel: birnn_forward.1
= control target key start
LH: loop header
LB: loop body
LE: loop exit
PB: predicated region body
PF: predicated region fallthrough
CT: control target
= control target key end

     0   :  { %s3451_s27 = smov 0   ;;  %s3453_s28 = smov 0   ;;  %s5034_s0 = inlined_call_operand.vmem [shape: s32[16,1], index: 0, kind: input, shape index: {}]   ;;  %s5035_s1 = inlined_call_operand.vmem [shape: bf16[8,16,16], index: 1, kind: input, shape index: {}, may-alias: {1,2}]   ;;  %s5036_s2 = inlined_call_operand.vmem [shape: bf16[8,16,16], index: 2, kind: input, shape index: {}, may-alias: {1,2}]   ;;  %s5037_s3 = inlined_call_operand.vmem [shape: bf16[2,16,384], index: 3, kind: input, shape index: {}]   ;;  %s5038_s4 = inlined_call_operand.vmem [shape: bf16[2,128,384], index: 4, kind: input, shape index: {}]   ;;  %s5039_s5 = inlined_call_operand.vmem [shape: f32[2,1,384], index: 5, kind: input, shape index: {}]   ;;  %s5040_s6 = inlined_call_operand.vmem [shape: f32[2,1,384], index: 6, kind: input, shape index: {}]   ;;  %s5041_s7 = inlined_call_operand.vmem [shape: f32[8,16,128], index: 7, kind: output, shape index: {0}]   ;;  %s5042_s8 = inlined_call_operand.vmem [shape: f32[8,16,128], index: 8, kind: output, shape index: {1}]  }
   0x1   :  { %s3455_s29 = smov 0  }
   0x2 LB: > { %s28_s30 = sadd.s32 1, %s3398_s28  ;;  %p2740_p0 = scmp.ge.s32.totalorder %s3402_s29, 1  ;;  %s3402_s29 = sphi %s3455_s29, %s19_s29   ;;  %s3398_s28 = sphi %s3453_s28, %s5316_s28   ;;  %s3394_s27 = sphi %s3451_s27, %s5315_s27  }
   0x3   : > { %p29_p1 = scmp.ge.s32.totalorder %s28_s30, 2  ;;  %p326_p2 = scmp.lt.s32.totalorder %s3402_s29, 3 }
   0x5   : > { %s5318_s30 = smov (%p29_p1, %s28_s30), 0  ;;  %p327_p3 = pnand %p2740_p0, %p326_p2 }
   0x7   : > { %330 = sbr.rel (%p327_p3) target bundleno = 853 (0x355), region = 48 }
   0xc   : > { %s3469_s9 = sshll.u32 %s3394_s27, 2  ;;  %s415_s10 = ssub.s32 1, %s3394_s27 }
   0xd   : > { %p405_p4 = scmp.lt.s32.totalorder %s3469_s9, 7  ;;  %s2744_s11 = sshll.u32 %s415_s10, 2 }
   0xe   : > { %p418_p5 = scmp.lt.s32.totalorder %s2744_s11, 7  ;;  %p2753_p6 = scmp.ne.s32.totalorder %s3394_s27, 0 }
   0xf   : > { %s406_s12 = scalar_select %p405_p4, %s3469_s9, 7 }
  0x10   : > { %s5320_s11 = smov (!%p418_p5, %s2744_s11), 7 }
  0x11   : > { %s3123_s13 = sshll.u32 %s406_s12, 3  ;;  %s3125_s14 = sshll.u32 %s406_s12, 4 }
  0x12   : > { %s3476_s17 = scalar_lea.vmem %s5035_s1, %s3123_s13  ;;  %s3124_s18 = sshll.u32 %s5320_s11, 3 }
  0x13   : > { %s3481_s21 = scalar_lea.vmem %s5036_s2, %s3124_s18  ;;  %s3486_s24 = scalar_lea.vmem %s5041_s7, %s3125_s14 }
  0x14   : > { %s3126_s25 = sshll.u32 %s5320_s11, 4  ;;  %459 = sbr.rel (%p2753_p6) target bundleno = 30 (0x1e), region = 52 }
  0x15   : > { %s3491_s12 = scalar_lea.vmem %s5042_s8, %s3126_s25 }
  0x19   : > { %v3404_v0 = vmov 0.0  }
  0x1a   : > { %460 = vst [vmem:[#allocation2 + $0x10] sm:$0xff] %v3404_v0 }
  0x1b   : > { %461 = vst [vmem:[#allocation2] sm:$0xff] %v3404_v0 }
  0x1c   : > { %462 = vst [vmem:[#allocation2 + $0x18] sm:$0xff] %v3404_v0 }
  0x1d   : > { %463 = vst [vmem:[#allocation2 + $0x8] sm:$0xff] %v3404_v0 }
  0x1e PF: > { %v2799_v1 = vld [vmem:[%s5037_s3] sm:$0xf]  ;;  %v3128_v2 = vld [vmem:[%s5037_s3 + $0x8] sm:$0xf0]  ;;  %v3127_v3 = vld [vmem:[%s5037_s3 + $0x4] sm:$0xf] }
  0x1f   : > { %v3502_v4 = vor.u32 %v3128_v2, %v2799_v1  ;;  %v2801_v5 = vld [vmem:[%s5037_s3 + $0xc] sm:$0xf0]  ;;  %v2828_v6 = vld [vmem:[%s5037_s3 + $0x20] sm:$0xf]  ;;  %v3132_v7 = vld [vmem:[%s5037_s3 + $0x28] sm:$0xf0] }
  0x20   : > { %v3513_v8 = vor.u32 %v3127_v3, %v2801_v5  ;;  %v3515_v9 = vor.u32 %v3132_v7, %v2828_v6  ;;  %v3015_v10 = vld [vmem:[%s5038_s4 + $0x168] sm:$0xf]  ;;  %v3179_v11 = vld [vmem:[%s5038_s4 + $0x170] sm:$0xf0]  ;;  %v3524_v12 = vld [vmem:[%s3476_s17] sm:$0xff]  ;;  %vm583_vm0 = vcmask 130048  }
  0x21   : > { %5146 = vst [vmem:[#allocation3_spill] sm:$0xff] %v3502_v4  ;;  %594 = vmatpush.bf16.msra.mxu2 %v3502_v4  ;;  %v3527_v13 = vor.u32 %v3179_v11, %v3015_v10  ;;  %v2807_v14 = vld [vmem:[%s5037_s3 + $0x8] sm:$0xf]  ;;  %v3129_v15 = vld [vmem:[%s5037_s3 + $0x10] sm:$0xf0]  ;;  %v3624_v44 = vld [vmem:[%s3481_s21 + $0x18] sm:$0xff] }
  0x22   : > { %5147 = vst [vmem:[#allocation4_spill] sm:$0xff] %v3513_v8  ;;  %v2820_v16 = vld [vmem:[%s5037_s3 + $0x18] sm:$0xf]  ;;  %608 = vmatpush.bf16.msra.mxu3 %v3513_v8  ;;  %698 = vmatpush.bf16.msra.mxu1 %v3515_v9  ;;  %v3540_v17 = vor.u32 %v3129_v15, %v2807_v14  ;;  %v3131_v18 = vld [vmem:[%s5037_s3 + $0x20] sm:$0xf0]  ;;  %s552_s13 = ssub.s32 7, %s3469_s9 }
  0x23   : > { %5148 = vst [vmem:[#allocation5_spill] sm:$0xff] %v3515_v9  ;;  %v2919_v19 = vld [vmem:[%s5038_s4 + $0xa8] sm:$0xf]  ;;  %v3155_v20 = vld [vmem:[%s5038_s4 + $0xb0] sm:$0xf0]  ;;  %v3552_v21 = vor.u32 %v3131_v18, %v2820_v16  ;;  %s1289_s14 = ssub.s32 6, %s3469_s9 }
  0x24   : > { %5149 = vst [vmem:[#allocation6_spill] sm:$0xff] %v3527_v13  ;;  %v3554_v22 = vor.u32 %v3155_v20, %v2919_v19  ;;  %v3154_v23 = vld [vmem:[%s5038_s4 + $0xac] sm:$0xf]  ;;  %v2921_v24 = vld [vmem:[%s5038_s4 + $0xb4] sm:$0xf0]  ;;  %2809 = vmatmul.msk.bf16.vlgmr.msra.gmra.mxu2 %vm583_vm0, %v3524_v12  ;;  %s1710_s25 = sadd.s32 2, %s3469_s9 }
  0x25   : > { %5150 = vst [vmem:[#allocation7_spill] sm:$0xff] %v3552_v21  ;;  %v3003_v25 = vld [vmem:[%s5038_s4 + $0x150] sm:$0xf]  ;;  %v3567_v26 = vor.u32 %v3154_v23, %v2921_v24  ;;  %v3176_v27 = vld [vmem:[%s5038_s4 + $0x158] sm:$0xf0]  ;;  %2810 = vmatmul.msk.bf16.vlgmr.msra.gmra.mxu3 %vm583_vm0, %v3524_v12  ;;  %622 = vmatpush.bf16.msrb.mxu2 %v3540_v17  ;;  %s1711_s27 = ssub.s32 5, %s3469_s9 }
  0x26   : > { %1019 = vmatpush.bf16.msrb.mxu1 %v3527_v13  ;;  %5151 = vst [vmem:[#allocation8_spill] sm:$0xff] %v3554_v22  ;;  %v2907_v28 = vld [vmem:[%s5038_s4 + $0x90] sm:$0xf]  ;;  %v3152_v29 = vld [vmem:[%s5038_s4 + $0x98] sm:$0xf0]  ;;  %v3581_v30 = vor.u32 %v3176_v27, %v3003_v25  ;;  %670 = vmatpush.bf16.msrb.mxu3 %v3552_v21  ;;  %s2132_s15 = sadd.s32 3, %s3469_s9 }
  0x27   : > { %5152 = vst [vmem:[#allocation9_spill] sm:$0xff] %v3567_v26  ;;  %v3151_v31 = vld [vmem:[%s5038_s4 + $0x94] sm:$0xf]  ;;  %v2909_v32 = vld [vmem:[%s5038_s4 + $0x9c] sm:$0xf0]  ;;  %v3594_v34 = vor.u32 %v3152_v29, %v2907_v28  ;;  %2832 = vmatmul.msk.bf16.vlgmr.msra.gmra.mxu1 %vm583_vm0, %v3624_v44  ;;  %s2133_s11 = ssub.s32 4, %s3469_s9 }
  0x28   : > { %5153 = vst [vmem:[#allocation10_spill] sm:$0xff] %v3581_v30  ;;  %v2991_v33 = vld [vmem:[%s5038_s4 + $0x138] sm:$0xf]  ;;  %v3173_v35 = vld [vmem:[%s5038_s4 + $0x140] sm:$0xf0]  ;;  %v3604_v37 = vor.u32 %v3151_v31, %v2909_v32 }
  0x29   : > { %841 = vmatpush.bf16.msra.mxu2 %v3554_v22  ;;  %5154 = vst [vmem:[#allocation11_spill] sm:$0xff] %v3594_v34  ;;  %v2895_v36 = vld [vmem:[%s5038_s4 + $0x78] sm:$0xf]  ;;  %v3606_v38 = vor.u32 %v3173_v35, %v2991_v33  ;;  %v3149_v39 = vld [vmem:[%s5038_s4 + $0x80] sm:$0xf0] }
  0x2a   : > { %855 = vmatpush.bf16.msra.mxu3 %v3567_v26  ;;  %1020 = vmatpush.bf16.msrb.mxu1 %v3581_v30  ;;  %5155 = vst [vmem:[#allocation12_spill] sm:$0xff] %v3604_v37  ;;  %v3148_v40 = vld [vmem:[%s5038_s4 + $0x7c] sm:$0xf]  ;;  %v2897_v41 = vld [vmem:[%s5038_s4 + $0x84] sm:$0xf0]  ;;  %v3627_v45 = vor.u32 %v3149_v39, %v2895_v36 }
  0x2b   : > { %5156 = vst [vmem:[#allocation13_spill] sm:$0xff] %v3606_v38  ;;  %v2979_v42 = vld [vmem:[%s5038_s4 + $0x120] sm:$0xf]  ;;  %v3170_v43 = vld [vmem:[%s5038_s4 + $0x128] sm:$0xf0]  ;;  %v3633_v46 = vor.u32 %v3148_v40, %v2897_v41 }
  0x2c   : > { %5157 = vst [vmem:[#allocation14_spill] sm:$0xff] %v3627_v45  ;;  %v3635_v47 = vor.u32 %v3170_v43, %v2979_v42  ;;  %v2883_v48 = vld [vmem:[%s5038_s4 + $0x60] sm:$0xf]  ;;  %v3146_v49 = vld [vmem:[%s5038_s4 + $0x68] sm:$0xf0] }
  0x2d   : > { %842 = vmatpush.bf16.msra.mxu2 %v3594_v34  ;;  %5158 = vst [vmem:[#allocation15_spill] sm:$0xff] %v3633_v46  ;;  %v3145_v50 = vld [vmem:[%s5038_s4 + $0x64] sm:$0xf]  ;;  %v2885_v51 = vld [vmem:[%s5038_s4 + $0x6c] sm:$0xf0]  ;;  %v3656_v54 = vor.u32 %v3146_v49, %v2883_v48  ;;  %v3787_v49 = vld [vmem:[#allocation2 + $0x18] sm:$0xff] }
  0x2e   : > { %856 = vmatpush.bf16.msra.mxu3 %v3604_v37  ;;  %1021 = vmatpush.bf16.msrb.mxu1 %v3606_v38  ;;  %5159 = vst [vmem:[#allocation16_spill] sm:$0xff] %v3635_v47  ;;  %v2967_v52 = vld [vmem:[%s5038_s4 + $0x108] sm:$0xf]  ;;  %v3167_v53 = vld [vmem:[%s5038_s4 + $0x110] sm:$0xf0]  ;;  %v3660_v55 = vor.u32 %v3145_v50, %v2885_v51 }
  0x2f   : > { %5160 = vst [vmem:[#allocation17_spill] sm:$0xff] %v3656_v54  ;;  %v3662_v56 = vor.u32 %v3167_v53, %v2967_v52  ;;  %v2871_v57 = vld [vmem:[%s5038_s4 + $0x48] sm:$0xf]  ;;  %v3143_v58 = vld [vmem:[%s5038_s4 + $0x50] sm:$0xf0] }
  0x30   : > { %5161 = vst [vmem:[#allocation18_spill] sm:$0xff] %v3660_v55  ;;  %v3142_v59 = vld [vmem:[%s5038_s4 + $0x4c] sm:$0xf]  ;;  %v2873_v60 = vld [vmem:[%s5038_s4 + $0x54] sm:$0xf0]  ;;  %v3683_v63 = vor.u32 %v3143_v58, %v2871_v57 }
  0x31   : > { %843 = vmatpush.bf16.msra.mxu2 %v3627_v45  ;;  %5162 = vst [vmem:[#allocation19_spill] sm:$0xff] %v3662_v56  ;;  %v2955_v61 = vld [vmem:[%s5038_s4 + $0xf0] sm:$0xf]  ;;  %v3164_v62 = vld [vmem:[%s5038_s4 + $0xf8] sm:$0xf0]  ;;  %v3687_v0 = vor.u32 %v3142_v59, %v2873_v60  ;;  %v3789_v50 = vld [vmem:[#allocation2 + $0x8] sm:$0xff] }
  0x32   : > { %857 = vmatpush.bf16.msra.mxu3 %v3633_v46  ;;  %1022 = vmatpush.bf16.msrb.mxu1 %v3635_v47  ;;  %5163 = vst [vmem:[#allocation20_spill] sm:$0xff] %v3683_v63  ;;  %v3689_v1 = vor.u32 %v3164_v62, %v2955_v61  ;;  %v2859_v2 = vld [vmem:[%s5038_s4 + $0x30] sm:$0xf]  ;;  %v3140_v3 = vld [vmem:[%s5038_s4 + $0x38] sm:$0xf0]  ;;  %v3816_v61 = vpack.c.bf16 %v3789_v50, %v3787_v49  ;;  %v3820_v62 = vld [vmem:[#allocation2] sm:$0xff] }
  0x33   : > { %5164 = vst [vmem:[#allocation21_spill] sm:$0xff] %v3687_v0  ;;  %v3139_v5 = vld [vmem:[%s5038_s4 + $0x34] sm:$0xf]  ;;  %v2861_v6 = vld [vmem:[%s5038_s4 + $0x3c] sm:$0xf0]  ;;  %v3720_v14 = vor.u32 %v3140_v3, %v2859_v2 }
  0x34   : > { %5165 = vst [vmem:[#allocation22_spill] sm:$0xff] %v3689_v1  ;;  %2811 = vmatmul.msk.bf16.vlgmr.msrb.gmra.mxu2 %vm583_vm0, %v3524_v12  ;;  %v2943_v7 = vld [vmem:[%s5038_s4 + $0xd8] sm:$0xf]  ;;  %v3161_v10 = vld [vmem:[%s5038_s4 + $0xe0] sm:$0xf0]  ;;  %v3733_v19 = vor.u32 %v3139_v5, %v2861_v6 }
  0x35   : > { %844 = vmatpush.bf16.msra.mxu2 %v3656_v54  ;;  %2830 = vmatmul.msk.bf16.vlgmr.msrb.gmra.mxu3 %vm583_vm0, %v3624_v44  ;;  %v2847_v11 = vld [vmem:[%s5038_s4 + $0x18] sm:$0xf]  ;;  %v3137_v12 = vld [vmem:[%s5038_s4 + $0x20] sm:$0xf0]  ;;  %5166 = vst [vmem:[#allocation23_spill] sm:$0xff] %v3720_v14  ;;  %v3735_v20 = vor.u32 %v3161_v10, %v2943_v7 }
  0x36   : > { %858 = vmatpush.bf16.msra.mxu3 %v3660_v55  ;;  %1023 = vmatpush.bf16.msrb.mxu1 %v3662_v56  ;;  %v3130_v15 = vld [vmem:[%s5037_s3 + $0x1c] sm:$0xf]  ;;  %v2822_v16 = vld [vmem:[%s5037_s3 + $0x24] sm:$0xf0]  ;;  %v2927_v18 = vld [vmem:[%s5038_s4 + $0xb0] sm:$0xf]  ;;  %v3764_v35 = vor.u32 %v3137_v12, %v2847_v11 }
  0x37   : > { %5167 = vst [vmem:[#allocation24_spill] sm:$0xff] %v3733_v19  ;;  %v3136_v23 = vld [vmem:[%s5038_s4 + $0x1c] sm:$0xf]  ;;  %v2849_v24 = vld [vmem:[%s5038_s4 + $0x24] sm:$0xf0]  ;;  %v3743_v25 = vor.u32 %v3130_v15, %v2822_v16 }
  0x38   : > { %5168 = vst [vmem:[#allocation25_spill] sm:$0xff] %v3735_v20  ;;  %v3156_v27 = vld [vmem:[%s5038_s4 + $0xb8] sm:$0xf0]  ;;  %v2931_v28 = vld [vmem:[%s5038_s4 + $0xc0] sm:$0xf]  ;;  %v3780_v42 = vor.u32 %v3136_v23, %v2849_v24 }
  0x39   : > { %845 = vmatpush.bf16.msra.mxu2 %v3683_v63  ;;  %v3158_v29 = vld [vmem:[%s5038_s4 + $0xc8] sm:$0xf0]  ;;  %v3754_v31 = vor.u32 %v3156_v27, %v2927_v18  ;;  %v2915_v32 = vld [vmem:[%s5038_s4 + $0x98] sm:$0xf]  ;;  %684 = vmatpush.bf16.msra.mxu0 %v3743_v25  ;;  %v3153_v33 = vld [vmem:[%s5038_s4 + $0xa0] sm:$0xf0]  ;;  %v1061_v27 = vstv %s3469_s9 }
  0x3a   : > { %859 = vmatpush.bf16.msra.mxu3 %v3687_v0  ;;  %1024 = vmatpush.bf16.msrb.mxu1 %v3689_v1  ;;  %5170 = vst [vmem:[#allocation27_spill] sm:$0xff] %v3764_v35  ;;  %v2835_v36 = vld [vmem:[%s5038_s4] sm:$0xf]  ;;  %v3134_v39 = vld [vmem:[%s5038_s4 + $0x8] sm:$0xf0]  ;;  %v3776_v41 = vor.u32 %v3153_v33, %v2915_v32  ;;  %v3782_v43 = vor.u32 %v3158_v29, %v2931_v28 }
  0x3b   : > { %5169 = vst [vmem:[#allocation26_spill] sm:$0xff] %v3754_v31  ;;  %v3133_v40 = vld [vmem:[%s5038_s4 + $0x4] sm:$0xf]  ;;  %v2837_v48 = vld [vmem:[%s5038_s4 + $0xc] sm:$0xf0]  ;;  %v3812_v60 = vor.u32 %v3134_v39, %v2835_v36  ;;  %v1172_v39 = vstv %s552_s13 }
  0x3c   : > { %5171 = vst [vmem:[#allocation28_spill] sm:$0xff] %v3776_v41  ;;  %v3178_v51 = vld [vmem:[%s5038_s4 + $0x16c] sm:$0xf]  ;;  %v3017_v52 = vld [vmem:[%s5038_s4 + $0x174] sm:$0xf0]  ;;  %2831 = vmatmul.msk.bf16.vlgmr.msra.gmra.mxu0 %vm583_vm0, %v3624_v44  ;;  %v3818_v44 = vld [vmem:[#allocation2 + $0x10] sm:$0xff]  ;;  %v3825_v2 = vor.u32 %v3133_v40, %v2837_v48 }
  0x3d   : > { %846 = vmatpush.bf16.msra.mxu2 %v3720_v14  ;;  %869 = vmatpush.bf16.msrb.mxu0 %v3754_v31  ;;  %5172 = vst [vmem:[#allocation29_spill] sm:$0xff] %v3780_v42  ;;  %v3023_v53 = vld [vmem:[%s5038_s4 + $0x170] sm:$0xf]  ;;  %v3180_v57 = vld [vmem:[%s5038_s4 + $0x178] sm:$0xf0]  ;;  %v3827_v3 = vor.u32 %v3178_v51, %v3017_v52  ;;  %v3846_v12 = vpack.c.bf16 %v3820_v62, %v3818_v44  ;;  %v3882_v36 = vld [vmem:[%s5034_s0] sm:$0xff] }
  0x3e   : > { %860 = vmatpush.bf16.msra.mxu3 %v3733_v19  ;;  %1025 = vmatpush.bf16.msrb.mxu1 %v3735_v20  ;;  %5173 = vst [vmem:[#allocation30_spill] sm:$0xff] %v3782_v43  ;;  %v2903_v58 = vld [vmem:[%s5038_s4 + $0x80] sm:$0xf]  ;;  %v3150_v59 = vld [vmem:[%s5038_s4 + $0x88] sm:$0xf0]  ;;  %v3830_v5 = vor.u32 %v3180_v57, %v3023_v53  ;;  %v5046_v52 = vmov 0   ;;  %vm1062_vm1 = vcmp.lt.s32.totalorder %v1061_v27, %v3882_v36 }
  0x3f   : > { %5174 = vst [vmem:[#allocation31_spill] sm:$0xff] %v3787_v49  ;;  %v3175_v6 = vld [vmem:[%s5038_s4 + $0x154] sm:$0xf]  ;;  %v3005_v7 = vld [vmem:[%s5038_s4 + $0x15c] sm:$0xf0]  ;;  %v3841_v11 = vor.u32 %v3150_v59, %v2903_v58  ;;  %3215 = vset.pattern.permute.xlu0 %v5046_v52  ;;  %vm1173_vm2 = vcmp.lt.s32.totalorder %v1172_v39, %v3882_v36  ;;  %v1158_v53 = vsel %vm1062_vm1, 1, %v5046_v52  ;;  %3216 = vset.pattern.permute.xlu1 %v5046_v52 }
  0x40   : > { %5175 = vst [vmem:[#allocation32_spill] sm:$0xff] %v3789_v50  ;;  %v3011_v10 = vld [vmem:[%s5038_s4 + $0x158] sm:$0xf]  ;;  %v3177_v15 = vld [vmem:[%s5038_s4 + $0x160] sm:$0xf0]  ;;  %v3861_v23 = vor.u32 %v3175_v6, %v3005_v7  ;;  %v3902_v57 = vld [vmem:[%s5034_s0 + $0x8] sm:$0xff]  ;;  %1161 = vperm.xlu0 %3215, %v1158_v53   ;;  %3217 = vset.pattern.permute.xlu2 %v5046_v52 }
  0x41   : > { %847 = vmatpush.bf16.msra.mxu2 %v3764_v35  ;;  %5176 = vst [vmem:[#allocation33_spill] sm:$0xff] %v3812_v60  ;;  %870 = vmatpush.bf16.msrb.mxu0 %v3776_v41  ;;  %v2891_v16 = vld [vmem:[%s5038_s4 + $0x68] sm:$0xf]  ;;  %v3147_v18 = vld [vmem:[%s5038_s4 + $0x70] sm:$0xf0]  ;;  %v3868_v28 = vor.u32 %v3177_v15, %v3011_v10  ;;  %v1269_v58 = vsel %vm1173_vm2, 1, %v5046_v52  ;;  %vm1063_vm3 = vcmp.lt.s32.totalorder %v1061_v27, %v3902_v57 }
  0x42   : > { %5177 = vst [vmem:[#allocation34_spill] sm:$0xff] %v3818_v44  ;;  %861 = vmatpush.bf16.msra.mxu3 %v3780_v42  ;;  %1026 = vmatpush.bf16.msrb.mxu1 %v3782_v43  ;;  %v3172_v24 = vld [vmem:[%s5038_s4 + $0x13c] sm:$0xf]  ;;  %v2993_v29 = vld [vmem:[%s5038_s4 + $0x144] sm:$0xf0]  ;;  %v3877_v33 = vor.u32 %v3147_v18, %v2891_v16  ;;  %vm1174_vm4 = vcmp.lt.s32.totalorder %v1172_v39, %v3902_v57 }
  0x43   : > { %5178 = vst [vmem:[#allocation35_spill] sm:$0xff] %v3820_v62  ;;  %v2999_v32 = vld [vmem:[%s5038_s4 + $0x140] sm:$0xf]  ;;  %v3174_v40 = vld [vmem:[%s5038_s4 + $0x148] sm:$0xf0]  ;;  %v3907_v59 = vor.u32 %v3172_v24, %v2993_v29  ;;  %1272 = vperm.xlu1 %3216, %v1269_v58   ;;  %v1159_v58 = vsel %vm1063_vm3, 1, %v5046_v52 }
  0x44   : > { %5179 = vst [vmem:[#allocation36_spill] sm:$0xff] %v3825_v2  ;;  %v2879_v48 = vld [vmem:[%s5038_s4 + $0x50] sm:$0xf]  ;;  %v3144_v51 = vld [vmem:[%s5038_s4 + $0x58] sm:$0xf0]  ;;  %v3910_v6 = vor.u32 %v3174_v40, %v2999_v32 }
  0x45   : > { %5180 = vst [vmem:[#allocation37_spill] sm:$0xff] %v3827_v3  ;;  %848 = vmatpush.bf16.msra.mxu2 %v3812_v60  ;;  %1027 = vmatmul.bf16.vlgmr.msrb.gmra.mxu1 %v3816_v61  ;;  %v3169_v7 = vld [vmem:[%s5038_s4 + $0x124] sm:$0xf]  ;;  %v2981_v10 = vld [vmem:[%s5038_s4 + $0x12c] sm:$0xf0]  ;;  %v3922_v16 = vor.u32 %v3144_v51, %v2879_v48 }
  0x46   : > { %5181 = vst [vmem:[#allocation38_spill] sm:$0xff] %v3830_v5  ;;  %1322 = vmatpush.bf16.msra.mxu1 %v3513_v8  ;;  %862 = vmatpush.bf16.msra.mxu3 %v3825_v2  ;;  %v2987_v15 = vld [vmem:[%s5038_s4 + $0x128] sm:$0xf]  ;;  %v3171_v18 = vld [vmem:[%s5038_s4 + $0x130] sm:$0xf0]  ;;  %v3937_v32 = vor.u32 %v3169_v7, %v2981_v10 }
  0x47   : > { %5182 = vst [vmem:[#allocation39_spill] sm:$0xff] %v3841_v11  ;;  %871 = vmatpush.bf16.msrb.mxu0 %v3841_v11  ;;  %v2867_v24 = vld [vmem:[%s5038_s4 + $0x38] sm:$0xf]  ;;  %v3141_v29 = vld [vmem:[%s5038_s4 + $0x40] sm:$0xf0]  ;;  %v3945_v48 = vor.u32 %v3171_v18, %v2987_v15  ;;  %v1593_v15 = vstv %s1289_s14  ;;  %v1270_v18 = vsel %vm1174_vm4, 1, %v5046_v52 }
  0x48   : > { %5183 = vst [vmem:[#allocation40_spill] sm:$0xff] %v3861_v23  ;;  %849 = vmatmul.bf16.vlgmr.msra.gmra.mxu2 %v3846_v12  ;;  %v3166_v40 = vld [vmem:[%s5038_s4 + $0x10c] sm:$0xf]  ;;  %v2969_v27 = vld [vmem:[%s5038_s4 + $0x114] sm:$0xf0]  ;;  %v3954_v53 = vor.u32 %v3141_v29, %v2867_v24  ;;  %1164 = vperm.xlu0 %3215, %v1159_v58   ;;  %vm1594_vm5 = vcmp.lt.s32.totalorder %v1593_v15, %v3882_v36 }
  0x49   : > { %1033 = vmatpush.bf16.msrb.mxu2 %v3827_v3  ;;  %5184 = vst [vmem:[#allocation41_spill] sm:$0xff] %v3868_v28  ;;  %863 = vmatmul.bf16.vlgmr.msra.gmra.mxu3 %v3846_v12  ;;  %v2975_v51 = vld [vmem:[%s5038_s4 + $0x110] sm:$0xf]  ;;  %v3168_v39 = vld [vmem:[%s5038_s4 + $0x118] sm:$0xf0]  ;;  %v3968_v24 = vor.u32 %v3166_v40, %v2969_v27  ;;  %vm1595_vm6 = vcmp.lt.s32.totalorder %v1593_v15, %v3902_v57 }
  0x4a   : > { %1047 = vmatpush.bf16.msrb.mxu3 %v3830_v5  ;;  %5185 = vst [vmem:[#allocation42_spill] sm:$0xff] %v3877_v33  ;;  %1361 = vmatpush.bf16.msrb.mxu1 %v3552_v21  ;;  %v2855_v7 = vld [vmem:[%s5038_s4 + $0x20] sm:$0xf]  ;;  %v3138_v10 = vld [vmem:[%s5038_s4 + $0x28] sm:$0xf0]  ;;  %v3971_v29 = vor.u32 %v3168_v39, %v2975_v51 }
  0x4b   : > { %5186 = vst [vmem:[#allocation43_spill] sm:$0xff] %v3907_v59  ;;  %872 = vmatpush.bf16.msrb.mxu0 %v3877_v33  ;;  %v3163_v21 = vld [vmem:[%s5038_s4 + $0xf4] sm:$0xf]  ;;  %v2957_v50 = vld [vmem:[%s5038_s4 + $0xfc] sm:$0xf0]  ;;  %v3983_v40 = vor.u32 %v3138_v10, %v2855_v7  ;;  %1275 = vperm.xlu1 %3216, %v1270_v18  }
  0x4c   : > { %5187 = vst [vmem:[#allocation44_spill] sm:$0xff] %v3922_v16  ;;  %v2963_v52 = vld [vmem:[%s5038_s4 + $0xf8] sm:$0xf]  ;;  %v3165_v27 = vld [vmem:[%s5038_s4 + $0x100] sm:$0xf0]  ;;  %v3996_v39 = vor.u32 %v3163_v21, %v2957_v50  ;;  %v5196_v21 = vmov 0  }
  0x4d   : > { %1034 = vmatpush.bf16.msrb.mxu2 %v3861_v23  ;;  %5188 = vst [vmem:[#allocation45_spill] sm:$0xff] %v3937_v32  ;;  %v2843_v51 = vld [vmem:[%s5038_s4 + $0x8] sm:$0xf]  ;;  %v3135_v58 = vld [vmem:[%s5038_s4 + $0x10] sm:$0xf0]  ;;  %v4001_v7 = vor.u32 %v3165_v27, %v2963_v52  ;;  %v1690_v50 = vsel %vm1594_vm5, 1, %v5196_v21  ;;  %v4020_v27 = vstv %s1710_s25 }
  0x4e   : > { %1048 = vmatpush.bf16.msrb.mxu3 %v3868_v28  ;;  %5189 = vst [vmem:[#allocation46_spill] sm:$0xff] %v3945_v48  ;;  %v3160_v10 = vld [vmem:[%s5038_s4 + $0xdc] sm:$0xf]  ;;  %v2945_v49 = vld [vmem:[%s5038_s4 + $0xe4] sm:$0xf0]  ;;  %v4010_v18 = vor.u32 %v3135_v58, %v2843_v51  ;;  %v1691_v62 = vsel %vm1595_vm6, 1, %v5196_v21  ;;  %vm1906_vm7 = vcmp.lt.s32.totalorder %v4020_v27, %v3902_v57 }
  0x4f   : > { %873 = vmatpush.bf16.msrb.mxu0 %v3922_v16  ;;  %5190 = vst [vmem:[#allocation47_spill] sm:$0xff] %v3954_v53  ;;  %v2951_v15 = vld [vmem:[%s5038_s4 + $0xe0] sm:$0xf]  ;;  %v3162_v52 = vld [vmem:[%s5038_s4 + $0xe8] sm:$0xf0]  ;;  %v4024_v44 = vor.u32 %v3160_v10, %v2945_v49  ;;  %s1288_s25 = sadd.s32 1, %s3469_s9 }
  0x50   : > { %5191 = vst [vmem:[#allocation48_spill] sm:$0xff] %v3968_v24  ;;  %1693 = vperm.xlu0 %3215, %v1690_v50   ;;  %v4027_v51 = vor.u32 %v3162_v52, %v2951_v15  ;;  %v3157_v58 = vld [vmem:[%s5038_s4 + $0xc4] sm:$0xf]  ;;  %v2939_v49 = vld [vmem:[%s5038_s4 + $0xc8] sm:$0xf]  ;;  %v2002_v52 = vsel %vm1906_vm7, 1, %v5196_v21 }
  0x51   : > { %1035 = vmatpush.bf16.msrb.mxu2 %v3907_v59  ;;  %5192 = vst [vmem:[#allocation49_spill] sm:$0xff] %v3971_v29  ;;  %v3159_v10 = vld [vmem:[%s5038_s4 + $0xd0] sm:$0xf0] }
  0x52   : > { %1049 = vmatpush.bf16.msrb.mxu3 %v3910_v6  ;;  %5193 = vst [vmem:[#allocation50_spill] sm:$0xff] %v3983_v40  ;;  %v4055_v15 = vor.u32 %v3159_v10, %v2939_v49 }
  0x53   : > { %874 = vmatpush.bf16.msrb.mxu0 %v3954_v53  ;;  %5194 = vst [vmem:[#allocation51_spill] sm:$0xff] %v4001_v7  ;;  %1696 = vperm.xlu1 %3216, %v1691_v62   ;;  %v2325_v62 = vstv %s2132_s15 }
  0x54   : > { %5195 = vst [vmem:[#allocation52_spill] sm:$0xff] %v4010_v18  ;;  %vm2326_vm9 = vcmp.lt.s32.totalorder %v2325_v62, %v3882_v36  ;;  %vm2327_vm10 = vcmp.lt.s32.totalorder %v2325_v62, %v3902_v57 }
  0x55   : > { %1036 = vmatpush.bf16.msrb.mxu2 %v3937_v32  ;;  %5197 = vst [vmem:[#allocation53_spill] sm:$0xff] %v4020_v27 }
  0x56   : > { %1050 = vmatpush.bf16.msrb.mxu3 %v3945_v48 }
  0x57   : > { %875 = vmatpush.bf16.msrb.mxu0 %v3983_v40 }
  0x58   : > { %2007 = vperm.xlu0 %3215, %v2002_v52  }
  0x59   : > { %1037 = vmatpush.bf16.msrb.mxu2 %v3968_v24  ;;  %v4036_v24 = vstv %s1711_s27 }
  0x5a   : > { %1051 = vmatpush.bf16.msrb.mxu3 %v3971_v29  ;;  %v2933_v29 = vld [vmem:[%s5038_s4 + $0xcc] sm:$0xf0]  ;;  %5198 = vst [vmem:[#allocation54_spill] sm:$0xff] %v4036_v24  ;;  %vm2016_vm8 = vcmp.lt.s32.totalorder %v4036_v24, %v3882_v36 }
  0x5b   : > { %876 = vmatpush.bf16.msrb.mxu0 %v4010_v18  ;;  %v4048_v50 = vor.u32 %v3157_v58, %v2933_v29  ;;  %v2112_v27 = vsel %vm2016_vm8, 1, %v5196_v21  ;;  %v4072_v29 = vstv %s2133_s11  ;;  %v2423_v58 = vsel %vm2327_vm10, 1, %v5196_v21 }
  0x5c   : > { %2115 = vperm.xlu1 %3216, %v2112_v27   ;;  %5199 = vst [vmem:[#allocation55_spill] sm:$0xff] %v4072_v29  ;;  %vm2438_vm11 = vcmp.lt.s32.totalorder %v4072_v29, %v3902_v57 }
  0x5d   : > { %1038 = vmatpush.bf16.msrb.mxu2 %v3996_v39 }
  0x5e   : > { %1052 = vmatpush.bf16.msrb.mxu3 %v4001_v7  ;;  %877 = vmatmul.bf16.vlgmr.msrb.gmra.mxu0 %v3846_v12  ;;  %v2422_v12 = vsel %vm2326_vm9, 1, %v5196_v21 }
  0x5f   : > { %1308 = vmatpush.bf16.msra.mxu0 %v3502_v4 }
  0x60   : > { %2425 = vperm.xlu0 %3215, %v2422_v12  }
  0x61   : > { %1039 = vmatpush.bf16.msrb.mxu2 %v4024_v44 }
  0x62   : > { %1053 = vmatpush.bf16.msrb.mxu3 %v4027_v51 }
  0x63   : > { %1336 = vmatpush.bf16.msrb.mxu0 %v3540_v17 }
  0x64   : > { %2428 = vperm.xlu1 %3216, %v2423_v58   ;;  %v4099_v58 = vld [vmem:[%s5039_s5 + $0x3] sm:$0x7] }
  0x65   : > { %1040 = vmatpush.bf16.msrb.mxu2 %v4048_v50 }
  0x66   : > { %1054 = vmatpush.bf16.msrb.mxu3 %v4055_v15 }
  0x68   : > { %1041 = vmatmul.bf16.vlgmr.msrb.gmra.mxu2 %v3816_v61 }
  0x69   : > { %1375 = vmatpush.bf16.msra.mxu2 %v3743_v25  ;;  %1055 = vmatmul.bf16.vlgmr.msrb.gmra.mxu3 %v3816_v61  ;;  %v2534_v61 = vsel %vm2438_vm11, 1, %v5196_v21 }
  0x6a   : > { %1389 = vmatpush.bf16.msra.mxu3 %v3515_v9  ;;  %2539 = vperm.xlu0 %3215, %v2534_v61  }
  0x6d   : > { %1425 = vmatpush.bf16.msrb.mxu2 %v3754_v31 }
  0x6e   : > { %1440 = vmatpush.bf16.msrb.mxu3 %v3527_v13 }
  0x71   : > { %1426 = vmatpush.bf16.msrb.mxu2 %v3776_v41 }
  0x72   : > { %1441 = vmatpush.bf16.msrb.mxu3 %v3581_v30 }
  0x75   : > { %1427 = vmatpush.bf16.msrb.mxu2 %v3841_v11  ;;  %v4131_v11 = vld [vmem:[%s5040_s6] sm:$0x7] }
  0x76   : > { %1442 = vmatpush.bf16.msrb.mxu3 %v3606_v38  ;;  %v4126_v38 = vld [vmem:[%s5039_s5] sm:$0x7] }
  0x77   : > { %v4142_v30 = vperm.slane %v4126_v38, 1 }
  0x79   : > { %1428 = vmatpush.bf16.msrb.mxu2 %v3877_v33 }
  0x7a   : > { %1443 = vmatpush.bf16.msrb.mxu3 %v3635_v47 }
  0x7d   : > { %1429 = vmatpush.bf16.msrb.mxu2 %v3922_v16 }
  0x7e   : > { %1444 = vmatpush.bf16.msrb.mxu3 %v3662_v56 }
  0x81   : > { %1430 = vmatpush.bf16.msrb.mxu2 %v3954_v53 }
  0x82   : > { %1445 = vmatpush.bf16.msrb.mxu3 %v3689_v1  ;;  %v3183_v1 = vld [vmem:[%s3476_s17 + $0x8] sm:$0xff] }
  0x83   : > { %3041 = vmatmul.msk.bf16.vlgmr.msra.gmra.mxu0 %vm583_vm0, %v3183_v1  ;;  %3042 = vmatmul.msk.bf16.vlgmr.msra.gmra.mxu1 %vm583_vm0, %v3183_v1 }
  0x84   : > { %1397 = vmatpush.bf16.msra.mxu0 %v3554_v22  ;;  %1411 = vmatpush.bf16.msra.mxu1 %v3567_v26  ;;  %v4139_v26 = vperm.slane %v4131_v11, 0 }
  0x85   : > { %1431 = vmatpush.bf16.msrb.mxu2 %v3983_v40 }
  0x86   : > { %1446 = vmatpush.bf16.msrb.mxu3 %v3735_v20 }
  0x88   : > { %1398 = vmatpush.bf16.msra.mxu0 %v3594_v34  ;;  %1412 = vmatpush.bf16.msra.mxu1 %v3604_v37 }
  0x89   : > { %1432 = vmatpush.bf16.msrb.mxu2 %v4010_v18  ;;  %v4109_v18 = vperm.slane %v4099_v58, 0 }
  0x8a   : > { %1447 = vmatpush.bf16.msrb.mxu3 %v3782_v43  ;;  %v4106_v43 = vld [vmem:[%s5040_s6 + $0x3] sm:$0x7] }
  0x8b   : > { %5200 = vst [vmem:[#allocation56_spill] sm:$0xff] %v4109_v18  ;;  %v4112_v40 = vperm.slane %v4106_v43, 0 }
  0x8c   : > { %1399 = vmatpush.bf16.msra.mxu0 %v3627_v45  ;;  %1413 = vmatpush.bf16.msra.mxu1 %v3633_v46 }
  0x8d   : > { %5201 = vst [vmem:[#allocation57_spill] sm:$0xff] %v4112_v40 }
  0x90   : > { %1400 = vmatpush.bf16.msra.mxu0 %v3656_v54  ;;  %1414 = vmatpush.bf16.msra.mxu1 %v3660_v55 }
  0x93   : > { %3043 = vmatmul.msk.bf16.vlgmr.msrb.gmra.mxu0 %vm583_vm0, %v3183_v1 }
  0x94   : > { %1401 = vmatpush.bf16.msra.mxu0 %v3683_v63  ;;  %1415 = vmatpush.bf16.msra.mxu1 %v3687_v0 }
  0x98   : > { %1402 = vmatpush.bf16.msra.mxu0 %v3720_v14  ;;  %1416 = vmatpush.bf16.msra.mxu1 %v3733_v19 }
  0x9c   : > { %1403 = vmatpush.bf16.msra.mxu0 %v3764_v35  ;;  %1417 = vmatpush.bf16.msra.mxu1 %v3780_v42 }
  0xa0   : > { %1404 = vmatpush.bf16.msra.mxu0 %v3812_v60  ;;  %1418 = vmatpush.bf16.msra.mxu1 %v3825_v2 }
  0xa4   : > { %v4092_v10 = vpop.f32.mrf.mxu1  ;;  %1454 = vmatpush.bf16.msrb.mxu0 %v3827_v3 }
  0xa7   : > { %v596_v27 = vpop.f32.mrf.mxu2 }
  0xa8   : > { %v610_v49 = vpop.f32.mrf.mxu3  ;;  %1455 = vmatpush.bf16.msrb.mxu0 %v3861_v23 }
  0xa9   : > { %v611_v31 = vadd.f32 %v610_v49, %v4142_v30 }
  0xac   : > { %v4094_v12 = vpop.f32.mrf.mxu1  ;;  %1456 = vmatpush.bf16.msrb.mxu0 %v3907_v59 }
  0xaf   : > { %v598_v52 = vpop.f32.mrf.mxu2 }
  0xb0   : > { %v612_v62 = vpop.f32.mrf.mxu3  ;;  %1457 = vmatpush.bf16.msrb.mxu0 %v3937_v32 }
  0xb7   : > { %v4101_v61 = vpop.f32.mrf.mxu2 }
  0xb8   : > { %v672_v20 = vpop.f32.mrf.mxu3 }
  0xb9   : > { %v673_v53 = vadd.f32 %v672_v20, %v4109_v18  ;;  %v686_v45 = vpop.f32.mrf.mxu0 }
  0xbf   : > { %v4116_v16 = vpop.f32.mrf.mxu2 }
  0xc0   : > { %v674_v33 = vpop.f32.mrf.mxu3 }
  0xc2   : > { %v1028_v56 = vpop.f32.mrf.mxu1 }
  0xc3   : > { %v1029_v47 = vadd.f32 %v1028_v56, %v4112_v40  ;;  %v4136_v56 = vperm.slane %v4126_v38, 0 }
  0xc5   : > { %v1175_v20 = vadd.f32 %v1029_v47, %v673_v53  ;;  %v675_v47 = vadd.f32 %v674_v33, %v4109_v18  ;;  %v4146_v53 = vperm.slane %v4131_v11, 1 }
  0xc7   : > { %v3029_v22 = vmul.f32 -1.442695, %v1175_v20  ;;  %5202 = vst [vmem:[#allocation58_spill] sm:$0xff] %v4146_v53  ;;  %v597_v20 = vadd.f32 %v596_v27, %v4136_v56 }
  0xc9   : > { %3218 = vpow2.f32 %v3029_v22 }
  0xca   : > { %v1030_v41 = vpop.f32.mrf.mxu1 }
  0xcb   : > { %v1031_v34 = vadd.f32 %v1030_v41, %v4112_v40  ;;  %v850_v29 = vpop.f32.mrf.mxu2 }
  0xcc   : > { %v851_v37 = vadd.f32 %v850_v29, %v4139_v26  ;;  %v864_v13 = vpop.f32.mrf.mxu3 }
  0xcd   : > { %v1176_v33 = vadd.f32 %v1031_v34, %v675_v47  ;;  %v865_v18 = vadd.f32 %v864_v13, %v4146_v53  ;;  %v599_v13 = vadd.f32 %v598_v52, %v4136_v56 }
  0xce   : > { %v1064_v24 = vadd.f32 %v851_v37, %v597_v20 }
  0xcf   : > { %v1104_v9 = vadd.f32 %v865_v18, %v611_v31  ;;  %v3030_v40 = vmul.f32 -1.442695, %v1176_v33  ;;  %v3219_v27 = vpop.eup %3218  ;;  %v613_v31 = vadd.f32 %v612_v62, %v4142_v30 }
  0xd0   : > { %v3025_v41 = vmul.f32 -1.442695, %v1064_v24  ;;  %v4163_v24 = vadd.f32 1.0, %v3219_v27  ;;  %v4182_v27 = vperm.slane %v4126_v38, 2 }
  0xd1   : > { %v3027_v46 = vmul.f32 -1.442695, %v1104_v9 }
  0xd2   : > { %3220 = vpow2.f32 %v3025_v41  ;;  %5203 = vst [vmem:[#allocation59_spill] sm:$0xff] %v4182_v27  ;;  %vm1190_vm13 = vweird.f32 %v4163_v24  ;;  %v1196_v60 = vand.u32 2147483648, %v4163_v24 }
  0xd3   : > { %v852_v22 = vpop.f32.mrf.mxu2  ;;  %3222 = vpow2.f32 %v3027_v46 }
  0xd4   : > { %v853_v34 = vadd.f32 %v852_v22, %v4139_v26  ;;  %v866_v37 = vpop.f32.mrf.mxu3  ;;  %3224 = vpow2.f32 %v3030_v40  ;;  %v688_v40 = vpop.f32.mrf.mxu0  ;;  %v3184_v22 = vld [vmem:[%s3481_s21 + $0x10] sm:$0xff] }
  0xd5   : > { %v867_v9 = vadd.f32 %v866_v37, %v4146_v53  ;;  %3226 = vrcp.f32 %v4163_v24  ;;  %3050 = vmatmul.msk.bf16.vlgmr.msrb.gmra.mxu1 %vm583_vm0, %v3184_v22  ;;  %3051 = vmatmul.msk.bf16.vlgmr.msra.gmra.mxu2 %vm583_vm0, %v3184_v22 }
  0xd6   : > { %v1065_v1 = vadd.f32 %v853_v34, %v599_v13  ;;  %v4188_v13 = vperm.slane %v4099_v58, 1  ;;  %1468 = vmatpush.bf16.msrb.mxu1 %v3830_v5  ;;  %3052 = vmatmul.msk.bf16.vlgmr.msra.gmra.mxu3 %vm583_vm0, %v3184_v22  ;;  %v4224_v22 = vperm.slane %v4131_v11, 2 }
  0xd7   : > { %v1105_v18 = vadd.f32 %v867_v9, %v613_v31  ;;  %1730 = vmatpush.bf16.msra.mxu2 %v3502_v4  ;;  %1744 = vmatpush.bf16.msra.mxu3 %v3513_v8 }
  0xd8   : > { %v3026_v29 = vmul.f32 -1.442695, %v1065_v1  ;;  %v3221_v49 = vpop.eup %3220  ;;  %5204 = vst [vmem:[#allocation60_spill] sm:$0xff] %v4188_v13  ;;  %v4204_v1 = vadd.f32 %v4101_v61, %v4182_v27  ;;  %v4227_v5 = vadd.f32 %v688_v40, %v4188_v13  ;;  %v1194_v40 = vand.u32 2147483647, %v4163_v24 }
  0xd9   : > { %v3223_v46 = vpop.eup %3222  ;;  %v4169_v52 = vadd.f32 1.0, %v3221_v49  ;;  %v3028_v62 = vmul.f32 -1.442695, %v1105_v18  ;;  %v4211_v49 = vadd.f32 %v4116_v16, %v4182_v27 }
  0xda   : > { %v3225_v47 = vpop.eup %3224  ;;  %v4171_v20 = vadd.f32 1.0, %v3223_v46  ;;  %3228 = vpow2.f32 %v3026_v29  ;;  %1469 = vmatpush.bf16.msrb.mxu1 %v3868_v28  ;;  %vm4277_vm6 = vcmp.eq.f32.partialorder %v1194_v40, 8.507059e+37 }
  0xdb   : > { %3230 = vrcp.f32 %v4169_v52  ;;  %v4177_v33 = vadd.f32 1.0, %v3225_v47  ;;  %v4179_v41 = vpop.eup %3226  ;;  %v4221_v47 = vperm.slane %v4106_v43, 1  ;;  %v1085_v27 = vand.u32 2147483648, %v4169_v52 }
  0xdc   : > { %3232 = vrcp.f32 %v4171_v20  ;;  %v1186_v31 = vmul.f32 %v4179_v41, %v4163_v24  ;;  %vm1079_vm14 = vweird.f32 %v4169_v52  ;;  %vm1119_vm3 = vweird.f32 %v4171_v20 }
  0xdd   : > { %3234 = vpow2.f32 %v3028_v62  ;;  %v687_v62 = vadd.f32 %v686_v45, %v4188_v13  ;;  %v1086_v4 = vor.u32 1.1754944e-38, %v1085_v27  ;;  %vm1191_vm4 = vweird.f32 %v4179_v41 }
  0xde   : > { %3236 = vrcp.f32 %v4177_v33  ;;  %v1187_v3 = vsub.f32 1.0, %v1186_v31  ;;  %1470 = vmatpush.bf16.msrb.mxu1 %v3910_v6  ;;  %vm4291_vm7 = vmor %vm1190_vm13, %vm1191_vm4 }
  0xe0   : > { %v3229_v34 = vpop.eup %3228 }
  0xe1   : > { %v3231_v37 = vpop.eup %3230  ;;  %v4194_v38 = vadd.f32 1.0, %v3229_v34  ;;  %v878_v34 = vpop.f32.mrf.mxu0 }
  0xe2   : > { %v4200_v9 = vpop.eup %3232  ;;  %v1075_v18 = vmul.f32 %v3231_v37, %v4169_v52  ;;  %vm1080_vm12 = vweird.f32 %v3231_v37  ;;  %1471 = vmatpush.bf16.msrb.mxu1 %v3945_v48 }
  0xe3   : > { %v3235_v29 = vpop.eup %3234  ;;  %v1115_v46 = vmul.f32 %v4200_v9, %v4171_v20  ;;  %3238 = vrcp.f32 %v4194_v38  ;;  %vm1081_vm15 = vmor %vm1079_vm14, %vm1080_vm12  ;;  %vm1120_vm2 = vweird.f32 %v4200_v9  ;;  %v1098_v48 = vand.u32 2147483647, %v4194_v38 }
  0xe4   : > { %v4218_v61 = vadd.f32 1.0, %v3235_v29  ;;  %v1076_v16 = vsub.f32 1.0, %v1075_v18  ;;  %v1083_v29 = vand.u32 2147483647, %v4169_v52  ;;  %v4233_v23 = vpop.eup %3236  ;;  %vm4272_vm5 = vmor %vm1119_vm3, %vm1120_vm2  ;;  %v1100_v32 = vand.u32 2147483648, %v4194_v38 }
  0xe5   : > { %v1116_v8 = vsub.f32 1.0, %v1115_v46  ;;  %v4237_v46 = vperm.slane %v4106_v43, 2  ;;  %v1188_v43 = vmul.f32 %v4179_v41, %v1187_v3  ;;  %vm1094_vm10 = vweird.f32 %v4194_v38 }
  0xe6   : > { %3240 = vrcp.f32 %v4218_v61  ;;  %v1077_v45 = vmul.f32 %v3231_v37, %v1076_v16  ;;  %v879_v16 = vadd.f32 %v878_v34, %v4224_v22  ;;  %vm1084_vm1 = vcmp.eq.f32.partialorder %v1083_v29, 8.507059e+37 }
  0xe7   : > { %v1117_v11 = vmul.f32 %v4200_v9, %v1116_v8  ;;  %v1125_v8 = vand.u32 2147483648, %v4171_v20  ;;  %v1201_v34 = vmul.f32 %v4233_v23, %v4177_v33  ;;  %v1123_v29 = vand.u32 2147483647, %v4171_v20 }
  0xe8   : > { %v1078_v28 = vadd.f32 %v3231_v37, %v1077_v45  ;;  %vm1134_vm11 = vweird.f32 %v4218_v61  ;;  %vm1099_vm14 = vcmp.eq.f32.partialorder %v1098_v48, 8.507059e+37  ;;  %vm1205_vm2 = vweird.f32 %v4177_v33 }
  0xe9   : > { %v4245_v2 = vpop.eup %3238  ;;  %v1118_v45 = vadd.f32 %v4200_v9, %v1117_v11  ;;  %vm1124_vm9 = vcmp.eq.f32.partialorder %v1123_v29, 8.507059e+37  ;;  %vm1206_vm3 = vweird.f32 %v4233_v23 }
  0xea   : > { %v1090_v3 = vmul.f32 %v4245_v2, %v4194_v38  ;;  %vm1095_vm8 = vweird.f32 %v4245_v2  ;;  %v4313_v38 = vpop.permute.xlu0 %1161 }
  0xeb   : > { %v1042_v18 = vpop.f32.mrf.mxu2  ;;  %v1122_v20 = vsel %vm4272_vm5, %v4200_v9, %v1118_v45  ;;  %v1197_v45 = vor.u32 1.1754944e-38, %v1196_v60  ;;  %vm1096_vm12 = vmor %vm1094_vm10, %vm1095_vm8 }
  0xec   : > { %v1043_v31 = vadd.f32 %v1042_v18, %v4221_v47  ;;  %v1082_v18 = vsel %vm1081_vm15, %v3231_v37, %v1078_v28  ;;  %v4259_v42 = vpop.eup %3240  ;;  %v1126_v37 = vor.u32 1.1754944e-38, %v1125_v8  ;;  %v1091_v8 = vsub.f32 1.0, %v1090_v3  ;;  %v1056_v24 = vpop.f32.mrf.mxu3 }
  0xed   : > { %v1087_v52 = vsel %vm1084_vm1, %v1086_v4, %v1082_v18  ;;  %v4266_v4 = vadd.f32 %v4179_v41, %v1188_v43  ;;  %vm1135_vm13 = vweird.f32 %v4259_v42  ;;  %vm1166_vm1 = vcmp.eq.s32.totalorder %v4313_v38, 1 }
  0xee   : > { %v1215_v59 = vadd.f32 %v1043_v31, %v687_v62  ;;  %v1144_v28 = vmul.f32 %v1087_v52, %v879_v16  ;;  %v1130_v62 = vmul.f32 %v4259_v42, %v4218_v61  ;;  %v1202_v31 = vsub.f32 1.0, %v1201_v34  ;;  %v880_v16 = vpop.f32.mrf.mxu0  ;;  %vm4332_vm15 = vmor %vm1134_vm11, %vm1135_vm13 }
  0xef   : > { %v1092_v9 = vmul.f32 %v4245_v2, %v1091_v8  ;;  %v881_v3 = vadd.f32 %v880_v16, %v4224_v22  ;;  %v1193_v60 = vsel %vm4291_vm7, %v4179_v41, %v4266_v4  ;;  %v1101_v16 = vor.u32 1.1754944e-38, %v1100_v32 }
  0xf0   : > { %v3031_v27 = vmul.f32 -1.442695, %v1215_v59  ;;  %v1146_v59 = vadd.f32 %v1144_v28, %v4204_v1  ;;  %v1131_v18 = vsub.f32 1.0, %v1130_v62  ;;  %v5212_v28 = vld [vmem:[#allocation49_spill] sm:$0xff]  ;;  %v1127_v62 = vsel %vm1124_vm9, %v1126_v37, %v1122_v20 }
  0xf1   : > { %1472 = vmatpush.bf16.msrb.mxu1 %v5212_v28  ;;  %v1203_v29 = vmul.f32 %v4233_v23, %v1202_v31  ;;  %v1150_v20 = vsub.f32 1.0, %v1127_v62  ;;  %v1140_v4 = vand.u32 2147483648, %v4218_v61  ;;  %v1138_v31 = vand.u32 2147483647, %v4218_v61 }
  0xf2   : > { %3242 = vpow2.f32 %v3031_v27  ;;  %v5209_v27 = vld [vmem:[#allocation48_spill] sm:$0xff]  ;;  %v1132_v34 = vmul.f32 %v4259_v42, %v1131_v18 }
  0xf3   : > { %v1044_v52 = vpop.f32.mrf.mxu2  ;;  %1458 = vmatpush.bf16.msrb.mxu0 %v5209_v27  ;;  %3244 = vtanh.f32 %v1146_v59  ;;  %v1093_v59 = vadd.f32 %v4245_v2, %v1092_v9  ;;  %v1141_v61 = vor.u32 1.1754944e-38, %v1140_v4  ;;  %vm1139_vm4 = vcmp.eq.f32.partialorder %v1138_v31, 8.507059e+37  ;;  %v1165_v4 = vpop.permute.xlu0 %1164 }
  0xf4   : > { %v1045_v40 = vadd.f32 %v1044_v52, %v4221_v47  ;;  %v1133_v41 = vadd.f32 %v4259_v42, %v1132_v34  ;;  %v4326_v34 = vperm.slane %v4099_v58, 2  ;;  %vm1167_vm7 = vcmp.eq.s32.totalorder %v1165_v4, 1 }
  0xf5   : > { %v1097_v8 = vsel %vm1096_vm12, %v4245_v2, %v1093_v59  ;;  %1473 = vmatpush.bf16.msrb.mxu1 %v4001_v7  ;;  %v1057_v2 = vadd.f32 %v1056_v24, %v4237_v46  ;;  %v1204_v59 = vadd.f32 %v4233_v23, %v1203_v29  ;;  %v1209_v29 = vand.u32 2147483647, %v4177_v33 }
  0xf6   : > { %v1216_v11 = vadd.f32 %v1045_v40, %v4227_v5  ;;  %v1102_v52 = vsel %vm1099_vm14, %v1101_v16, %v1097_v8  ;;  %v5213_v40 = vld [vmem:[#allocation34_spill] sm:$0xff]  ;;  %v1137_v58 = vsel %vm4332_vm15, %v4259_v42, %v1133_v41  ;;  %v1482_v16 = vstv %s1288_s25  ;;  %v1058_v42 = vpop.f32.mrf.mxu3 }
  0xf7   : > { %1459 = vmatpush.bf16.msrb.mxu0 %v3996_v39  ;;  %v1145_v1 = vmul.f32 %v1102_v52, %v881_v3  ;;  %v1154_v9 = vmul.f32 %v1127_v62, %v5213_v40  ;;  %v1198_v62 = vsel %vm4277_vm6, %v1197_v45, %v1193_v60  ;;  %v1211_v8 = vand.u32 2147483648, %v4177_v33  ;;  %vm4359_vm6 = vmor %vm1205_vm2, %vm1206_vm3 }
  0xf8   : > { %v3243_v37 = vpop.eup %3242  ;;  %v3032_v5 = vmul.f32 -1.442695, %v1216_v11  ;;  %vm1483_vm5 = vcmp.lt.s32.totalorder %v1482_v16, %v3882_v36  ;;  %v1059_v33 = vadd.f32 %v1058_v42, %v4237_v46  ;;  %vm1484_vm8 = vcmp.lt.s32.totalorder %v1482_v16, %v3902_v57 }
  0xf9   : > { %v4315_v18 = vadd.f32 1.0, %v3243_v37  ;;  %v3245_v32 = vpop.eup %3244  ;;  %v1147_v3 = vadd.f32 %v1145_v1, %v4211_v49  ;;  %1474 = vmatpush.bf16.msrb.mxu1 %v4027_v51  ;;  %v1255_v49 = vmul.f32 %v1198_v62, %v1057_v2  ;;  %vm1210_vm9 = vcmp.eq.f32.partialorder %v1209_v29, 8.507059e+37 }
  0xfa   : > { %3246 = vpow2.f32 %v3032_v5  ;;  %v1152_v48 = vmul.f32 %v3245_v32, %v1150_v20  ;;  %v701_v5 = vadd.f32 %v4092_v10, %v4326_v34  ;;  %v1142_v20 = vsel %vm1139_vm4, %v1141_v61, %v1137_v58 }
  0xfb   : > { %3248 = vrcp.f32 %v4315_v18  ;;  %1460 = vmatpush.bf16.msrb.mxu0 %v4024_v44  ;;  %v1579_v10 = vsel %vm1483_vm5, 1, %v5196_v21  ;;  %v1208_v32 = vsel %vm4359_vm6, %v4233_v23, %v1204_v59  ;;  %v1151_v1 = vsub.f32 1.0, %v1142_v20  ;;  %v5218_v23 = vld [vmem:[#allocation35_spill] sm:$0xff] }
  0xfc   : > { %v1156_v24 = vadd.f32 %v1154_v9, %v1152_v48  ;;  %3250 = vtanh.f32 %v1147_v3  ;;  %1582 = vperm.xlu2 %3217, %v1579_v10   ;;  %v1257_v31 = vadd.f32 %v1255_v49, %v701_v5  ;;  %v1212_v9 = vor.u32 1.1754944e-38, %v1211_v8 }
  0xfd   : > { %1475 = vmatpush.bf16.msrb.mxu1 %v4055_v15  ;;  %v1236_v11 = vand.u32 2147483648, %v4315_v18  ;;  %v1155_v58 = vmul.f32 %v1142_v20, %v5218_v23  ;;  %v1234_v62 = vand.u32 2147483647, %v4315_v18  ;;  %v1580_v5 = vsel %vm1484_vm8, 1, %v5196_v21 }
  0xfe   : > { %v1170_v52 = vsel %vm1166_vm1, %v1156_v24, 0.0  ;;  %v1213_v59 = vsel %vm1210_vm9, %v1212_v9, %v1208_v32  ;;  %v703_v16 = vadd.f32 %v4094_v12, %v4326_v34  ;;  %vm1230_vm11 = vweird.f32 %v4315_v18 }
  0xff   : > { %1461 = vmatpush.bf16.msrb.mxu0 %v4048_v50  ;;  %1283 = vst [vmem:[%s3486_s24] sm:$0xff] %v1170_v52  ;;  %v1256_v49 = vmul.f32 %v1213_v59, %v1059_v33  ;;  %v1237_v20 = vor.u32 1.1754944e-38, %v1236_v11  ;;  %v4386_v60 = vsel %vm1166_vm1, %v1156_v24, %v5213_v40  ;;  %vm1235_vm13 = vcmp.eq.f32.partialorder %v1234_v62, 8.507059e+37  ;;  %v5219_v24 = vld [vmem:[#allocation53_spill] sm:$0xff] }
 0x100   : > { %v3247_v37 = vpop.eup %3246  ;;  %vm1905_vm14 = vcmp.lt.s32.totalorder %v5219_v24, %v3882_v36  ;;  %v5221_v11 = vld [vmem:[#allocation5_spill] sm:$0xff]  ;;  %v5225_v24 = vld [vmem:[#allocation26_spill] sm:$0xff] }
 0x101   : > { %v3249_v43 = vpop.eup %3248  ;;  %v4353_v45 = vadd.f32 1.0, %v3247_v37  ;;  %v1258_v32 = vadd.f32 %v1256_v49, %v703_v16 }
 0x102   : > { %v1226_v41 = vmul.f32 %v3249_v43, %v4315_v18  ;;  %v3251_v2 = vpop.eup %3250  ;;  %vm1231_vm10 = vweird.f32 %v3249_v43 }
 0x103   : > { %3252 = vrcp.f32 %v4353_v45  ;;  %v1153_v3 = vmul.f32 %v3251_v2, %v1151_v1  ;;  %vm1232_vm12 = vmor %vm1230_vm11, %vm1231_vm10  ;;  %v5220_v1 = vld [vmem:[#allocation31_spill] sm:$0xff]  ;;  %vm1245_vm2 = vweird.f32 %v4353_v45 }
 0x104   : > { %v1227_v48 = vsub.f32 1.0, %v1226_v41  ;;  %3254 = vtanh.f32 %v1257_v31  ;;  %1585 = vperm.xlu2 %3217, %v1580_v5   ;;  %v1251_v31 = vand.u32 2147483648, %v4353_v45  ;;  %v5222_v5 = vld [vmem:[#allocation54_spill] sm:$0xff] }
 0x105   : > { %v1157_v37 = vadd.f32 %v1155_v58, %v1153_v3  ;;  %3256 = vtanh.f32 %v1258_v32  ;;  %v2001_v3 = vsel %vm1905_vm14, 1, %v5196_v21  ;;  %vm2017_vm5 = vcmp.lt.s32.totalorder %v5222_v5, %v3902_v57  ;;  %v1324_v5 = vpop.f32.mrf.mxu1 }
 0x106   : > { %v1228_v61 = vmul.f32 %v3249_v43, %v1227_v48  ;;  %v1273_v48 = vpop.permute.xlu1 %1272 }
 0x107   : > { %v4390_v29 = vsel %vm1167_vm7, %v1157_v37, %v5218_v23  ;;  %v1171_v10 = vsel %vm1167_vm7, %v1157_v37, 0.0  ;;  %vm1277_vm1 = vcmp.eq.s32.totalorder %v1273_v48, 1  ;;  %v5231_v48 = vld [vmem:[#allocation13_spill] sm:$0xff] }
 0x108   : > { %v1229_v42 = vadd.f32 %v3249_v43, %v1228_v61  ;;  %v1396_v18 = vpack.c.bf16 %v4390_v29, %v4386_v60  ;;  %1284 = vst [vmem:[%s3486_s24 + $0x8] sm:$0xff] %v1171_v10  ;;  %v1252_v61 = vor.u32 1.1754944e-38, %v1251_v31  ;;  %v5228_v31 = vld [vmem:[#allocation28_spill] sm:$0xff] }
 0x109   : > { %v3253_v8 = vpop.eup %3252 }
 0x10a   : > { %v1233_v52 = vsel %vm1232_vm12, %v3249_v43, %v1229_v42  ;;  %v1241_v12 = vmul.f32 %v3253_v8, %v4353_v45  ;;  %1405 = vmatmul.bf16.vlgmr.msra.gmra.mxu0 %v1396_v18  ;;  %1419 = vmatmul.bf16.vlgmr.msra.gmra.mxu1 %v1396_v18  ;;  %v3255_v4 = vpop.eup %3254  ;;  %v1249_v43 = vand.u32 2147483647, %v4353_v45  ;;  %vm1246_vm15 = vweird.f32 %v3253_v8 }
 0x10b   : > { %v1238_v41 = vsel %vm1235_vm13, %v1237_v20, %v1233_v52  ;;  %1433 = vmatmul.bf16.vlgmr.msrb.gmra.mxu2 %v1396_v18  ;;  %1797 = vmatpush.bf16.msra.mxu0 %v3743_v25  ;;  %vm1247_vm3 = vmor %vm1245_vm2, %vm1246_vm15  ;;  %v3257_v16 = vpop.eup %3256  ;;  %v5223_v20 = vld [vmem:[#allocation32_spill] sm:$0xff]  ;;  %v2113_v45 = vsel %vm2017_vm5, 1, %v5196_v21  ;;  %v3378_v18 = vld [vmem:[#allocation2 + $0x18] sm:$0xff] }
 0x10c   : > { %v1261_v38 = vsub.f32 1.0, %v1238_v41  ;;  %v1242_v40 = vsub.f32 1.0, %v1241_v12  ;;  %v1265_v2 = vmul.f32 %v1238_v41, %v5220_v1  ;;  %1758 = vmatpush.bf16.msrb.mxu2 %v3540_v17  ;;  %1811 = vmatpush.bf16.msra.mxu1 %v5221_v11  ;;  %vm1250_vm4 = vcmp.eq.f32.partialorder %v1249_v43, 8.507059e+37  ;;  %v3379_v41 = vld [vmem:[#allocation2 + $0x8] sm:$0xff]  ;;  %v5227_v43 = vld [vmem:[#allocation55_spill] sm:$0xff] }
 0x10d   : > { %2004 = vperm.xlu2 %3217, %v2001_v3   ;;  %vm2437_vm7 = vcmp.lt.s32.totalorder %v5227_v43, %v3882_v36  ;;  %v5233_v3 = vld [vmem:[#allocation16_spill] sm:$0xff]  ;;  %v5236_v36 = vld [vmem:[#allocation47_spill] sm:$0xff] }
 0x10e   : > { %v1263_v33 = vmul.f32 %v3255_v4, %v1261_v38  ;;  %v1243_v9 = vmul.f32 %v3253_v8, %v1242_v40  ;;  %v1276_v12 = vpop.permute.xlu1 %1275  ;;  %v5224_v40 = vld [vmem:[#allocation7_spill] sm:$0xff]  ;;  %v5226_v4 = vld [vmem:[#allocation6_spill] sm:$0xff]  ;;  %v2533_v1 = vsel %vm2437_vm7, 1, %v5196_v21  ;;  %v5239_v21 = vld [vmem:[#allocation25_spill] sm:$0xff] }
 0x10f   : > { %vm1278_vm6 = vcmp.eq.s32.totalorder %v1276_v12, 1  ;;  %v3185_v12 = vld [vmem:[%s3476_s17 + $0x10] sm:$0xff] }
 0x110   : > { %v1267_v23 = vadd.f32 %v1265_v2, %v1263_v33  ;;  %v1244_v58 = vadd.f32 %v3253_v8, %v1243_v9  ;;  %v5229_v33 = vld [vmem:[#allocation10_spill] sm:$0xff]  ;;  %v5230_v2 = vld [vmem:[#allocation39_spill] sm:$0xff] }
 0x111   : > { %v5232_v9 = vld [vmem:[#allocation42_spill] sm:$0xff] }
 0x112   : > { %v1281_v62 = vsel %vm1277_vm1, %v1267_v23, 0.0  ;;  %v1248_v59 = vsel %vm1247_vm3, %v3253_v8, %v1244_v58  ;;  %v4414_v8 = vsel %vm1277_vm1, %v1267_v23, %v3378_v18  ;;  %v5234_v23 = vld [vmem:[#allocation44_spill] sm:$0xff]  ;;  %v5235_v58 = vld [vmem:[#allocation19_spill] sm:$0xff] }
 0x113   : > { %3033 = vst [vmem:[%s3491_s12 + $0x30] sm:$0xff] %v1281_v62  ;;  %v1253_v49 = vsel %vm1250_vm4, %v1252_v61, %v1248_v59  ;;  %v5237_v61 = vld [vmem:[#allocation22_spill] sm:$0xff]  ;;  %v5240_v59 = vld [vmem:[#allocation52_spill] sm:$0xff] }
 0x114   : > { %v1262_v37 = vsub.f32 1.0, %v1253_v49  ;;  %v1266_v10 = vmul.f32 %v1253_v49, %v5223_v20  ;;  %v5238_v62 = vld [vmem:[#allocation50_spill] sm:$0xff]  ;;  %v5242_v18 = vld [vmem:[#allocation8_spill] sm:$0xff] }
 0x115   : > { %2118 = vperm.xlu2 %3217, %v2113_v45   ;;  %v5241_v49 = vld [vmem:[#allocation30_spill] sm:$0xff] }
 0x116   : > { %v1264_v42 = vmul.f32 %v3257_v16, %v1262_v37  ;;  %v1310_v37 = vpop.f32.mrf.mxu0 }
 0x118   : > { %v1268_v52 = vadd.f32 %v1266_v10, %v1264_v42  ;;  %v1326_v42 = vpop.f32.mrf.mxu1 }
 0x11a   : > { %v4416_v32 = vsel %vm1278_vm6, %v1268_v52, %v3379_v41  ;;  %v1282_v38 = vsel %vm1278_vm6, %v1268_v52, 0.0  ;;  %v5243_v41 = vld [vmem:[#allocation9_spill] sm:$0xff] }
 0x11b   : > { %3034 = vst [vmem:[%s3491_s12 + $0x38] sm:$0xff] %v1282_v38  ;;  %v1439_v57 = vpack.c.bf16 %v4416_v32, %v4414_v8  ;;  %3071 = vmatmul.msk.bf16.vlgmr.msra.gmra.mxu2 %vm583_vm0, %v3185_v12  ;;  %v1311_v38 = vadd.f32 %v1310_v37, %v4136_v56  ;;  %v5246_v37 = vld [vmem:[#allocation14_spill] sm:$0xff] }
 0x11c   : > { %1819 = vmatpush.bf16.msra.mxu2 %v5242_v18 }
 0x11d   : > { %1448 = vmatmul.bf16.vlgmr.msrb.gmra.mxu3 %v1439_v57  ;;  %1462 = vmatmul.bf16.vlgmr.msrb.gmra.mxu0 %v1439_v57 }
 0x11e   : > { %1476 = vmatmul.bf16.vlgmr.msrb.gmra.mxu1 %v1439_v57  ;;  %1783 = vmatpush.bf16.msrb.mxu3 %v5224_v40  ;;  %v1312_v16 = vpop.f32.mrf.mxu0 }
 0x11f   : > { %1847 = vmatpush.bf16.msrb.mxu0 %v5225_v24  ;;  %1862 = vmatpush.bf16.msrb.mxu1 %v5226_v4 }
 0x120   : > { %2536 = vperm.xlu2 %3217, %v2533_v1   ;;  %v1325_v1 = vadd.f32 %v1324_v5, %v4142_v30  ;;  %v1313_v5 = vadd.f32 %v1312_v16, %v4136_v56 }
 0x123   : > { %1848 = vmatpush.bf16.msrb.mxu0 %v5228_v31  ;;  %1863 = vmatpush.bf16.msrb.mxu1 %v5229_v33 }
 0x126   : > { %v4441_v20 = vpop.f32.mrf.mxu0 }
 0x127   : > { %1849 = vmatpush.bf16.msrb.mxu0 %v5230_v2  ;;  %1864 = vmatpush.bf16.msrb.mxu1 %v5231_v48 }
 0x12b   : > { %1850 = vmatpush.bf16.msrb.mxu0 %v5232_v9  ;;  %1865 = vmatpush.bf16.msrb.mxu1 %v5233_v3  ;;  %v5247_v3 = vld [vmem:[#allocation15_spill] sm:$0xff] }
 0x12c   : > { %3073 = vmatmul.msk.bf16.vlgmr.msrb.gmra.mxu2 %vm583_vm0, %v3185_v12 }
 0x12d   : > { %3072 = vmatmul.msk.bf16.vlgmr.msra.gmra.mxu3 %vm583_vm0, %v3185_v12 }
 0x12e   : > { %v4445_v45 = vpop.f32.mrf.mxu0  ;;  %1833 = vmatpush.bf16.msra.mxu3 %v5243_v41 }
 0x12f   : > { %1851 = vmatpush.bf16.msrb.mxu0 %v5234_v23  ;;  %1866 = vmatpush.bf16.msrb.mxu1 %v5235_v58 }
 0x133   : > { %1852 = vmatpush.bf16.msrb.mxu0 %v5236_v36  ;;  %1867 = vmatpush.bf16.msrb.mxu1 %v5237_v61 }
 0x137   : > { %1853 = vmatpush.bf16.msrb.mxu0 %v5238_v62  ;;  %1868 = vmatpush.bf16.msrb.mxu1 %v5239_v21  ;;  %v5244_v21 = vld [vmem:[#allocation11_spill] sm:$0xff]  ;;  %v5245_v62 = vld [vmem:[#allocation12_spill] sm:$0xff] }
 0x138   : > { %1820 = vmatpush.bf16.msra.mxu2 %v5244_v21  ;;  %1834 = vmatpush.bf16.msra.mxu3 %v5245_v62  ;;  %v1327_v21 = vadd.f32 %v1326_v42, %v4142_v30 }
 0x13b   : > { %1854 = vmatpush.bf16.msrb.mxu0 %v5240_v59  ;;  %1869 = vmatpush.bf16.msrb.mxu1 %v5241_v49 }
 0x13c   : > { %1821 = vmatpush.bf16.msra.mxu2 %v5246_v37  ;;  %1835 = vmatpush.bf16.msra.mxu3 %v5247_v3  ;;  %v5253_v3 = vld [vmem:[#allocation36_spill] sm:$0xff] }
 0x140   : > { %1822 = vmatpush.bf16.msra.mxu2 %v3656_v54  ;;  %1836 = vmatpush.bf16.msra.mxu3 %v3660_v55  ;;  %v5252_v54 = vld [vmem:[#allocation33_spill] sm:$0xff] }
 0x144   : > { %1823 = vmatpush.bf16.msra.mxu2 %v3683_v63  ;;  %1837 = vmatpush.bf16.msra.mxu3 %v3687_v0 }
 0x148   : > { %1824 = vmatpush.bf16.msra.mxu2 %v3720_v14  ;;  %1838 = vmatpush.bf16.msra.mxu3 %v3733_v19  ;;  %v5251_v19 = vld [vmem:[#allocation57_spill] sm:$0xff] }
 0x14c   : > { %1825 = vmatpush.bf16.msra.mxu2 %v3764_v35 }
 0x150   : > { %1826 = vmatpush.bf16.msra.mxu2 %v5252_v54 }
 0x152   : > { %v4443_v10 = vpop.f32.mrf.mxu1 }
 0x158   : > { %v1377_v58 = vpop.f32.mrf.mxu2 }
 0x159   : > { %v4460_v41 = vpop.f32.mrf.mxu3 }
 0x15a   : > { %v4447_v52 = vpop.f32.mrf.mxu1 }
 0x187   : > { %v1406_v57 = vpop.f32.mrf.mxu0  ;;  %v1420_v43 = vpop.f32.mrf.mxu1 }
 0x188   : > { %v1407_v49 = vadd.f32 %v1406_v57, %v4139_v26  ;;  %v1421_v59 = vadd.f32 %v1420_v43, %v4146_v53 }
 0x18a   : > { %v1485_v61 = vadd.f32 %v1407_v49, %v1311_v38  ;;  %v1525_v36 = vadd.f32 %v1421_v59, %v1325_v1  ;;  %v1379_v1 = vpop.f32.mrf.mxu2 }
 0x18c   : > { %v3053_v18 = vmul.f32 -1.442695, %v1485_v61  ;;  %v3055_v23 = vmul.f32 -1.442695, %v1525_v36 }
 0x18e   : > { %3258 = vpow2.f32 %v3053_v18 }
 0x18f   : > { %3260 = vpow2.f32 %v3055_v23  ;;  %v1408_v57 = vpop.f32.mrf.mxu0  ;;  %v1422_v43 = vpop.f32.mrf.mxu1 }
 0x190   : > { %v1409_v49 = vadd.f32 %v1408_v57, %v4139_v26  ;;  %v1423_v59 = vadd.f32 %v1422_v43, %v4146_v53  ;;  %v4477_v43 = vpop.f32.mrf.mxu3 }
 0x192   : > { %v1486_v36 = vadd.f32 %v1409_v49, %v1313_v5  ;;  %v1526_v61 = vadd.f32 %v1423_v59, %v1327_v21  ;;  %v1378_v21 = vadd.f32 %v1377_v58, %v4188_v13 }
 0x194   : > { %v3259_v18 = vpop.eup %3258  ;;  %v3054_v38 = vmul.f32 -1.442695, %v1486_v36  ;;  %v3056_v42 = vmul.f32 -1.442695, %v1526_v61  ;;  %v3186_v36 = vld [vmem:[%s3481_s21 + $0x8] sm:$0xff]  ;;  %v5248_v61 = vld [vmem:[#allocation29_spill] sm:$0xff] }
 0x195   : > { %v3261_v23 = vpop.eup %3260  ;;  %v4473_v16 = vadd.f32 1.0, %v3259_v18  ;;  %1839 = vmatpush.bf16.msra.mxu3 %v5248_v61  ;;  %3081 = vmatmul.msk.bf16.vlgmr.msra.gmra.mxu0 %vm583_vm0, %v3186_v36 }
 0x196   : > { %v4475_v57 = vadd.f32 1.0, %v3261_v23  ;;  %3262 = vpow2.f32 %v3054_v38  ;;  %3080 = vmatmul.msk.bf16.vlgmr.msrb.gmra.mxu3 %vm583_vm0, %v3186_v36  ;;  %3082 = vmatmul.msk.bf16.vlgmr.msra.gmra.mxu1 %vm583_vm0, %v3186_v36 }
 0x197   : > { %3264 = vrcp.f32 %v4473_v16  ;;  %v1506_v36 = vand.u32 2147483648, %v4473_v16  ;;  %vm1500_vm9 = vweird.f32 %v4473_v16 }
 0x198   : > { %3266 = vrcp.f32 %v4475_v57  ;;  %vm1540_vm13 = vweird.f32 %v4475_v57 }
 0x199   : > { %3268 = vpow2.f32 %v3056_v42  ;;  %1840 = vmatpush.bf16.msra.mxu3 %v5253_v3  ;;  %v5257_v3 = vld [vmem:[#allocation4_spill] sm:$0xff] }
 0x19a   : > { %v1463_v12 = vpop.f32.mrf.mxu0  ;;  %2166 = vmatpush.bf16.msra.mxu1 %v5257_v3  ;;  %v1544_v3 = vand.u32 2147483647, %v4475_v57 }
 0x19b   : > { %v1464_v5 = vadd.f32 %v1463_v12, %v4221_v47 }
 0x19c   : > { %v3263_v59 = vpop.eup %3262  ;;  %vm4549_vm1 = vcmp.eq.f32.partialorder %v1544_v3, 8.507059e+37  ;;  %v5266_v3 = vld [vmem:[#allocation46_spill] sm:$0xff] }
 0x19d   : > { %v1636_v49 = vadd.f32 %v1464_v5, %v1378_v21  ;;  %v3265_v58 = vpop.eup %3264  ;;  %v4488_v18 = vadd.f32 1.0, %v3263_v59  ;;  %v5249_v21 = vld [vmem:[#allocation56_spill] sm:$0xff]  ;;  %v1380_v5 = vadd.f32 %v1379_v1, %v4188_v13  ;;  %v1434_v59 = vpop.f32.mrf.mxu2  ;;  %v1504_v13 = vand.u32 2147483647, %v4473_v16 }
 0x19e   : > { %v4490_v23 = vpop.eup %3266  ;;  %v1496_v14 = vmul.f32 %v3265_v58, %v4473_v16  ;;  %v1364_v12 = vadd.f32 %v4443_v10, %v5249_v21  ;;  %v5254_v10 = vld [vmem:[#allocation59_spill] sm:$0xff]  ;;  %vm1501_vm8 = vweird.f32 %v3265_v58  ;;  %v1435_v37 = vadd.f32 %v1434_v59, %v4224_v22 }
 0x19f   : > { %v3059_v38 = vmul.f32 -1.442695, %v1636_v49  ;;  %v3269_v42 = vpop.eup %3268  ;;  %3270 = vrcp.f32 %v4488_v18  ;;  %v5250_v49 = vld [vmem:[#allocation3_spill] sm:$0xff]  ;;  %v1339_v1 = vadd.f32 %v4441_v20, %v5254_v10  ;;  %v1366_v20 = vadd.f32 %v4447_v52, %v5249_v21  ;;  %vm1502_vm10 = vmor %vm1500_vm9, %vm1501_vm8  ;;  %v5259_v52 = vld [vmem:[#allocation41_spill] sm:$0xff] }
 0x1a0   : > { %v1449_v0 = vpop.f32.mrf.mxu3  ;;  %2152 = vmatpush.bf16.msra.mxu0 %v5250_v49  ;;  %v1497_v61 = vsub.f32 1.0, %v1496_v14  ;;  %v4501_v35 = vadd.f32 1.0, %v3269_v42  ;;  %v1536_v14 = vmul.f32 %v4490_v23, %v4475_v57  ;;  %v5255_v42 = vld [vmem:[#allocation37_spill] sm:$0xff]  ;;  %vm1505_vm11 = vcmp.eq.f32.partialorder %v1504_v13, 8.507059e+37 }
 0x1a1   : > { %3272 = vpow2.f32 %v3059_v38  ;;  %v1450_v63 = vadd.f32 %v1449_v0, %v5251_v19  ;;  %1876 = vmatpush.bf16.msrb.mxu2 %v5255_v42  ;;  %v5256_v38 = vld [vmem:[#allocation38_spill] sm:$0xff]  ;;  %vm1541_vm12 = vweird.f32 %v4490_v23  ;;  %vm1515_vm2 = vweird.f32 %v4488_v18 }
 0x1a2   : > { %v1465_v55 = vpop.f32.mrf.mxu0  ;;  %1890 = vmatpush.bf16.msrb.mxu3 %v5256_v38  ;;  %v1498_v0 = vmul.f32 %v3265_v58, %v1497_v61  ;;  %v1537_v62 = vsub.f32 1.0, %v1536_v14  ;;  %3274 = vrcp.f32 %v4501_v35  ;;  %vm4542_vm15 = vmor %vm1540_vm13, %vm1541_vm12  ;;  %vm1555_vm7 = vweird.f32 %v4501_v35 }
 0x1a3   : > { %v1596_v49 = vadd.f32 %v1450_v63, %v1364_v12  ;;  %v1466_v54 = vadd.f32 %v1465_v55, %v4221_v47  ;;  %v1507_v63 = vor.u32 1.1754944e-38, %v1506_v36  ;;  %v5258_v12 = vld [vmem:[#allocation40_spill] sm:$0xff] }
 0x1a4   : > { %v1499_v53 = vadd.f32 %v3265_v58, %v1498_v0  ;;  %v1538_v55 = vmul.f32 %v4490_v23, %v1537_v62 }
 0x1a5   : > { %v3057_v42 = vmul.f32 -1.442695, %v1596_v49  ;;  %v1637_v38 = vadd.f32 %v1466_v54, %v1380_v5  ;;  %v3271_v61 = vpop.eup %3270  ;;  %1877 = vmatpush.bf16.msrb.mxu2 %v5258_v12  ;;  %v1546_v12 = vand.u32 2147483648, %v4475_v57 }
 0x1a6   : > { %1891 = vmatpush.bf16.msrb.mxu3 %v5259_v52  ;;  %v1503_v16 = vsel %vm1502_vm10, %v3265_v58, %v1499_v53  ;;  %v1511_v14 = vmul.f32 %v3271_v61, %v4488_v18  ;;  %v1539_v13 = vadd.f32 %v4490_v23, %v1538_v55  ;;  %v1519_v53 = vand.u32 2147483647, %v4488_v18 }
 0x1a7   : > { %v3273_v59 = vpop.eup %3272  ;;  %3276 = vpow2.f32 %v3057_v42  ;;  %v1508_v5 = vsel %vm1505_vm11, %v1507_v63, %v1503_v16  ;;  %v3060_v62 = vmul.f32 -1.442695, %v1637_v38  ;;  %v1521_v58 = vand.u32 2147483648, %v4488_v18  ;;  %v5260_v42 = vld [vmem:[#allocation43_spill] sm:$0xff]  ;;  %v4574_v16 = vpop.permute.xlu2 %1582 }
 0x1a8   : > { %v1451_v54 = vpop.f32.mrf.mxu3  ;;  %v4527_v0 = vadd.f32 1.0, %v3273_v59  ;;  %v1565_v36 = vmul.f32 %v1508_v5, %v1435_v37  ;;  %v1512_v49 = vsub.f32 1.0, %v1511_v14  ;;  %v4538_v63 = vpop.eup %3274  ;;  %vm1516_vm14 = vweird.f32 %v3271_v61 }
 0x1a9   : > { %v1452_v52 = vadd.f32 %v1451_v54, %v5251_v19  ;;  %1878 = vmatpush.bf16.msrb.mxu2 %v5260_v42  ;;  %v1436_v59 = vpop.f32.mrf.mxu2  ;;  %v1543_v57 = vsel %vm4542_vm15, %v4490_v23, %v1539_v13  ;;  %v1547_v5 = vor.u32 1.1754944e-38, %v1546_v12  ;;  %vm1517_vm3 = vmor %vm1515_vm2, %vm1516_vm14  ;;  %v1551_v55 = vmul.f32 %v4538_v63, %v4501_v35  ;;  %v5265_v23 = vld [vmem:[#allocation45_spill] sm:$0xff] }
 0x1aa   : > { %3278 = vrcp.f32 %v4527_v0  ;;  %1892 = vmatpush.bf16.msrb.mxu3 %v3910_v6  ;;  %v1567_v37 = vadd.f32 %v1565_v36, %v1339_v1  ;;  %v1513_v38 = vmul.f32 %v3271_v61, %v1512_v49  ;;  %v1522_v36 = vor.u32 1.1754944e-38, %v1521_v58 }
 0x1ab   : > { %3280 = vpow2.f32 %v3060_v62  ;;  %v1597_v14 = vadd.f32 %v1452_v52, %v1366_v20  ;;  %v1437_v20 = vadd.f32 %v1436_v59, %v4224_v22  ;;  %vm1520_vm4 = vcmp.eq.f32.partialorder %v1519_v53, 8.507059e+37 }
 0x1ac   : > { %3282 = vtanh.f32 %v1567_v37  ;;  %v1514_v54 = vadd.f32 %v3271_v61, %v1513_v38  ;;  %v1548_v18 = vsel %vm4549_vm1, %v1547_v5, %v1543_v57  ;;  %v1341_v37 = vadd.f32 %v4445_v45, %v5254_v10 }
 0x1ad   : > { %v3277_v1 = vpop.eup %3276  ;;  %v3058_v62 = vmul.f32 -1.442695, %v1597_v14  ;;  %1879 = vmatpush.bf16.msrb.mxu2 %v5265_v23  ;;  %v1571_v14 = vsub.f32 1.0, %v1548_v18  ;;  %v1552_v59 = vsub.f32 1.0, %v1551_v55  ;;  %v1575_v45 = vmul.f32 %v1548_v18, %v4386_v60 }
 0x1ae   : > { %v4554_v49 = vadd.f32 1.0, %v3277_v1  ;;  %1893 = vmatpush.bf16.msrb.mxu3 %v5266_v3  ;;  %v1518_v52 = vsel %vm1517_vm3, %v3271_v61, %v1514_v54  ;;  %vm1587_vm5 = vcmp.eq.s32.totalorder %v4574_v16, 1  ;;  %vm1556_vm6 = vweird.f32 %v4538_v63 }
 0x1af   : > { %v1523_v13 = vsel %vm1520_vm4, %v1522_v36, %v1518_v52  ;;  %v1553_v5 = vmul.f32 %v4538_v63, %v1552_v59  ;;  %v1561_v55 = vand.u32 2147483648, %v4501_v35  ;;  %v1559_v52 = vand.u32 2147483647, %v4501_v35  ;;  %vm4593_vm8 = vmor %vm1555_vm7, %vm1556_vm6  ;;  %v1586_v59 = vpop.permute.xlu2 %1585 }
 0x1b0   : > { %v4563_v12 = vpop.eup %3278  ;;  %3284 = vrcp.f32 %v4554_v49  ;;  %v1566_v38 = vmul.f32 %v1523_v13, %v1437_v20  ;;  %vm1611_vm11 = vweird.f32 %v4554_v49  ;;  %vm1588_vm15 = vcmp.eq.s32.totalorder %v1586_v59, 1 }
 0x1b1   : > { %v3281_v58 = vpop.eup %3280  ;;  %3286 = vpow2.f32 %v3058_v62  ;;  %1880 = vmatpush.bf16.msrb.mxu2 %v5209_v27  ;;  %v1647_v57 = vmul.f32 %v4563_v12, %v4527_v0  ;;  %vm1560_vm10 = vcmp.eq.f32.partialorder %v1559_v52, 8.507059e+37  ;;  %vm1652_vm14 = vweird.f32 %v4563_v12 }
 0x1b2   : > { %v4568_v1 = vadd.f32 1.0, %v3281_v58  ;;  %1894 = vmatpush.bf16.msrb.mxu3 %v5212_v28  ;;  %v3283_v61 = vpop.eup %3282  ;;  %v1568_v53 = vadd.f32 %v1566_v38, %v1341_v37  ;;  %v1554_v37 = vadd.f32 %v4538_v63, %v1553_v5  ;;  %vm1651_vm1 = vweird.f32 %v4527_v0 }
 0x1b3   : > { %v1573_v54 = vmul.f32 %v3283_v61, %v1571_v14  ;;  %v1648_v13 = vsub.f32 1.0, %v1647_v57  ;;  %v1615_v61 = vand.u32 2147483647, %v4554_v49  ;;  %vm4628_vm2 = vmor %vm1651_vm1, %vm1652_vm14 }
 0x1b4   : > { %3288 = vrcp.f32 %v4568_v1  ;;  %v1558_v57 = vsel %vm4593_vm8, %v4538_v63, %v1554_v37 }
 0x1b5   : > { %3290 = vtanh.f32 %v1568_v53  ;;  %v1577_v62 = vadd.f32 %v1575_v45, %v1573_v54  ;;  %1881 = vmatpush.bf16.msrb.mxu2 %v3996_v39  ;;  %v1617_v53 = vand.u32 2147483648, %v4554_v49  ;;  %v1562_v54 = vor.u32 1.1754944e-38, %v1561_v55  ;;  %v1477_v45 = vpop.f32.mrf.mxu1 }
 0x1b6   : > { %v3285_v36 = vpop.eup %3284  ;;  %1895 = vmatpush.bf16.msrb.mxu3 %v4001_v7  ;;  %v1478_v55 = vadd.f32 %v1477_v45, %v4237_v46  ;;  %vm1616_vm13 = vcmp.eq.f32.partialorder %v1615_v61, 8.507059e+37 }
 0x1b7   : > { %v1607_v20 = vmul.f32 %v3285_v36, %v4554_v49  ;;  %v3287_v18 = vpop.eup %3286  ;;  %v1591_v58 = vsel %vm1587_vm5, %v1577_v62, 0.0  ;;  %vm1612_vm9 = vweird.f32 %v3285_v36  ;;  %v1618_v37 = vor.u32 1.1754944e-38, %v1617_v53 }
 0x1b8   : > { %3061 = vst [vmem:[%s3486_s24 + $0x10] sm:$0xff] %v1591_v58  ;;  %v4591_v14 = vadd.f32 1.0, %v3287_v18  ;;  %v1649_v18 = vmul.f32 %v4563_v12, %v1648_v13  ;;  %v1563_v58 = vsel %vm1560_vm10, %v1562_v54, %v1558_v57  ;;  %vm1613_vm12 = vmor %vm1611_vm11, %vm1612_vm9  ;;  %v1392_v53 = vadd.f32 %v4460_v41, %v4326_v34 }
 0x1b9   : > { %v1608_v38 = vsub.f32 1.0, %v1607_v20  ;;  %1882 = vmatpush.bf16.msrb.mxu2 %v4024_v44  ;;  %v1572_v63 = vsub.f32 1.0, %v1563_v58  ;;  %v1576_v57 = vmul.f32 %v1563_v58, %v4390_v29  ;;  %vm1666_vm9 = vweird.f32 %v4568_v1  ;;  %v1694_v58 = vpop.permute.xlu0 %1693 }
 0x1ba   : > { %1896 = vmatpush.bf16.msrb.mxu3 %v4027_v51  ;;  %v4604_v35 = vpop.eup %3288  ;;  %3292 = vrcp.f32 %v4591_v14  ;;  %v1650_v49 = vadd.f32 %v4563_v12, %v1649_v18  ;;  %vm1698_vm11 = vcmp.eq.s32.totalorder %v1694_v58, 1 }
 0x1bb   : > { %v1609_v5 = vmul.f32 %v3285_v36, %v1608_v38  ;;  %v3291_v20 = vpop.eup %3290  ;;  %v1662_v52 = vmul.f32 %v4604_v35, %v4568_v1  ;;  %vm1667_vm8 = vweird.f32 %v4604_v35 }
 0x1bc   : > { %v1574_v13 = vmul.f32 %v3291_v20, %v1572_v63  ;;  %v4625_v20 = vsel %vm1587_vm5, %v1577_v62, %v4386_v60  ;;  %v1654_v60 = vsel %vm4628_vm2, %v4563_v12, %v1650_v49  ;;  %v1632_v62 = vand.u32 2147483648, %v4591_v14  ;;  %vm1668_vm10 = vmor %vm1666_vm9, %vm1667_vm8 }
 0x1bd   : > { %v1610_v7 = vadd.f32 %v3285_v36, %v1609_v5  ;;  %1883 = vmatpush.bf16.msrb.mxu2 %v4048_v50  ;;  %v1655_v5 = vand.u32 2147483647, %v4527_v0  ;;  %v1663_v63 = vsub.f32 1.0, %v1662_v52  ;;  %vm1626_vm5 = vweird.f32 %v4591_v14 }
 0x1be   : > { %1897 = vmatpush.bf16.msrb.mxu3 %v4055_v15  ;;  %v1578_v45 = vadd.f32 %v1576_v57, %v1574_v13  ;;  %v1479_v13 = vpop.f32.mrf.mxu1  ;;  %v1633_v12 = vor.u32 1.1754944e-38, %v1632_v62 }
 0x1bf   : > { %v1614_v38 = vsel %vm1613_vm12, %v3285_v36, %v1610_v7  ;;  %v1657_v7 = vand.u32 2147483648, %v4527_v0  ;;  %vm1656_vm3 = vcmp.eq.f32.partialorder %v1655_v5, 8.507059e+37  ;;  %v1664_v52 = vmul.f32 %v4604_v35, %v1663_v63 }
 0x1c0   : > { %v1619_v54 = vsel %vm1616_vm13, %v1618_v37, %v1614_v38  ;;  %v3293_v61 = vpop.eup %3292  ;;  %v1592_v37 = vsel %vm1588_vm15, %v1578_v45, 0.0  ;;  %v1480_v49 = vadd.f32 %v1479_v13, %v4237_v46 }
 0x1c1   : > { %v1676_v36 = vmul.f32 %v1619_v54, %v1478_v55  ;;  %v1622_v18 = vmul.f32 %v3293_v61, %v4591_v14  ;;  %v4633_v55 = vsel %vm1588_vm15, %v1578_v45, %v4390_v29  ;;  %3062 = vst [vmem:[%s3486_s24 + $0x18] sm:$0xff] %v1592_v37  ;;  %v1658_v16 = vor.u32 1.1754944e-38, %v1657_v7 }
 0x1c2   : > { %v1818_v0 = vpack.c.bf16 %v4633_v55, %v4625_v20  ;;  %vm1627_vm4 = vweird.f32 %v3293_v61  ;;  %v1630_v29 = vand.u32 2147483647, %v4591_v14  ;;  %v1394_v45 = vadd.f32 %v4477_v43, %v4326_v34 }
 0x1c3   : > { %v1678_v41 = vadd.f32 %v1676_v36, %v1392_v53  ;;  %v1623_v38 = vsub.f32 1.0, %v1622_v18  ;;  %v1659_v57 = vsel %vm1656_vm3, %v1658_v16, %v1654_v60  ;;  %vm1628_vm6 = vmor %vm1626_vm5, %vm1627_vm4 }
 0x1c4   : > { %1827 = vmatmul.bf16.vlgmr.msra.gmra.mxu2 %v1818_v0  ;;  %1841 = vmatmul.bf16.vlgmr.msra.gmra.mxu3 %v1818_v0  ;;  %vm1631_vm7 = vcmp.eq.f32.partialorder %v1630_v29, 8.507059e+37  ;;  %v1682_v7 = vsub.f32 1.0, %v1659_v57  ;;  %v1686_v18 = vmul.f32 %v1659_v57, %v4414_v8 }
 0x1c5   : > { %3294 = vtanh.f32 %v1678_v41  ;;  %v1624_v59 = vmul.f32 %v3293_v61, %v1623_v38  ;;  %1855 = vmatmul.bf16.vlgmr.msrb.gmra.mxu0 %v1818_v0  ;;  %2218 = vmatpush.bf16.msra.mxu2 %v3743_v25  ;;  %v1665_v25 = vadd.f32 %v4604_v35, %v1664_v52 }
 0x1c6   : > { %2180 = vmatpush.bf16.msrb.mxu0 %v3540_v17  ;;  %2232 = vmatpush.bf16.msra.mxu3 %v5221_v11  ;;  %v1672_v17 = vand.u32 2147483648, %v4568_v1 }
 0x1c7   : > { %v1625_v54 = vadd.f32 %v3293_v61, %v1624_v59  ;;  %v1669_v63 = vsel %vm1668_vm10, %v4604_v35, %v1665_v25  ;;  %v3187_v25 = vld [vmem:[%s3476_s17 + $0x18] sm:$0xff] }
 0x1c8   : > { %v1673_v37 = vor.u32 1.1754944e-38, %v1672_v17  ;;  %v5281_v17 = vld [vmem:[#allocation9_spill] sm:$0xff] }
 0x1c9   : > { %v1629_v53 = vsel %vm1628_vm6, %v3293_v61, %v1625_v54  ;;  %v1670_v61 = vand.u32 2147483647, %v4568_v1  ;;  %v1697_v1 = vpop.permute.xlu1 %1696  ;;  %v5273_v54 = vld [vmem:[#allocation19_spill] sm:$0xff] }
 0x1ca   : > { %v1634_v14 = vsel %vm1631_vm7, %v1633_v12, %v1629_v53  ;;  %vm1699_vm13 = vcmp.eq.s32.totalorder %v1697_v1, 1  ;;  %v5285_v1 = vld [vmem:[#allocation14_spill] sm:$0xff] }
 0x1cb   : > { %v3295_v36 = vpop.eup %3294  ;;  %v1677_v11 = vmul.f32 %v1634_v14, %v1480_v49  ;;  %vm1671_vm12 = vcmp.eq.f32.partialorder %v1670_v61, 8.507059e+37  ;;  %v5280_v14 = vld [vmem:[#allocation8_spill] sm:$0xff] }
 0x1cc   : > { %v1684_v5 = vmul.f32 %v3295_v36, %v1682_v7  ;;  %v1674_v0 = vsel %vm1671_vm12, %v1673_v37, %v1669_v63  ;;  %v5283_v37 = vld [vmem:[#allocation11_spill] sm:$0xff] }
 0x1cd   : > { %v1679_v41 = vadd.f32 %v1677_v11, %v1394_v45  ;;  %v1683_v60 = vsub.f32 1.0, %v1674_v0  ;;  %v1687_v59 = vmul.f32 %v1674_v0, %v4416_v32 }
 0x1ce   : > { %v1688_v43 = vadd.f32 %v1686_v18, %v1684_v5 }
 0x1cf   : > { %3296 = vtanh.f32 %v1679_v41 }
 0x1d0   : > { %v1702_v38 = vsel %vm1698_vm11, %v1688_v43, 0.0  ;;  %v4661_v52 = vsel %vm1698_vm11, %v1688_v43, %v4414_v8  ;;  %v5271_v8 = vld [vmem:[#allocation16_spill] sm:$0xff]  ;;  %v5282_v43 = vld [vmem:[#allocation58_spill] sm:$0xff] }
 0x1d1   : > { %3063 = vst [vmem:[%s3491_s12 + $0x20] sm:$0xff] %v1702_v38  ;;  %v5284_v38 = vld [vmem:[#allocation12_spill] sm:$0xff] }
 0x1d5   : > { %v3297_v16 = vpop.eup %3296  ;;  %3101 = vmatmul.msk.bf16.vlgmr.msra.gmra.mxu0 %vm583_vm0, %v3187_v25 }
 0x1d6   : > { %v1685_v62 = vmul.f32 %v3297_v16, %v1683_v60  ;;  %2240 = vmatpush.bf16.msra.mxu0 %v5280_v14 }
 0x1d8   : > { %v1689_v29 = vadd.f32 %v1687_v59, %v1685_v62 }
 0x1da   : > { %v4664_v35 = vsel %vm1699_vm13, %v1689_v29, %v4416_v32  ;;  %v1703_v13 = vsel %vm1699_vm13, %v1689_v29, 0.0  ;;  %v5272_v32 = vld [vmem:[#allocation44_spill] sm:$0xff]  ;;  %2241 = vmatpush.bf16.msra.mxu0 %v5283_v37  ;;  %v5286_v29 = vld [vmem:[#allocation15_spill] sm:$0xff] }
 0x1db   : > { %3064 = vst [vmem:[%s3491_s12 + $0x28] sm:$0xff] %v1703_v13  ;;  %v1861_v57 = vpack.c.bf16 %v4664_v35, %v4661_v52 }
 0x1dd   : > { %1870 = vmatmul.bf16.vlgmr.msrb.gmra.mxu1 %v1861_v57  ;;  %1884 = vmatmul.bf16.vlgmr.msrb.gmra.mxu2 %v1861_v57 }
 0x1de   : > { %1898 = vmatmul.bf16.vlgmr.msrb.gmra.mxu3 %v1861_v57  ;;  %2204 = vmatpush.bf16.msrb.mxu1 %v5224_v40  ;;  %v5274_v40 = vld [vmem:[#allocation47_spill] sm:$0xff] }
 0x1df   : > { %2268 = vmatpush.bf16.msrb.mxu2 %v5225_v24  ;;  %2283 = vmatpush.bf16.msrb.mxu3 %v5226_v4  ;;  %v5275_v24 = vld [vmem:[#allocation22_spill] sm:$0xff] }
 0x1e0   : > { %v5276_v4 = vld [vmem:[#allocation50_spill] sm:$0xff]  ;;  %2242 = vmatpush.bf16.msra.mxu0 %v5285_v1 }
 0x1e3   : > { %2269 = vmatpush.bf16.msrb.mxu2 %v5228_v31  ;;  %2284 = vmatpush.bf16.msrb.mxu3 %v5229_v33  ;;  %v5277_v31 = vld [vmem:[#allocation25_spill] sm:$0xff]  ;;  %v5278_v33 = vld [vmem:[#allocation52_spill] sm:$0xff] }
 0x1e5   : > { %3103 = vmatmul.msk.bf16.vlgmr.msrb.gmra.mxu0 %vm583_vm0, %v3187_v25 }
 0x1e7   : > { %2270 = vmatpush.bf16.msrb.mxu2 %v5230_v2  ;;  %2285 = vmatpush.bf16.msrb.mxu3 %v5231_v48  ;;  %v5279_v2 = vld [vmem:[#allocation30_spill] sm:$0xff]  ;;  %v1746_v48 = vpop.f32.mrf.mxu3 }
 0x1e8   : > { %v1747_v58 = vadd.f32 %v1746_v48, %v4142_v30 }
 0x1eb   : > { %2271 = vmatpush.bf16.msrb.mxu2 %v5232_v9  ;;  %2286 = vmatpush.bf16.msrb.mxu3 %v5271_v8  ;;  %v1732_v9 = vpop.f32.mrf.mxu2 }
 0x1ec   : > { %v1733_v5 = vadd.f32 %v1732_v9, %v4136_v56 }
 0x1ed   : > { %3102 = vmatmul.msk.bf16.vlgmr.msra.gmra.mxu1 %vm583_vm0, %v3187_v25  ;;  %v5292_v25 = vld [vmem:[#allocation24_spill] sm:$0xff] }
 0x1ee   : > { %2254 = vmatpush.bf16.msra.mxu1 %v5281_v17 }
 0x1ef   : > { %2272 = vmatpush.bf16.msrb.mxu2 %v5272_v32  ;;  %2287 = vmatpush.bf16.msrb.mxu3 %v5273_v54  ;;  %v1748_v12 = vpop.f32.mrf.mxu3 }
 0x1f0   : > { %v1749_v32 = vadd.f32 %v1748_v12, %v4142_v30  ;;  %v5290_v12 = vld [vmem:[#allocation21_spill] sm:$0xff] }
 0x1f2   : > { %2255 = vmatpush.bf16.msra.mxu1 %v5284_v38 }
 0x1f3   : > { %2273 = vmatpush.bf16.msrb.mxu2 %v5274_v40  ;;  %2288 = vmatpush.bf16.msrb.mxu3 %v5275_v24  ;;  %v1734_v49 = vpop.f32.mrf.mxu2  ;;  %v5287_v24 = vld [vmem:[#allocation17_spill] sm:$0xff] }
 0x1f4   : > { %v1735_v13 = vadd.f32 %v1734_v49, %v4136_v56  ;;  %2243 = vmatpush.bf16.msra.mxu0 %v5287_v24  ;;  %v5289_v49 = vld [vmem:[#allocation20_spill] sm:$0xff] }
 0x1f6   : > { %2256 = vmatpush.bf16.msra.mxu1 %v5286_v29 }
 0x1f7   : > { %2274 = vmatpush.bf16.msrb.mxu2 %v5276_v4  ;;  %2289 = vmatpush.bf16.msrb.mxu3 %v5277_v31  ;;  %v5288_v4 = vld [vmem:[#allocation18_spill] sm:$0xff] }
 0x1f8   : > { %2244 = vmatpush.bf16.msra.mxu0 %v5289_v49  ;;  %v5297_v49 = vld [vmem:[#allocation36_spill] sm:$0xff] }
 0x1fa   : > { %2257 = vmatpush.bf16.msra.mxu1 %v5288_v4 }
 0x1fb   : > { %2275 = vmatpush.bf16.msrb.mxu2 %v5278_v33  ;;  %2290 = vmatpush.bf16.msrb.mxu3 %v5279_v2  ;;  %v4686_v53 = vpop.f32.mrf.mxu2 }
 0x1fe   : > { %2258 = vmatpush.bf16.msra.mxu1 %v5290_v12 }
 0x202   : > { %2259 = vmatpush.bf16.msra.mxu1 %v5292_v25  ;;  %v5298_v25 = vld [vmem:[#allocation37_spill] sm:$0xff] }
 0x203   : > { %v4688_v36 = vpop.f32.mrf.mxu2 }
 0x212   : > { %v1799_v16 = vpop.f32.mrf.mxu0 }
 0x213   : > { %v4697_v11 = vpop.f32.mrf.mxu1 }
 0x219   : > { %v1785_v7 = vpop.f32.mrf.mxu3 }
 0x21a   : > { %v1786_v37 = vadd.f32 %v1785_v7, %v5249_v21 }
 0x21b   : > { %v4713_v31 = vpop.f32.mrf.mxu1 }
 0x221   : > { %v4690_v45 = vpop.f32.mrf.mxu3 }
 0x247   : > { %v1828_v18 = vpop.f32.mrf.mxu2  ;;  %v1842_v61 = vpop.f32.mrf.mxu3 }
 0x248   : > { %v1829_v41 = vadd.f32 %v1828_v18, %v4139_v26  ;;  %v1843_v63 = vadd.f32 %v1842_v61, %v5282_v43  ;;  %v1801_v18 = vpop.f32.mrf.mxu0 }
 0x24a   : > { %v1907_v0 = vadd.f32 %v1829_v41, %v1733_v5  ;;  %v1947_v60 = vadd.f32 %v1843_v63, %v1747_v58  ;;  %v5291_v58 = vld [vmem:[#allocation23_spill] sm:$0xff] }
 0x24b   : > { %2245 = vmatpush.bf16.msra.mxu0 %v5291_v58  ;;  %v3188_v63 = vld [vmem:[%s3481_s21] sm:$0xff] }
 0x24c   : > { %v3083_v62 = vmul.f32 -1.442695, %v1907_v0  ;;  %v3085_v59 = vmul.f32 -1.442695, %v1947_v60  ;;  %3108 = vmatmul.msk.bf16.vlgmr.msrb.gmra.mxu1 %vm583_vm0, %v3188_v63  ;;  %3109 = vmatmul.msk.bf16.vlgmr.msra.gmra.mxu2 %vm583_vm0, %v3188_v63 }
 0x24d   : > { %3110 = vmatmul.msk.bf16.vlgmr.msra.gmra.mxu3 %vm583_vm0, %v3188_v63  ;;  %v1761_v63 = vadd.f32 %v4686_v53, %v5254_v10  ;;  %v5300_v53 = vld [vmem:[#allocation40_spill] sm:$0xff] }
 0x24e   : > { %3298 = vpow2.f32 %v3083_v62  ;;  %v5293_v62 = vld [vmem:[#allocation27_spill] sm:$0xff] }
 0x24f   : > { %3300 = vpow2.f32 %v3085_v59  ;;  %v1830_v57 = vpop.f32.mrf.mxu2  ;;  %v1844_v8 = vpop.f32.mrf.mxu3  ;;  %2246 = vmatpush.bf16.msra.mxu0 %v5293_v62  ;;  %v5294_v59 = vld [vmem:[#allocation29_spill] sm:$0xff] }
 0x250   : > { %v1831_v54 = vadd.f32 %v1830_v57, %v4139_v26  ;;  %v1845_v40 = vadd.f32 %v1844_v8, %v5282_v43  ;;  %2260 = vmatpush.bf16.msra.mxu1 %v5294_v59  ;;  %v1856_v4 = vpop.f32.mrf.mxu0 }
 0x252   : > { %v1908_v33 = vadd.f32 %v1831_v54, %v1735_v13  ;;  %v1948_v2 = vadd.f32 %v1845_v40, %v1749_v32  ;;  %v5295_v40 = vld [vmem:[#allocation60_spill] sm:$0xff] }
 0x253   : > { %v1800_v24 = vadd.f32 %v1799_v16, %v5295_v40 }
 0x254   : > { %v3299_v48 = vpop.eup %3298  ;;  %v3084_v9 = vmul.f32 -1.442695, %v1908_v33  ;;  %v3086_v5 = vmul.f32 -1.442695, %v1948_v2  ;;  %2261 = vmatpush.bf16.msra.mxu1 %v5297_v49 }
 0x255   : > { %v3301_v14 = vpop.eup %3300  ;;  %v1915_v17 = vadd.f32 1.0, %v3299_v48 }
 0x256   : > { %v4718_v61 = vadd.f32 1.0, %v3301_v14  ;;  %3302 = vpow2.f32 %v3084_v9  ;;  %v5296_v9 = vld [vmem:[#allocation33_spill] sm:$0xff] }
 0x257   : > { %3304 = vrcp.f32 %v1915_v17  ;;  %v1926_v2 = vand.u32 2147483647, %v1915_v17  ;;  %2247 = vmatpush.bf16.msra.mxu0 %v5296_v9  ;;  %v1928_v12 = vand.u32 2147483648, %v1915_v17  ;;  %vm1922_vm14 = vweird.f32 %v1915_v17 }
 0x258   : > { %3306 = vrcp.f32 %v4718_v61  ;;  %vm1962_vm2 = vweird.f32 %v4718_v61 }
 0x259   : > { %3308 = vpow2.f32 %v3086_v5  ;;  %vm1927_vm1 = vcmp.eq.f32.partialorder %v1926_v2, 8.507059e+37 }
 0x25a   : > { %v1871_v41 = vpop.f32.mrf.mxu1 }
 0x25b   : > { %v1872_v38 = vadd.f32 %v1871_v41, %v5251_v19  ;;  %2297 = vmatpush.bf16.msrb.mxu0 %v5298_v25  ;;  %v5299_v41 = vld [vmem:[#allocation38_spill] sm:$0xff] }
 0x25c   : > { %v3303_v0 = vpop.eup %3302  ;;  %2311 = vmatpush.bf16.msrb.mxu1 %v5299_v41 }
 0x25d   : > { %v2018_v60 = vadd.f32 %v1872_v38, %v1786_v37  ;;  %v3305_v1 = vpop.eup %3304  ;;  %v4730_v29 = vadd.f32 1.0, %v3303_v0  ;;  %v1802_v37 = vadd.f32 %v1801_v18, %v5295_v40  ;;  %v1788_v38 = vadd.f32 %v4690_v45, %v5249_v21  ;;  %v5301_v18 = vld [vmem:[#allocation41_spill] sm:$0xff] }
 0x25e   : > { %v4733_v13 = vpop.eup %3306  ;;  %v1918_v7 = vmul.f32 %v3305_v1, %v1915_v17  ;;  %vm1923_vm0 = vweird.f32 %v3305_v1  ;;  %v1857_v0 = vadd.f32 %v1856_v4, %v4224_v22 }
 0x25f   : > { %v3087_v57 = vmul.f32 -1.442695, %v2018_v60  ;;  %v3309_v8 = vpop.eup %3308  ;;  %v1958_v32 = vmul.f32 %v4733_v13, %v4718_v61  ;;  %3310 = vrcp.f32 %v4730_v29  ;;  %vm1924_vm15 = vmor %vm1922_vm14, %vm1923_vm0  ;;  %2298 = vmatpush.bf16.msrb.mxu0 %v5300_v53  ;;  %vm1963_vm3 = vweird.f32 %v4733_v13 }
 0x260   : > { %v1885_v54 = vpop.f32.mrf.mxu2  ;;  %v1919_v33 = vsub.f32 1.0, %v1918_v7  ;;  %v4739_v48 = vadd.f32 1.0, %v3309_v8  ;;  %2312 = vmatpush.bf16.msrb.mxu1 %v5301_v18  ;;  %v1941_v4 = vand.u32 2147483647, %v4730_v29  ;;  %vm4781_vm5 = vmor %vm1962_vm2, %vm1963_vm3  ;;  %vm1937_vm6 = vweird.f32 %v4730_v29 }
 0x261   : > { %v1959_v14 = vsub.f32 1.0, %v1958_v32  ;;  %3312 = vpow2.f32 %v3087_v57  ;;  %v1886_v5 = vadd.f32 %v1885_v54, %v4221_v47  ;;  %v1929_v57 = vor.u32 1.1754944e-38, %v1928_v12 }
 0x262   : > { %v1873_v58 = vpop.f32.mrf.mxu1  ;;  %v1920_v16 = vmul.f32 %v3305_v1, %v1919_v33  ;;  %3314 = vrcp.f32 %v4739_v48  ;;  %v1943_v33 = vand.u32 2147483648, %v4730_v29  ;;  %vm1942_vm8 = vcmp.eq.f32.partialorder %v1941_v4, 8.507059e+37  ;;  %v4802_v4 = vpop.permute.xlu2 %2004 }
 0x263   : > { %v2058_v62 = vadd.f32 %v1886_v5, %v1800_v24  ;;  %v1874_v59 = vadd.f32 %v1873_v58, %v5251_v19  ;;  %v1960_v8 = vmul.f32 %v4733_v13, %v1959_v14  ;;  %2299 = vmatpush.bf16.msrb.mxu0 %v5260_v42  ;;  %vm1977_vm11 = vweird.f32 %v4739_v48 }
 0x264   : > { %v1921_v60 = vadd.f32 %v3305_v1, %v1920_v16  ;;  %2313 = vmatpush.bf16.msrb.mxu1 %v3910_v6  ;;  %v1944_v53 = vor.u32 1.1754944e-38, %v1943_v33  ;;  %vm2009_vm12 = vcmp.eq.s32.totalorder %v4802_v4, 1 }
 0x265   : > { %v3311_v7 = vpop.eup %3310  ;;  %v3089_v32 = vmul.f32 -1.442695, %v2058_v62  ;;  %v2019_v2 = vadd.f32 %v1874_v59, %v1788_v38  ;;  %v1858_v38 = vpop.f32.mrf.mxu0  ;;  %v1968_v62 = vand.u32 2147483648, %v4718_v61 }
 0x266   : > { %v1925_v45 = vsel %vm1924_vm15, %v3305_v1, %v1921_v60  ;;  %v1933_v17 = vmul.f32 %v3311_v7, %v4730_v29  ;;  %v1961_v1 = vadd.f32 %v4733_v13, %v1960_v8  ;;  %vm1938_vm4 = vweird.f32 %v3311_v7 }
 0x267   : > { %v3313_v54 = vpop.eup %3312  ;;  %v1930_v24 = vsel %vm1927_vm1, %v1929_v57, %v1925_v45  ;;  %3316 = vpow2.f32 %v3089_v32  ;;  %v3088_v25 = vmul.f32 -1.442695, %v2019_v2  ;;  %v1763_v57 = vadd.f32 %v4688_v36, %v5254_v10  ;;  %vm1939_vm7 = vmor %vm1937_vm6, %vm1938_vm4  ;;  %2300 = vmatpush.bf16.msrb.mxu0 %v5265_v23 }
 0x268   : > { %v1887_v9 = vpop.f32.mrf.mxu2  ;;  %v4762_v49 = vpop.eup %3314  ;;  %v1987_v12 = vmul.f32 %v1930_v24, %v1857_v0  ;;  %v1934_v14 = vsub.f32 1.0, %v1933_v17  ;;  %v4764_v5 = vadd.f32 1.0, %v3313_v54  ;;  %v1966_v0 = vand.u32 2147483647, %v4718_v61  ;;  %2314 = vmatpush.bf16.msrb.mxu1 %v5266_v3 }
 0x269   : > { %v1973_v58 = vmul.f32 %v4762_v49, %v4739_v48  ;;  %v1888_v41 = vadd.f32 %v1887_v9, %v4221_v47  ;;  %v1859_v8 = vadd.f32 %v1858_v38, %v4224_v22  ;;  %v1965_v29 = vsel %vm4781_vm5, %v4733_v13, %v1961_v1 }
 0x26a   : > { %v1989_v16 = vadd.f32 %v1987_v12, %v1761_v63  ;;  %v1935_v60 = vmul.f32 %v3311_v7, %v1934_v14  ;;  %3318 = vrcp.f32 %v4764_v5  ;;  %vm1967_vm9 = vcmp.eq.f32.partialorder %v1966_v0, 8.507059e+37 }
 0x26b   : > { %v1974_v59 = vsub.f32 1.0, %v1973_v58  ;;  %3320 = vpow2.f32 %v3088_v25  ;;  %v2059_v63 = vadd.f32 %v1888_v41, %v1802_v37  ;;  %v1969_v37 = vor.u32 1.1754944e-38, %v1968_v62  ;;  %2301 = vmatpush.bf16.msrb.mxu0 %v5209_v27  ;;  %v1899_v27 = vpop.f32.mrf.mxu3  ;;  %v2008_v62 = vpop.permute.xlu0 %2007 }
 0x26c   : > { %v1936_v42 = vadd.f32 %v3311_v7, %v1935_v60  ;;  %3322 = vtanh.f32 %v1989_v16  ;;  %vm1978_vm10 = vweird.f32 %v4762_v49  ;;  %v1983_v3 = vand.u32 2147483648, %v4739_v48  ;;  %2315 = vmatpush.bf16.msrb.mxu1 %v5212_v28  ;;  %v5306_v60 = vld [vmem:[#allocation51_spill] sm:$0xff] }
 0x26d   : > { %v1975_v18 = vmul.f32 %v4762_v49, %v1974_v59  ;;  %v3317_v36 = vpop.eup %3316  ;;  %v3090_v45 = vmul.f32 -1.442695, %v2059_v63  ;;  %v1970_v13 = vsel %vm1967_vm9, %v1969_v37, %v1965_v29  ;;  %v1981_v9 = vand.u32 2147483647, %v4739_v48  ;;  %vm4811_vm13 = vmor %vm1977_vm11, %vm1978_vm10 }
 0x26e   : > { %v1940_v61 = vsel %vm1939_vm7, %v3311_v7, %v1936_v42  ;;  %v4793_v32 = vadd.f32 1.0, %v3317_v36  ;;  %v2037_v58 = vand.u32 2147483647, %v4764_v5  ;;  %v2039_v25 = vand.u32 2147483648, %v4764_v5 }
 0x26f   : > { %v1945_v17 = vsel %vm1942_vm8, %v1944_v53, %v1940_v61  ;;  %v1976_v33 = vadd.f32 %v4762_v49, %v1975_v18  ;;  %3324 = vpow2.f32 %v3090_v45  ;;  %v1993_v41 = vsub.f32 1.0, %v1970_v13  ;;  %2302 = vmatpush.bf16.msrb.mxu0 %v3996_v39 }
 0x270   : > { %v3319_v54 = vpop.eup %3318  ;;  %v1988_v24 = vmul.f32 %v1945_v17, %v1859_v8  ;;  %3326 = vrcp.f32 %v4793_v32  ;;  %v1984_v16 = vor.u32 1.1754944e-38, %v1983_v3  ;;  %2316 = vmatpush.bf16.msrb.mxu1 %v5306_v60  ;;  %vm1982_vm14 = vcmp.eq.f32.partialorder %v1981_v9, 8.507059e+37 }
 0x271   : > { %v3321_v23 = vpop.eup %3320  ;;  %v2029_v7 = vmul.f32 %v3319_v54, %v4764_v5  ;;  %v1980_v48 = vsel %vm4811_vm13, %v4762_v49, %v1976_v33  ;;  %vm2034_vm0 = vweird.f32 %v3319_v54  ;;  %v1900_v59 = vadd.f32 %v1899_v27, %v4237_v46 }
 0x272   : > { %v1990_v2 = vadd.f32 %v1988_v24, %v1763_v57  ;;  %v4806_v12 = vadd.f32 1.0, %v3321_v23  ;;  %v3323_v14 = vpop.eup %3322  ;;  %v1997_v6 = vmul.f32 %v1970_v13, %v4625_v20  ;;  %vm2010_vm15 = vcmp.eq.s32.totalorder %v2008_v62, 1 }
 0x273   : > { %v2030_v28 = vsub.f32 1.0, %v2029_v7  ;;  %v1995_v57 = vmul.f32 %v3323_v14, %v1993_v41  ;;  %vm2033_vm1 = vweird.f32 %v4764_v5  ;;  %v1985_v8 = vsel %vm1982_vm14, %v1984_v16, %v1980_v48  ;;  %2303 = vmatpush.bf16.msrb.mxu0 %v4024_v44  ;;  %v1901_v48 = vpop.f32.mrf.mxu3 }
 0x274   : > { %3328 = vrcp.f32 %v4806_v12  ;;  %vm2035_vm2 = vmor %vm2033_vm1, %vm2034_vm0  ;;  %vm2038_vm3 = vcmp.eq.f32.partialorder %v2037_v58, 8.507059e+37  ;;  %v2040_v53 = vor.u32 1.1754944e-38, %v2039_v25  ;;  %v2079_v36 = vand.u32 2147483648, %v4793_v32  ;;  %2317 = vmatpush.bf16.msrb.mxu1 %v4027_v51 }
 0x275   : > { %v2031_v38 = vmul.f32 %v3319_v54, %v2030_v28  ;;  %3330 = vtanh.f32 %v1990_v2  ;;  %v3325_v0 = vpop.eup %3324  ;;  %v1999_v18 = vadd.f32 %v1997_v6, %v1995_v57  ;;  %v2077_v45 = vand.u32 2147483647, %v4793_v32 }
 0x276   : > { %v3327_v42 = vpop.eup %3326  ;;  %v4826_v63 = vadd.f32 1.0, %v3325_v0  ;;  %v1814_v29 = vadd.f32 %v4697_v11, %v4326_v34  ;;  %v1994_v24 = vsub.f32 1.0, %v1985_v8  ;;  %vm2073_vm4 = vweird.f32 %v4793_v32  ;;  %v2154_v11 = vpop.f32.mrf.mxu0 }
 0x277   : > { %v2032_v49 = vadd.f32 %v3319_v54, %v2031_v38  ;;  %v2069_v39 = vmul.f32 %v3327_v42, %v4793_v32  ;;  %v1998_v3 = vmul.f32 %v1985_v8, %v4633_v55  ;;  %vm2074_vm5 = vweird.f32 %v3327_v42  ;;  %2304 = vmatpush.bf16.msrb.mxu0 %v4048_v50 }
 0x278   : > { %3332 = vrcp.f32 %v4826_v63  ;;  %v2013_v51 = vsel %vm2009_vm12, %v1999_v18, 0.0  ;;  %v2080_v13 = vor.u32 1.1754944e-38, %v2079_v36  ;;  %vm4842_vm6 = vcmp.eq.f32.partialorder %v2077_v45, 8.507059e+37  ;;  %2318 = vmatpush.bf16.msrb.mxu1 %v4055_v15  ;;  %vm2075_vm8 = vmor %vm2073_vm4, %vm2074_vm5  ;;  %v2116_v45 = vpop.permute.xlu1 %2115 }
 0x279   : > { %v2036_v61 = vsel %vm2035_vm2, %v3319_v54, %v2032_v49  ;;  %v2070_v37 = vsub.f32 1.0, %v2069_v39  ;;  %3091 = vst [vmem:[%s3486_s24 + $0x20] sm:$0xff] %v2013_v51  ;;  %vm2048_vm7 = vweird.f32 %v4806_v12  ;;  %v2054_v1 = vand.u32 2147483648, %v4806_v12 }
 0x27a   : > { %v3329_v5 = vpop.eup %3328  ;;  %v2041_v17 = vsel %vm2038_vm3, %v2040_v53, %v2036_v61  ;;  %v2052_v25 = vand.u32 2147483647, %v4806_v12  ;;  %v4859_v41 = vsel %vm2009_vm12, %v1999_v18, %v4625_v20  ;;  %v1902_v20 = vadd.f32 %v1901_v48, %v4237_v46 }
 0x27b   : > { %v3331_v33 = vpop.eup %3330  ;;  %v2098_v54 = vmul.f32 %v2041_v17, %v1900_v59  ;;  %v2044_v23 = vmul.f32 %v3329_v5, %v4806_v12  ;;  %v2071_v7 = vmul.f32 %v3327_v42, %v2070_v37  ;;  %vm2049_vm9 = vweird.f32 %v3329_v5 }
 0x27c   : > { %v1996_v44 = vmul.f32 %v3331_v33, %v1994_v24  ;;  %vm2050_vm10 = vmor %vm2048_vm7, %vm2049_vm9  ;;  %v2055_v4 = vor.u32 1.1754944e-38, %v2054_v1  ;;  %vm2053_vm11 = vcmp.eq.f32.partialorder %v2052_v25, 8.507059e+37  ;;  %v1816_v49 = vadd.f32 %v4713_v31, %v4326_v34 }
 0x27d   : > { %v2100_v2 = vadd.f32 %v2098_v54, %v1814_v29  ;;  %v2045_v9 = vsub.f32 1.0, %v2044_v23  ;;  %v2072_v14 = vadd.f32 %v3327_v42, %v2071_v7  ;;  %vm2088_vm13 = vweird.f32 %v4826_v63 }
 0x27e   : > { %v2000_v27 = vadd.f32 %v1998_v3, %v1996_v44  ;;  %v3333_v28 = vpop.eup %3332  ;;  %v2094_v12 = vand.u32 2147483648, %v4826_v63  ;;  %v2092_v36 = vand.u32 2147483647, %v4826_v63  ;;  %vm2120_vm14 = vcmp.eq.s32.totalorder %v2116_v45, 1  ;;  %v2119_v3 = vpop.permute.xlu2 %2118 }
 0x27f   : > { %3334 = vtanh.f32 %v2100_v2  ;;  %v2046_v58 = vmul.f32 %v3329_v5, %v2045_v9  ;;  %v2076_v50 = vsel %vm2075_vm8, %v3327_v42, %v2072_v14  ;;  %v2084_v15 = vmul.f32 %v3333_v28, %v4826_v63  ;;  %v2168_v2 = vpop.f32.mrf.mxu1  ;;  %v2156_v9 = vpop.f32.mrf.mxu0 }
 0x280   : > { %v4863_v16 = vsel %vm2010_vm15, %v2000_v27, %v4633_v55  ;;  %v2081_v32 = vsel %vm4842_vm6, %v2080_v13, %v2076_v50  ;;  %v2014_v60 = vsel %vm2010_vm15, %v2000_v27, 0.0  ;;  %vm2089_vm12 = vweird.f32 %v3333_v28 }
 0x281   : > { %v2047_v38 = vadd.f32 %v3329_v5, %v2046_v58  ;;  %v2239_v0 = vpack.c.bf16 %v4863_v16, %v4859_v41  ;;  %v2085_v59 = vsub.f32 1.0, %v2084_v15  ;;  %3092 = vst [vmem:[%s3486_s24 + $0x28] sm:$0xff] %v2014_v60  ;;  %v2104_v55 = vsub.f32 1.0, %v2081_v32  ;;  %vm2090_vm0 = vmor %vm2088_vm13, %vm2089_vm12 }
 0x282   : > { %v2108_v53 = vmul.f32 %v2081_v32, %v4661_v52  ;;  %v2095_v37 = vor.u32 1.1754944e-38, %v2094_v12  ;;  %vm2093_vm15 = vcmp.eq.f32.partialorder %v2092_v36, 8.507059e+37  ;;  %vm2121_vm1 = vcmp.eq.s32.totalorder %v2119_v3, 1 }
 0x283   : > { %v2051_v57 = vsel %vm2050_vm10, %v3329_v5, %v2047_v38  ;;  %2248 = vmatmul.bf16.vlgmr.msra.gmra.mxu0 %v2239_v0  ;;  %2262 = vmatmul.bf16.vlgmr.msra.gmra.mxu1 %v2239_v0  ;;  %v2086_v6 = vmul.f32 %v3333_v28, %v2085_v59  ;;  %v2155_v50 = vadd.f32 %v2154_v11, %v4136_v56 }
 0x284   : > { %v2056_v62 = vsel %vm2053_vm11, %v2055_v4, %v2051_v57  ;;  %2276 = vmatmul.bf16.vlgmr.msrb.gmra.mxu2 %v2239_v0  ;;  %v2169_v15 = vadd.f32 %v2168_v2, %v4142_v30 }
 0x285   : > { %v3335_v42 = vpop.eup %3334  ;;  %v2099_v8 = vmul.f32 %v2056_v62, %v1902_v20  ;;  %v2087_v18 = vadd.f32 %v3333_v28, %v2086_v6  ;;  %v2157_v6 = vadd.f32 %v2156_v9, %v4136_v56 }
 0x286   : > { %v2106_v39 = vmul.f32 %v3335_v42, %v2104_v55 }
 0x287   : > { %v2101_v61 = vadd.f32 %v2099_v8, %v1816_v49  ;;  %v2091_v29 = vsel %vm2090_vm0, %v3333_v28, %v2087_v18  ;;  %v2170_v14 = vpop.f32.mrf.mxu1  ;;  %v2182_v1 = vpop.f32.mrf.mxu0 }
 0x288   : > { %v2110_v5 = vadd.f32 %v2108_v53, %v2106_v39  ;;  %v2096_v17 = vsel %vm2093_vm15, %v2095_v37, %v2091_v29  ;;  %v2171_v62 = vadd.f32 %v2170_v14, %v4142_v30 }
 0x289   : > { %3336 = vtanh.f32 %v2101_v61  ;;  %v2105_v24 = vsub.f32 1.0, %v2096_v17  ;;  %v2109_v23 = vmul.f32 %v2096_v17, %v4664_v35 }
 0x28a   : > { %v2124_v31 = vsel %vm2120_vm14, %v2110_v5, 0.0  ;;  %v4883_v44 = vsel %vm2120_vm14, %v2110_v5, %v4661_v52 }
 0x28b   : > { %3093 = vst [vmem:[%s3491_s12 + $0x10] sm:$0xff] %v2124_v31 }
 0x28f   : > { %v3337_v33 = vpop.eup %3336  ;;  %v4891_v28 = vpop.f32.mrf.mxu0 }
 0x290   : > { %v2107_v54 = vmul.f32 %v3337_v33, %v2105_v24 }
 0x292   : > { %v2111_v63 = vadd.f32 %v2109_v23, %v2107_v54  ;;  %v2183_v23 = vadd.f32 %v2182_v1, %v5254_v10 }
 0x294   : > { %v2125_v7 = vsel %vm2121_vm1, %v2111_v63, 0.0  ;;  %v4886_v51 = vsel %vm2121_vm1, %v2111_v63, %v4664_v35 }
 0x295   : > { %3094 = vst [vmem:[%s3491_s12 + $0x18] sm:$0xff] %v2125_v7  ;;  %v2282_v13 = vpack.c.bf16 %v4886_v51, %v4883_v44 }
 0x297   : > { %2291 = vmatmul.bf16.vlgmr.msrb.gmra.mxu3 %v2282_v13  ;;  %2305 = vmatmul.bf16.vlgmr.msrb.gmra.mxu0 %v2282_v13 }
 0x298   : > { %2319 = vmatmul.bf16.vlgmr.msrb.gmra.mxu1 %v2282_v13 }
 0x2c9   : > { %v2206_v27 = vpop.f32.mrf.mxu1 }
 0x2ca   : > { %v2207_v63 = vadd.f32 %v2206_v27, %v5249_v21 }
 0x2cf   : > { %v2220_v58 = vpop.f32.mrf.mxu2 }
 0x2d0   : > { %v4897_v20 = vpop.f32.mrf.mxu3 }
 0x2d1   : > { %v2208_v52 = vpop.f32.mrf.mxu1 }
 0x2d2   : > { %v4920_v7 = vadd.f32 %v2208_v52, %v5249_v21 }
 0x2d7   : > { %v2222_v4 = vpop.f32.mrf.mxu2 }
 0x2d8   : > { %v4906_v30 = vpop.f32.mrf.mxu3  ;;  %v2223_v1 = vadd.f32 %v2222_v4, %v5295_v40 }
 0x300   : > { %v2249_v25 = vpop.f32.mrf.mxu0  ;;  %v2263_v35 = vpop.f32.mrf.mxu1 }
 0x301   : > { %v2250_v48 = vadd.f32 %v2249_v25, %v4139_v26  ;;  %v2264_v32 = vadd.f32 %v2263_v35, %v5282_v43 }
 0x303   : > { %v2328_v38 = vadd.f32 %v2250_v48, %v2155_v50  ;;  %v2368_v60 = vadd.f32 %v2264_v32, %v2169_v15 }
 0x305   : > { %v3111_v0 = vmul.f32 -1.442695, %v2328_v38  ;;  %v3113_v59 = vmul.f32 -1.442695, %v2368_v60 }
 0x307   : > { %3338 = vpow2.f32 %v3111_v0  ;;  %v2277_v56 = vpop.f32.mrf.mxu2 }
 0x308   : > { %3340 = vpow2.f32 %v3113_v59  ;;  %v2251_v57 = vpop.f32.mrf.mxu0  ;;  %v2265_v55 = vpop.f32.mrf.mxu1  ;;  %v2278_v21 = vadd.f32 %v2277_v56, %v4224_v22 }
 0x309   : > { %v2252_v42 = vadd.f32 %v2251_v57, %v4139_v26  ;;  %v2266_v49 = vadd.f32 %v2265_v55, %v5282_v43  ;;  %v2221_v26 = vadd.f32 %v2220_v58, %v5295_v40 }
 0x30b   : > { %v2329_v12 = vadd.f32 %v2252_v42, %v2157_v6  ;;  %v2369_v8 = vadd.f32 %v2266_v49, %v2171_v62 }
 0x30d   : > { %v3339_v39 = vpop.eup %3338  ;;  %v3112_v53 = vmul.f32 -1.442695, %v2329_v12  ;;  %v3114_v61 = vmul.f32 -1.442695, %v2369_v8 }
 0x30e   : > { %v3341_v18 = vpop.eup %3340  ;;  %v2336_v36 = vadd.f32 1.0, %v3339_v39 }
 0x30f   : > { %v4903_v45 = vadd.f32 1.0, %v3341_v18  ;;  %3342 = vpow2.f32 %v3112_v53  ;;  %v2279_v27 = vpop.f32.mrf.mxu2 }
 0x310   : > { %3344 = vrcp.f32 %v2336_v36  ;;  %v2347_v9 = vand.u32 2147483647, %v2336_v36  ;;  %v2349_v14 = vand.u32 2147483648, %v2336_v36  ;;  %vm2343_vm4 = vweird.f32 %v2336_v36 }
 0x311   : > { %3346 = vrcp.f32 %v4903_v45  ;;  %vm2383_vm3 = vweird.f32 %v4903_v45  ;;  %v2389_v15 = vand.u32 2147483648, %v4903_v45  ;;  %v2387_v60 = vand.u32 2147483647, %v4903_v45 }
 0x312   : > { %3348 = vpow2.f32 %v3114_v61  ;;  %vm2348_vm6 = vcmp.eq.f32.partialorder %v2347_v9, 8.507059e+37  ;;  %v2350_v38 = vor.u32 1.1754944e-38, %v2349_v14  ;;  %v2280_v4 = vadd.f32 %v2279_v27, %v4224_v22 }
 0x313   : > { %v2390_v12 = vor.u32 1.1754944e-38, %v2389_v15  ;;  %vm2388_vm10 = vcmp.eq.f32.partialorder %v2387_v60, 8.507059e+37 }
 0x314   : > { %v2306_v43 = vpop.f32.mrf.mxu0 }
 0x315   : > { %v3343_v5 = vpop.eup %3342  ;;  %v2307_v29 = vadd.f32 %v2306_v43, %v4221_v47 }
 0x316   : > { %v3345_v37 = vpop.eup %3344  ;;  %v4910_v31 = vadd.f32 1.0, %v3343_v5 }
 0x317   : > { %v4912_v17 = vpop.eup %3346  ;;  %v2339_v24 = vmul.f32 %v3345_v37, %v2336_v36  ;;  %v2479_v33 = vadd.f32 %v2307_v29, %v2221_v26  ;;  %vm2344_vm2 = vweird.f32 %v3345_v37 }
 0x318   : > { %v3349_v54 = vpop.eup %3348  ;;  %v2379_v3 = vmul.f32 %v4912_v17, %v4903_v45  ;;  %3350 = vrcp.f32 %v4910_v31  ;;  %vm2345_vm5 = vmor %vm2343_vm4, %vm2344_vm2  ;;  %vm2384_vm7 = vweird.f32 %v4912_v17  ;;  %v2362_v22 = vand.u32 2147483647, %v4910_v31 }
 0x319   : > { %v2340_v13 = vsub.f32 1.0, %v2339_v24  ;;  %v4922_v11 = vadd.f32 1.0, %v3349_v54  ;;  %v3117_v58 = vmul.f32 -1.442695, %v2479_v33  ;;  %v2364_v18 = vand.u32 2147483648, %v4910_v31  ;;  %vm4947_vm9 = vmor %vm2383_vm3, %vm2384_vm7 }
 0x31a   : > { %v2380_v2 = vsub.f32 1.0, %v2379_v3  ;;  %v2292_v25 = vpop.f32.mrf.mxu3  ;;  %vm2358_vm11 = vweird.f32 %v4910_v31  ;;  %vm2363_vm13 = vcmp.eq.f32.partialorder %v2362_v22, 8.507059e+37 }
 0x31b   : > { %v2341_v35 = vmul.f32 %v3345_v37, %v2340_v13  ;;  %3352 = vrcp.f32 %v4922_v11  ;;  %v2293_v32 = vadd.f32 %v2292_v25, %v5251_v19  ;;  %v2404_v9 = vand.u32 2147483648, %v4922_v11 }
 0x31c   : > { %v2381_v50 = vmul.f32 %v4912_v17, %v2380_v2  ;;  %v2308_v52 = vpop.f32.mrf.mxu0  ;;  %3354 = vpow2.f32 %v3117_v58  ;;  %vm2398_vm14 = vweird.f32 %v4922_v11 }
 0x31d   : > { %v2342_v48 = vadd.f32 %v3345_v37, %v2341_v35  ;;  %v2309_v0 = vadd.f32 %v2308_v52, %v4221_v47  ;;  %v2439_v55 = vadd.f32 %v2293_v32, %v2207_v63  ;;  %v2405_v15 = vor.u32 1.1754944e-38, %v2404_v9 }
 0x31e   : > { %v3351_v40 = vpop.eup %3350  ;;  %v2382_v62 = vadd.f32 %v4912_v17, %v2381_v50 }
 0x31f   : > { %v2346_v59 = vsel %vm2345_vm5, %v3345_v37, %v2342_v48  ;;  %v2354_v57 = vmul.f32 %v3351_v40, %v4910_v31  ;;  %v2480_v42 = vadd.f32 %v2309_v0, %v2223_v1  ;;  %v3115_v53 = vmul.f32 -1.442695, %v2439_v55  ;;  %v2426_v48 = vpop.permute.xlu0 %2425 }
 0x320   : > { %v2351_v6 = vsel %vm2348_vm6, %v2350_v38, %v2346_v59  ;;  %vm2359_vm8 = vweird.f32 %v3351_v40  ;;  %v2386_v29 = vsel %vm4947_vm9, %v4912_v17, %v2382_v62  ;;  %v2185_v31 = vadd.f32 %v4891_v28, %v5254_v10 }
 0x321   : > { %v4937_v49 = vpop.eup %3352  ;;  %v2408_v8 = vmul.f32 %v2351_v6, %v2278_v21  ;;  %v2355_v39 = vsub.f32 1.0, %v2354_v57  ;;  %3356 = vpow2.f32 %v3115_v53  ;;  %v3118_v5 = vmul.f32 -1.442695, %v2480_v42  ;;  %vm2360_vm12 = vmor %vm2358_vm11, %vm2359_vm8 }
 0x322   : > { %v2394_v47 = vmul.f32 %v4937_v49, %v4922_v11  ;;  %v2294_v36 = vpop.f32.mrf.mxu3  ;;  %v3355_v61 = vpop.eup %3354  ;;  %v2391_v3 = vsel %vm2388_vm10, %v2390_v12, %v2386_v29  ;;  %vm2399_vm0 = vweird.f32 %v4937_v49  ;;  %v2402_v1 = vand.u32 2147483647, %v4922_v11 }
 0x323   : > { %v2410_v26 = vadd.f32 %v2408_v8, %v2183_v23  ;;  %v2356_v43 = vmul.f32 %v3351_v40, %v2355_v39  ;;  %v4954_v24 = vadd.f32 1.0, %v3355_v61  ;;  %v2295_v33 = vadd.f32 %v2294_v36, %v5251_v19  ;;  %vm4969_vm15 = vmor %vm2398_vm14, %vm2399_vm0 }
 0x324   : > { %v2395_v37 = vsub.f32 1.0, %v2394_v47  ;;  %v2365_v23 = vor.u32 1.1754944e-38, %v2364_v18  ;;  %v2414_v25 = vsub.f32 1.0, %v2391_v3  ;;  %v2418_v28 = vmul.f32 %v2391_v3, %v4859_v41  ;;  %v2320_v47 = vpop.f32.mrf.mxu1 }
 0x325   : > { %3358 = vtanh.f32 %v2410_v26  ;;  %v2357_v45 = vadd.f32 %v3351_v40, %v2356_v43  ;;  %v2440_v63 = vadd.f32 %v2295_v33, %v4920_v7  ;;  %vm2403_vm1 = vcmp.eq.f32.partialorder %v2402_v1, 8.507059e+37 }
 0x326   : > { %v2396_v54 = vmul.f32 %v4937_v49, %v2395_v37  ;;  %3360 = vrcp.f32 %v4954_v24  ;;  %vm2430_vm2 = vcmp.eq.s32.totalorder %v2426_v48, 1  ;;  %vm2494_vm9 = vweird.f32 %v4954_v24 }
 0x327   : > { %v2361_v17 = vsel %vm2360_vm12, %v3351_v40, %v2357_v45  ;;  %3362 = vpow2.f32 %v3118_v5  ;;  %v3357_v2 = vpop.eup %3356  ;;  %v3116_v58 = vmul.f32 -1.442695, %v2440_v63  ;;  %v2321_v45 = vadd.f32 %v2320_v47, %v4237_v46 }
 0x328   : > { %v2366_v19 = vsel %vm2363_vm13, %v2365_v23, %v2361_v17  ;;  %v2397_v13 = vadd.f32 %v4937_v49, %v2396_v54  ;;  %v2447_v35 = vadd.f32 1.0, %v3357_v2  ;;  %v2235_v63 = vadd.f32 %v4897_v20, %v4326_v34 }
 0x329   : > { %v2409_v14 = vmul.f32 %v2366_v19, %v2280_v4  ;;  %3364 = vpow2.f32 %v3116_v58  ;;  %v2500_v19 = vand.u32 2147483648, %v4954_v24 }
 0x32a   : > { %v2401_v52 = vsel %vm4969_vm15, %v4937_v49, %v2397_v13  ;;  %3366 = vrcp.f32 %v2447_v35  ;;  %v2429_v49 = vpop.permute.xlu1 %2428  ;;  %v2460_v22 = vand.u32 2147483648, %v2447_v35  ;;  %v2458_v61 = vand.u32 2147483647, %v2447_v35 }
 0x32b   : > { %v3359_v7 = vpop.eup %3358  ;;  %v2411_v21 = vadd.f32 %v2409_v14, %v2185_v31  ;;  %v2406_v38 = vsel %vm2403_vm1, %v2405_v15, %v2401_v52  ;;  %vm2431_vm3 = vcmp.eq.s32.totalorder %v2429_v49, 1  ;;  %vm2454_vm5 = vweird.f32 %v2447_v35 }
 0x32c   : > { %v4973_v27 = vpop.eup %3360  ;;  %v2416_v10 = vmul.f32 %v3359_v7, %v2414_v25  ;;  %v2415_v55 = vsub.f32 1.0, %v2406_v38  ;;  %v2419_v8 = vmul.f32 %v2406_v38, %v4863_v16  ;;  %v2461_v33 = vor.u32 1.1754944e-38, %v2460_v22  ;;  %v2322_v7 = vpop.f32.mrf.mxu1 }
 0x32d   : > { %v3363_v11 = vpop.eup %3362  ;;  %3368 = vtanh.f32 %v2411_v21  ;;  %v2490_v59 = vmul.f32 %v4973_v27, %v4954_v24  ;;  %vm2459_vm7 = vcmp.eq.f32.partialorder %v2458_v61, 8.507059e+37  ;;  %vm2495_vm8 = vweird.f32 %v4973_v27 }
 0x32e   : > { %v2420_v32 = vadd.f32 %v2418_v28, %v2416_v10  ;;  %v4979_v40 = vadd.f32 1.0, %v3363_v11  ;;  %v2498_v31 = vand.u32 2147483647, %v4954_v24  ;;  %vm5002_vm10 = vmor %vm2494_vm9, %vm2495_vm8  ;;  %v2501_v50 = vor.u32 1.1754944e-38, %v2500_v19 }
 0x32f   : > { %v3365_v4 = vpop.eup %3364  ;;  %v2323_v28 = vadd.f32 %v2322_v7, %v4237_v46  ;;  %v2237_v15 = vadd.f32 %v4906_v30, %v4326_v34 }
 0x330   : > { %v2432_v60 = vsel %vm2430_vm2, %v2420_v32, %v4859_v41  ;;  %v2434_v0 = vsel %vm2430_vm2, %v2420_v32, 0.0  ;;  %3370 = vrcp.f32 %v4979_v40  ;;  %v3367_v57 = vpop.eup %3366  ;;  %v2448_v6 = vadd.f32 1.0, %v3365_v4 }
 0x331   : > { %3119 = vst [vmem:[%s3486_s24 + $0x30] sm:$0xff] %v2434_v0  ;;  %v2450_v42 = vmul.f32 %v3367_v57, %v2447_v35  ;;  %v2491_v41 = vsub.f32 1.0, %v2490_v59  ;;  %vm2455_vm4 = vweird.f32 %v3367_v57  ;;  %vm2499_vm13 = vcmp.eq.f32.partialorder %v2498_v31, 8.507059e+37  ;;  %v2537_v59 = vpop.permute.xlu2 %2536 }
 0x332   : > { %2552 = vst [vmem:[#allocation2 + $0x10] sm:$0xff] %v2432_v60  ;;  %3372 = vrcp.f32 %v2448_v6  ;;  %vm2456_vm6 = vmor %vm2454_vm5, %vm2455_vm4  ;;  %v2475_v9 = vand.u32 2147483648, %v2448_v6  ;;  %v2473_v1 = vand.u32 2147483647, %v2448_v6  ;;  %vm2469_vm12 = vweird.f32 %v2448_v6 }
 0x333   : > { %v3369_v62 = vpop.eup %3368  ;;  %v2451_v39 = vsub.f32 1.0, %v2450_v42  ;;  %v2492_v43 = vmul.f32 %v4973_v27, %v2491_v41  ;;  %v2515_v48 = vand.u32 2147483648, %v4979_v40  ;;  %vm2509_vm1 = vweird.f32 %v4979_v40 }
 0x334   : > { %v2417_v12 = vmul.f32 %v3369_v62, %v2415_v55  ;;  %v2476_v24 = vor.u32 1.1754944e-38, %v2475_v9  ;;  %vm2474_vm14 = vcmp.eq.f32.partialorder %v2473_v1, 8.507059e+37  ;;  %v2513_v60 = vand.u32 2147483647, %v4979_v40 }
 0x335   : > { %v2452_v36 = vmul.f32 %v3367_v57, %v2451_v39  ;;  %vm2541_vm4 = vcmp.eq.s32.totalorder %v2537_v59, 1 }
 0x336   : > { %v2421_v53 = vadd.f32 %v2419_v8, %v2417_v12  ;;  %v4987_v18 = vpop.eup %3370  ;;  %v2540_v12 = vpop.permute.xlu0 %2539 }
 0x337   : > { %v2505_v5 = vmul.f32 %v4987_v18, %v4979_v40  ;;  %v2453_v29 = vadd.f32 %v3367_v57, %v2452_v36  ;;  %vm2510_vm15 = vweird.f32 %v4987_v18  ;;  %vm2542_vm5 = vcmp.eq.s32.totalorder %v2540_v12, 1 }
 0x338   : > { %v2433_v56 = vsel %vm2431_vm3, %v2421_v53, %v4863_v16  ;;  %v2435_v26 = vsel %vm2431_vm3, %v2421_v53, 0.0  ;;  %v3373_v37 = vpop.eup %3372  ;;  %v2493_v16 = vadd.f32 %v4973_v27, %v2492_v43  ;;  %vm2511_vm2 = vmor %vm2509_vm1, %vm2510_vm15  ;;  %vm2514_vm3 = vcmp.eq.f32.partialorder %v2513_v60, 8.507059e+37 }
 0x339   : > { %3120 = vst [vmem:[%s3486_s24 + $0x38] sm:$0xff] %v2435_v26  ;;  %v2457_v54 = vsel %vm2456_vm6, %v3367_v57, %v2453_v29  ;;  %v2465_v23 = vmul.f32 %v3373_v37, %v2448_v6  ;;  %v2506_v17 = vsub.f32 1.0, %v2505_v5  ;;  %vm2470_vm11 = vweird.f32 %v3373_v37 }
 0x33a   : > { %2553 = vst [vmem:[#allocation2] sm:$0xff] %v2433_v56  ;;  %v2462_v3 = vsel %vm2459_vm7, %v2461_v33, %v2457_v54  ;;  %v2497_v20 = vsel %vm5002_vm10, %v4973_v27, %v2493_v16  ;;  %vm2471_vm0 = vmor %vm2469_vm12, %vm2470_vm11  ;;  %v2516_v6 = vor.u32 1.1754944e-38, %v2515_v48 }
 0x33b   : > { %v2519_v13 = vmul.f32 %v2462_v3, %v2321_v45  ;;  %v2466_v2 = vsub.f32 1.0, %v2465_v23  ;;  %v2507_v35 = vmul.f32 %v4987_v18, %v2506_v17  ;;  %v2502_v10 = vsel %vm2499_vm13, %v2501_v50, %v2497_v20 }
 0x33c   : > { %v2525_v38 = vsub.f32 1.0, %v2502_v10  ;;  %v2529_v4 = vmul.f32 %v2502_v10, %v4883_v44 }
 0x33d   : > { %v2521_v58 = vadd.f32 %v2519_v13, %v2235_v63  ;;  %v2467_v25 = vmul.f32 %v3373_v37, %v2466_v2  ;;  %v2508_v11 = vadd.f32 %v4987_v18, %v2507_v35 }
 0x33f   : > { %3374 = vtanh.f32 %v2521_v58  ;;  %v2468_v21 = vadd.f32 %v3373_v37, %v2467_v25  ;;  %v2512_v55 = vsel %vm2511_vm2, %v4987_v18, %v2508_v11 }
 0x340   : > { %v2517_v30 = vsel %vm2514_vm3, %v2516_v6, %v2512_v55 }
 0x341   : > { %v2472_v52 = vsel %vm2471_vm0, %v3373_v37, %v2468_v21  ;;  %v2526_v42 = vsub.f32 1.0, %v2517_v30  ;;  %v2530_v8 = vmul.f32 %v2517_v30, %v4886_v51 }
 0x342   : > { %v2477_v27 = vsel %vm2474_vm14, %v2476_v24, %v2472_v52 }
 0x343   : > { %v2520_v32 = vmul.f32 %v2477_v27, %v2323_v28 }
 0x345   : > { %v3375_v46 = vpop.eup %3374  ;;  %v2522_v0 = vadd.f32 %v2520_v32, %v2237_v15 }
 0x346   : > { %v2527_v57 = vmul.f32 %v3375_v46, %v2525_v38 }
 0x347   : > { %3376 = vtanh.f32 %v2522_v0 }
 0x348   : > { %v2531_v34 = vadd.f32 %v2529_v4, %v2527_v57 }
 0x34a   : > { %v2543_v62 = vsel %vm2541_vm4, %v2531_v34, %v4883_v44  ;;  %v2545_v40 = vsel %vm2541_vm4, %v2531_v34, 0.0 }
 0x34b   : > { %2550 = vst [vmem:[%s3491_s12] sm:$0xff] %v2545_v40 }
 0x34c   : > { %2554 = vst [vmem:[#allocation2 + $0x18] sm:$0xff] %v2543_v62 }
 0x34d   : > { %v3377_v49 = vpop.eup %3376 }
 0x34e   : > { %v2528_v41 = vmul.f32 %v3377_v49, %v2526_v42 }
 0x350   : > { %v2532_v39 = vadd.f32 %v2530_v8, %v2528_v41 }
 0x352   : > { %v2544_v53 = vsel %vm2542_vm5, %v2532_v39, %v4886_v51  ;;  %v2546_v47 = vsel %vm2542_vm5, %v2532_v39, 0.0 }
 0x353   : > { %2551 = vst [vmem:[%s3491_s12 + $0x8] sm:$0xff] %v2546_v47 }
 0x354   : > { %2555 = vst [vmem:[#allocation2 + $0x8] sm:$0xff] %v2544_v53 }
 0x355 PF: > { %s19_s29 = sadd.s32 1, %s3402_s29   ;;  %s5315_s27 = smov %s3398_s28 }
 0x356   : > { %p16_p7 = scmp.ge.s32.totalorder %s19_s29, 4   ;;  %s5316_s28 = smov %s5318_s30 }
 0x358   :  { %18 = sbr.rel (!%p16_p7) target bundleno = 2 (0x2), region = 117 }

</bundles_post_ra>
